<compile_context>
chip_gen: v7x
topology: tpu7x:2x2x1
jax: 0.10.0
libtpu: 0.0.40
codegen_flags: <defaults>
</compile_context>

<pallas_src>
import functools
import math

import jax
import jax.numpy as jnp
from jax import lax
from jax.experimental import pallas as pl
from jax.experimental.pallas import tpu as pltpu


# ----------------------------- in-kernel helpers -----------------------------

def _layernorm(x, gamma, beta, eps=1e-5):
    # x: (..., C) f32; gamma/beta broadcastable (1, C). Stats in f32.
    mu = jnp.mean(x, axis=-1, keepdims=True)
    var = jnp.mean((x - mu) ** 2, axis=-1, keepdims=True)
    return (x - mu) * lax.rsqrt(var + eps) * gamma + beta


def _gelu_tanh(x):
    # matches nn.GELU(approximate='tanh'); computed in f32
    c = math.sqrt(2.0 / math.pi)
    return 0.5 * x * (1.0 + jnp.tanh(c * (x + 0.044715 * x * x * x)))


# -------------------- all transformer blocks in one kernel --------------------

def _blocks_kernel(n_head,
                   x_ref, ln1w, ln1b, wqkv, bqkv, wproj, bproj,
                   ln2w, ln2b, wfc, bfc, wp2, bp2, lnfw, lnfb,
                   h_ref, xres):
    l = pl.program_id(1)

    # Layer 0: seed the VMEM-resident residual stream from the embedding input.
    @pl.when(l == 0)
    def _():
        xres[...] = x_ref[...]

    x = xres[...]                          # (Bb, T, C) f32, resident across layers
    Bb, T, C = x.shape
    H = n_head
    hd = C // H
    scale = 1.0 / math.sqrt(hd)

    def split_heads(a):                    # (Bb*T, C) f32 -> (H*Bb, T, hd) bf16
        parts = [a[:, i * hd:(i + 1) * hd].astype(jnp.bfloat16).reshape(Bb, T, hd)
                 for i in range(H)]
        return jnp.concatenate(parts, axis=0)

    # --- x = x + attn(ln_1(x)) ---
    h1 = _layernorm(x, ln1w[0], ln1b[0])
    qkv = jnp.dot(h1.reshape(Bb * T, C).astype(jnp.bfloat16), wqkv[0],
                  preferred_element_type=jnp.float32) + bqkv[0]    # (Bb*T, 3C) f32

    qh = split_heads(qkv[:, 0 * C:1 * C] * scale)   # scale folded into q (not s)
    kh = split_heads(qkv[:, 1 * C:2 * C])
    vh = split_heads(qkv[:, 2 * C:3 * C])

    row = lax.broadcasted_iota(jnp.int32, (T, T), 0)
    col = lax.broadcasted_iota(jnp.int32, (T, T), 1)
    causal = (col <= row)[None]                     # (1, T, T), hoisted once

    # Single batched matmul over all (head, batch-row) pairs for QK^T and PV.
    s = lax.dot_general(qh, kh, (((2,), (2,)), ((0,), (0,))),
                        preferred_element_type=jnp.float32)        # (H*Bb, T, T)
    s = jnp.where(causal, s, -1e30)                 # f32 scores: -1e30 is safe
    s = s - jnp.max(s, axis=-1, keepdims=True)
    p = jnp.exp(s)
    p = p * pl.reciprocal(jnp.sum(p, axis=-1, keepdims=True), approx=True)
    o = lax.dot_general(p.astype(jnp.bfloat16), vh, (((2,), (1,)), ((0,), (0,))),
                        preferred_element_type=jnp.float32)        # (H*Bb, T, hd)

    # Lane-dense head merge -> ONE (Bb*T, C) x (C, C) output projection.
    y = jnp.concatenate(
        [o[i * Bb:(i + 1) * Bb].reshape(Bb * T, hd) for i in range(H)], axis=-1)
    yp = jnp.dot(y.astype(jnp.bfloat16), wproj[0],
                 preferred_element_type=jnp.float32) + bproj[0]    # (Bb*T, C)
    x = x + yp.reshape(Bb, T, C)

    # --- x = x + mlp(ln_2(x)) ---
    h2 = _layernorm(x, ln2w[0], ln2b[0])
    a = jnp.dot(h2.reshape(Bb * T, C).astype(jnp.bfloat16), wfc[0],
                preferred_element_type=jnp.float32) + bfc[0]       # (Bb*T, 4C)
    g = _gelu_tanh(a)
    m = jnp.dot(g.astype(jnp.bfloat16), wp2[0],
                preferred_element_type=jnp.float32) + bp2[0]       # (Bb*T, C)
    x = x + m.reshape(Bb, T, C)
    xres[...] = x

    # Final LayerNorm computed ONCE (last layer), emitted bf16 for the lm_head.
    @pl.when(l == pl.num_programs(1) - 1)
    def _():
        h_ref[...] = _layernorm(x, lnfw[...], lnfb[...]).astype(jnp.bfloat16)


def _blocks_vmem_estimate(bb, T, C, H, wbytes_layer):
    x_io = 2 * bb * T * C * 4            # f32 embedding input (double-buffered)
    h_io = 2 * bb * T * C * 2            # bf16 LN_f(x) output (double-buffered)
    resident = bb * T * C * 4            # residual-stream scratch
    inter = (bb * T * (3 * C * 6 + 4 * C * 6 + 4 * C * 4)   # qkv / mlp activations
             + H * bb * T * T * 8)                           # scores + probs
    return 2 * wbytes_layer + x_io + h_io + resident + inter


def transformer_blocks(x, blk, lnf_w, lnf_b, n_head, batch_tile=None,
                       weight_buffers=2):
    """Run all n_layer blocks in one pallas_call; x stays resident across layers."""
    B, T, C = x.shape
    L = blk["w_attn"].shape[0]

    order = ["ln1_w", "ln1_b", "w_attn", "b_attn", "w_attnproj", "b_attnproj",
             "ln2_w", "ln2_b", "w_fc", "b_fc", "w_mlpproj", "b_mlpproj"]
    p_arrays = [blk[k] for k in order]
    wbytes_layer = sum(math.prod(a.shape[1:]) * a.dtype.itemsize for a in p_arrays)

    # Batch tile: as large as the (v7x-safe) VMEM budget allows, but keep >=2
    # steps on the parallel batch axis when possible (v7x has 2 TensorCores).
    if batch_tile is None:
        budget = 44 << 20
        divs = [d for d in range(1, B + 1) if B % d == 0]
        fit = [d for d in divs
               if _blocks_vmem_estimate(d, T, C, n_head, wbytes_layer) <= budget]
        fit = fit or [1]
        par = [d for d in fit if B // d >= 2]
        batch_tile = max(par) if par else max(fit)
    Bb = batch_tile
    assert B % Bb == 0
    nb = B // Bb

    big = {"w_attn", "w_fc", "w_mlpproj"}

    def pspec(name, arr):
        rest = arr.shape[1:]
        kwargs = {}
        # Deeper weight prefetch only if requested (exposed DMA at layer
        # boundaries); default 2 keeps standard double-buffering.
        if weight_buffers > 2 and name in big:
            kwargs["pipeline_mode"] = pl.Buffered(weight_buffers)
        return pl.BlockSpec((1,) + rest,
                            lambda b, l, n=len(rest): (l,) + (0,) * n, **kwargs)

    in_specs = ([pl.BlockSpec((Bb, T, C), lambda b, l: (b, 0, 0))]
                + [pspec(k, a) for k, a in zip(order, p_arrays)]
                + [pl.BlockSpec((1, C), lambda b, l: (0, 0)),
                   pl.BlockSpec((1, C), lambda b, l: (0, 0))])

    est = _blocks_vmem_estimate(Bb, T, C, n_head, wbytes_layer)
    # Cap below v7x's 64 MiB physical VMEM to leave compiler headroom.
    vmem_limit = int(min(max(est + (8 << 20), 16 << 20), 56 << 20))

    return pl.pallas_call(
        functools.partial(_blocks_kernel, n_head),
        out_shape=jax.ShapeDtypeStruct((B, T, C), jnp.bfloat16),   # LN_f(x), bf16
        grid=(nb, L),
        in_specs=in_specs,
        out_specs=pl.BlockSpec((Bb, T, C), lambda b, l: (b, 0, 0)),
        scratch_shapes=[pltpu.VMEM((Bb, T, C), jnp.float32)],      # residual stream
        compiler_params=pltpu.CompilerParams(
            dimension_semantics=("parallel", "arbitrary"),
            vmem_limit_bytes=vmem_limit),
    )(x, *p_arrays, lnf_w, lnf_b)


# ---------------------- tied lm_head (vocab-outer, tiled) ----------------------

def _lm_head_kernel(h_ref, wte_ref, out_ref):
    # h is already LayerNorm'ed (computed once in the blocks kernel), bf16.
    out_ref[...] = lax.dot_general(
        h_ref[...], wte_ref[...], (((1,), (1,)), ((), ())),
        preferred_element_type=jnp.float32).astype(out_ref.dtype)


def final_logits(h, wte, tile_v=None, row_tile=None, logits_dtype=jnp.bfloat16):
    B, T, C = h.shape
    V = wte.shape[0]
    R = B * T
    h2 = h.reshape(R, C)

    if tile_v is None:
        tile_v = V
        for cand in (2048, 1024, 512, 384, 256, 128):   # <=2048: fits v7x 64 MiB
            if V % cand == 0:
                tile_v = cand
                break
    assert V % tile_v == 0
    if row_tile is None:
        row_tile = R
        for cand in (512, 256, 128, 64, 32, 16, 8):
            if R % cand == 0:
                row_tile = cand
                break
    assert R % row_tile == 0
    nv, nr = V // tile_v, R // row_tile

    out_bytes = jnp.dtype(logits_dtype).itemsize
    est = (2 * (row_tile * C * 2 + tile_v * C * wte.dtype.itemsize
                + row_tile * tile_v * out_bytes) + row_tile * tile_v * 4)
    vmem_limit = int(min(max(est + (8 << 20), 16 << 20), 56 << 20))

    out = pl.pallas_call(
        _lm_head_kernel,
        out_shape=jax.ShapeDtypeStruct((R, V), logits_dtype),
        # Vocab axis OUTER / rows inner: the tied wte weight streams from HBM
        # exactly once; only the small (row_tile, C) h block is re-fetched.
        grid=(nv, nr),
        in_specs=[pl.BlockSpec((row_tile, C), lambda v, r: (r, 0)),
                  pl.BlockSpec((tile_v, C), lambda v, r: (v, 0))],
        out_specs=pl.BlockSpec((row_tile, tile_v), lambda v, r: (r, v)),
        compiler_params=pltpu.CompilerParams(
            dimension_semantics=("parallel", "parallel"),
            vmem_limit_bytes=vmem_limit),
    )(h2, wte)
    return out.reshape(B, T, V)


# ------------------------------- parameter init -------------------------------

def init_params(key, vocab_size, block_size, n_layer, n_head, n_embd):
    std = 0.02
    proj_std = 0.02 * (2 * n_layer) ** (-0.5)   # NANOGPT_SCALE_INIT layers
    C = n_embd
    keys = jax.random.split(key, 6)
    return {
        # Tied embedding / lm_head weight stored once, in bf16 (MXU operand).
        "wte": (jax.random.normal(keys[0], (vocab_size, C)) * std
                ).astype(jnp.bfloat16),
        "wpe": (jax.random.normal(keys[1], (block_size, C)) * std
                ).astype(jnp.float32),
        "lnf_w": jnp.ones((1, C), jnp.float32),
        "lnf_b": jnp.zeros((1, C), jnp.float32),
        # Per-layer weights stacked on a leading layer axis (single pallas_call
        # iterates over it).  Matmul weights bf16; biases / LN params f32.
        "blk": dict(
            ln1_w=jnp.ones((n_layer, 1, C), jnp.float32),
            ln1_b=jnp.zeros((n_layer, 1, C), jnp.float32),
            w_attn=(jax.random.normal(keys[2], (n_layer, C, 3 * C)) * std
                    ).astype(jnp.bfloat16),
            b_attn=jnp.zeros((n_layer, 1, 3 * C), jnp.float32),
            w_attnproj=(jax.random.normal(keys[3], (n_layer, C, C)) * proj_std
                        ).astype(jnp.bfloat16),
            b_attnproj=jnp.zeros((n_layer, 1, C), jnp.float32),
            ln2_w=jnp.ones((n_layer, 1, C), jnp.float32),
            ln2_b=jnp.zeros((n_layer, 1, C), jnp.float32),
            w_fc=(jax.random.normal(keys[4], (n_layer, C, 4 * C)) * std
                  ).astype(jnp.bfloat16),
            b_fc=jnp.zeros((n_layer, 1, 4 * C), jnp.float32),
            w_mlpproj=(jax.random.normal(keys[5], (n_layer, 4 * C, C)) * proj_std
                       ).astype(jnp.bfloat16),
            b_mlpproj=jnp.zeros((n_layer, 1, C), jnp.float32),
        ),
    }


# --------------------------------- GPT forward --------------------------------

def gpt_forward(idx, params, n_head, logits_dtype=jnp.bfloat16,
                lm_tile_v=None, batch_tile=None):
    """idx: (B, T) int32 token ids -> (logits (B, T, V), loss=None)."""
    B, T = idx.shape
    tok_embed = jnp.take(params["wte"], idx, axis=0).astype(jnp.float32)
    pos_embed = params["wpe"][:T][None, :, :]
    x = tok_embed + pos_embed                                   # (B, T, C) f32
    h = transformer_blocks(x, params["blk"], params["lnf_w"], params["lnf_b"],
                           n_head, batch_tile=batch_tile)       # (B, T, C) bf16
    logits = final_logits(h, params["wte"], tile_v=lm_tile_v,
                          logits_dtype=logits_dtype)
    # TODO(synk): cross-entropy loss path (targets is not None) not implemented;
    # reference forward with targets=None returns loss=None.
    return logits, None


# ------------------------------------ main ------------------------------------

if __name__ == "__main__":
    # Small but lane-dense GPTConfig-like settings (C, 3C, 4C, V all multiples
    # of 128; T a multiple of 8).
    vocab_size = 512
    block_size = 128
    n_layer = 2
    n_head = 4
    n_embd = 128
    B, T = 2, 64

    key = jax.random.PRNGKey(0)
    kp, ki = jax.random.split(key)
    params = init_params(kp, vocab_size, block_size, n_layer, n_head, n_embd)
    idx = jax.random.randint(ki, (B, T), 0, vocab_size, dtype=jnp.int32)

    fwd = jax.jit(functools.partial(gpt_forward, n_head=n_head))
    logits, loss = fwd(idx, params)
    logits = jax.block_until_ready(logits)
    assert logits.shape == (B, T, vocab_size)
    assert loss is None
    assert bool(jnp.isfinite(logits.astype(jnp.float32)).all())
    print("KERNEL_OK")
</pallas_src>

<mosaic_0001>
module attributes {stable_mosaic.version = 11 : i64} {
  func.func @_lm_head_kernel(%arg0: i32, %arg1: i32, %arg2: memref<128x128xbf16, #tpu.memory_space<vmem>>, %arg3: memref<512x128xbf16, #tpu.memory_space<vmem>>, %arg4: memref<128x512xbf16, #tpu.memory_space<vmem>>) attributes {dimension_semantics = [#tpu.dimension_semantics<parallel>, #tpu.dimension_semantics<parallel>], iteration_bounds = array<i64: 1, 1>, scalar_prefetch = 0 : i64, scratch_operands = 0 : i64, tpu.core_type = #tpu.core_type<tc>, window_params = [{transform_indices = @transform_0, window_bounds = array<i64: 128, 128>}, {transform_indices = @transform_1, window_bounds = array<i64: 512, 128>}, {transform_indices = @transform_2, window_bounds = array<i64: 128, 512>}]} {
    %c0 = arith.constant 0 : index
    %c0_0 = arith.constant 0 : index
    %0 = vector.load %arg2[%c0, %c0_0] : memref<128x128xbf16, #tpu.memory_space<vmem>>, vector<128x128xbf16>
    %c0_1 = arith.constant 0 : index
    %c0_2 = arith.constant 0 : index
    %1 = vector.load %arg3[%c0_1, %c0_2] : memref<512x128xbf16, #tpu.memory_space<vmem>>, vector<512x128xbf16>
    %cst = arith.constant dense<0.000000e+00> : vector<128x512xf32>
    %2 = tpu.matmul %0, %1, %cst {dimension_numbers = #tpu.dot_dimension_numbers<[1], [1], [0], [0], [0, 0, 1, 0], [], []>} : vector<128x128xbf16>, vector<512x128xbf16>, vector<128x512xf32> -> vector<128x512xf32>
    %3 = arith.truncf %2 : vector<128x512xf32> to vector<128x512xbf16>
    %c0_3 = arith.constant 0 : index
    %c0_4 = arith.constant 0 : index
    %4 = vector.load %arg4[%c0_3, %c0_4] : memref<128x512xbf16, #tpu.memory_space<vmem>>, vector<128x512xbf16>
    tpu.vector_store %arg4[%c0_3, %c0_4], %3 {strides = array<i32>} : memref<128x512xbf16, #tpu.memory_space<vmem>>, vector<128x512xbf16>,
    return
  }
  func.func @transform_0(%arg0: i32, %arg1: i32) -> (i32, i32) {
    %c0_i32 = arith.constant 0 : i32
    %c0_i32_0 = arith.constant 0 : i32
    return %arg1, %c0_i32 : i32, i32
  }
  func.func @transform_1(%arg0: i32, %arg1: i32) -> (i32, i32) {
    %c0_i32 = arith.constant 0 : i32
    %c0_i32_0 = arith.constant 0 : i32
    return %arg0, %c0_i32 : i32, i32
  }
  func.func @transform_2(%arg0: i32, %arg1: i32) -> (i32, i32) {
    %c0_i32 = arith.constant 0 : i32
    return %arg1, %arg0 : i32, i32
  }
}

module attributes {stable_mosaic.version = 11 : i64} {
  func.func @_blocks_kernel(%arg0: i32, %arg1: i32, %arg2: memref<1x64x128xf32, #tpu.memory_space<vmem>>, %arg3: memref<1x1x128xf32, #tpu.memory_space<vmem>>, %arg4: memref<1x1x128xf32, #tpu.memory_space<vmem>>, %arg5: memref<1x128x384xbf16, #tpu.memory_space<vmem>>, %arg6: memref<1x1x384xf32, #tpu.memory_space<vmem>>, %arg7: memref<1x128x128xbf16, #tpu.memory_space<vmem>>, %arg8: memref<1x1x128xf32, #tpu.memory_space<vmem>>, %arg9: memref<1x1x128xf32, #tpu.memory_space<vmem>>, %arg10: memref<1x1x128xf32, #tpu.memory_space<vmem>>, %arg11: memref<1x128x512xbf16, #tpu.memory_space<vmem>>, %arg12: memref<1x1x512xf32, #tpu.memory_space<vmem>>, %arg13: memref<1x512x128xbf16, #tpu.memory_space<vmem>>, %arg14: memref<1x1x128xf32, #tpu.memory_space<vmem>>, %arg15: memref<1x128xf32, #tpu.memory_space<vmem>>, %arg16: memref<1x128xf32, #tpu.memory_space<vmem>>, %arg17: memref<1x64x128xbf16, #tpu.memory_space<vmem>>, %arg18: memref<1x64x128xf32, #tpu.memory_space<vmem>>) attributes {dimension_semantics = [#tpu.dimension_semantics<parallel>, #tpu.dimension_semantics<arbitrary>], iteration_bounds = array<i64: 2, 2>, scalar_prefetch = 0 : i64, scratch_operands = 1 : i64, tpu.core_type = #tpu.core_type<tc>, window_params = [{transform_indices = @transform_0, window_bounds = array<i64: 1, 64, 128>}, {transform_indices = @transform_1, window_bounds = array<i64: 1, 1, 128>}, {transform_indices = @transform_2, window_bounds = array<i64: 1, 1, 128>}, {transform_indices = @transform_3, window_bounds = array<i64: 1, 128, 384>}, {transform_indices = @transform_4, window_bounds = array<i64: 1, 1, 384>}, {transform_indices = @transform_5, window_bounds = array<i64: 1, 128, 128>}, {transform_indices = @transform_6, window_bounds = array<i64: 1, 1, 128>}, {transform_indices = @transform_7, window_bounds = array<i64: 1, 1, 128>}, {transform_indices = @transform_8, window_bounds = array<i64: 1, 1, 128>}, {transform_indices = @transform_9, window_bounds = array<i64: 1, 128, 512>}, {transform_indices = @transform_10, window_bounds = array<i64: 1, 1, 512>}, {transform_indices = @transform_11, window_bounds = array<i64: 1, 512, 128>}, {transform_indices = @transform_12, window_bounds = array<i64: 1, 1, 128>}, {pipeline_mode = #tpu.pipeline_mode<synchronous>, transform_indices = @transform_13, window_bounds = array<i64: 1, 128>}, {pipeline_mode = #tpu.pipeline_mode<synchronous>, transform_indices = @transform_14, window_bounds = array<i64: 1, 128>}, {transform_indices = @transform_15, window_bounds = array<i64: 1, 64, 128>}]} {
    %c0_i32 = arith.constant 0 : i32
    %0 = arith.cmpi eq, %arg1, %c0_i32 : i32
    %1 = arith.extui %0 : i1 to i32
    %c0_i32_0 = arith.constant 0 : i32
    %2 = arith.cmpi ne, %1, %c0_i32_0 : i32
    scf.if %2 {
      %c0_66 = arith.constant 0 : index
      %c0_67 = arith.constant 0 : index
      %c0_68 = arith.constant 0 : index
      %189 = vector.load %arg2[%c0_66, %c0_67, %c0_68] : memref<1x64x128xf32, #tpu.memory_space<vmem>>, vector<1x64x128xf32>
      %c0_69 = arith.constant 0 : index
      %c0_70 = arith.constant 0 : index
      %c0_71 = arith.constant 0 : index
      %190 = vector.load %arg18[%c0_69, %c0_70, %c0_71] : memref<1x64x128xf32, #tpu.memory_space<vmem>>, vector<1x64x128xf32>
      tpu.vector_store %arg18[%c0_69, %c0_70, %c0_71], %189 {strides = array<i32>} : memref<1x64x128xf32, #tpu.memory_space<vmem>>, vector<1x64x128xf32>,
    } else {
    }
    %c0 = arith.constant 0 : index
    %c0_1 = arith.constant 0 : index
    %c0_2 = arith.constant 0 : index
    %3 = vector.load %arg18[%c0, %c0_1, %c0_2] : memref<1x64x128xf32, #tpu.memory_space<vmem>>, vector<1x64x128xf32>
    %c0_3 = arith.constant 0 : index
    %c0_4 = arith.constant 0 : index
    %c0_5 = arith.constant 0 : index
    %4 = vector.load %arg3[%c0_3, %c0_4, %c0_5] : memref<1x1x128xf32, #tpu.memory_space<vmem>>, vector<1x1x128xf32>
    %5 = vector.shape_cast %4 : vector<1x1x128xf32> to vector<1x128xf32>
    %c0_6 = arith.constant 0 : index
    %c0_7 = arith.constant 0 : index
    %c0_8 = arith.constant 0 : index
    %6 = vector.load %arg4[%c0_6, %c0_7, %c0_8] : memref<1x1x128xf32, #tpu.memory_space<vmem>>, vector<1x1x128xf32>
    %7 = vector.shape_cast %6 : vector<1x1x128xf32> to vector<1x128xf32>
    %cst = arith.constant dense<0.000000e+00> : vector<1x64xf32>
    %8 = vector.multi_reduction <add>, %3, %cst [2] : vector<1x64x128xf32> to vector<1x64xf32>
    %9 = vector.shape_cast %8 : vector<1x64xf32> to vector<1x64x1xf32>
    %cst_9 = arith.constant 1.280000e+02 : f32
    %10 = vector.broadcast %cst_9 : f32 to vector<1x64x1xf32>
    %11 = arith.divf %9, %10 : vector<1x64x1xf32>
    %12 = vector.broadcast %11 : vector<1x64x1xf32> to vector<1x64x128xf32>
    %13 = arith.subf %3, %12 : vector<1x64x128xf32>
    %14 = arith.mulf %13, %13 : vector<1x64x128xf32>
    %cst_10 = arith.constant dense<0.000000e+00> : vector<1x64xf32>
    %15 = vector.multi_reduction <add>, %14, %cst_10 [2] : vector<1x64x128xf32> to vector<1x64xf32>
    %16 = vector.shape_cast %15 : vector<1x64xf32> to vector<1x64x1xf32>
    %cst_11 = arith.constant 1.280000e+02 : f32
    %17 = vector.broadcast %cst_11 : f32 to vector<1x64x1xf32>
    %18 = arith.divf %16, %17 : vector<1x64x1xf32>
    %19 = vector.broadcast %11 : vector<1x64x1xf32> to vector<1x64x128xf32>
    %20 = arith.subf %3, %19 : vector<1x64x128xf32>
    %cst_12 = arith.constant 9.99999974E-6 : f32
    %21 = vector.broadcast %cst_12 : f32 to vector<1x64x1xf32>
    %22 = arith.addf %18, %21 : vector<1x64x1xf32>
    %23 = math.rsqrt %22 : vector<1x64x1xf32>
    %24 = vector.broadcast %23 : vector<1x64x1xf32> to vector<1x64x128xf32>
    %25 = arith.mulf %20, %24 : vector<1x64x128xf32>
    %26 = vector.shape_cast %5 : vector<1x128xf32> to vector<1x1x128xf32>
    %27 = vector.broadcast %26 : vector<1x1x128xf32> to vector<1x64x128xf32>
    %28 = arith.mulf %25, %27 : vector<1x64x128xf32>
    %29 = vector.shape_cast %7 : vector<1x128xf32> to vector<1x1x128xf32>
    %30 = vector.broadcast %29 : vector<1x1x128xf32> to vector<1x64x128xf32>
    %31 = arith.addf %28, %30 : vector<1x64x128xf32>
    %32 = vector.shape_cast %31 : vector<1x64x128xf32> to vector<64x128xf32>
    %33 = arith.truncf %32 : vector<64x128xf32> to vector<64x128xbf16>
    %c0_13 = arith.constant 0 : index
    %c0_14 = arith.constant 0 : index
    %c0_15 = arith.constant 0 : index
    %34 = vector.load %arg5[%c0_13, %c0_14, %c0_15] : memref<1x128x384xbf16, #tpu.memory_space<vmem>>, vector<1x128x384xbf16>
    %35 = vector.shape_cast %34 : vector<1x128x384xbf16> to vector<128x384xbf16>
    %cst_16 = arith.constant dense<0.000000e+00> : vector<64x384xf32>
    %36 = tpu.matmul %33, %35, %cst_16 {dimension_numbers = #tpu.dot_dimension_numbers<[1], [0], [0], [1], [0, 0, 1, 1], [], []>} : vector<64x128xbf16>, vector<128x384xbf16>, vector<64x384xf32> -> vector<64x384xf32>
    %c0_17 = arith.constant 0 : index
    %c0_18 = arith.constant 0 : index
    %c0_19 = arith.constant 0 : index
    %37 = vector.load %arg6[%c0_17, %c0_18, %c0_19] : memref<1x1x384xf32, #tpu.memory_space<vmem>>, vector<1x1x384xf32>
    %38 = vector.shape_cast %37 : vector<1x1x384xf32> to vector<1x384xf32>
    %39 = vector.broadcast %38 : vector<1x384xf32> to vector<64x384xf32>
    %40 = arith.addf %36, %39 : vector<64x384xf32>
    %41 = vector.extract_strided_slice %40 {offsets = [0, 0], sizes = [64, 128], strides = [1, 1]} : vector<64x384xf32> to vector<64x128xf32>
    %cst_20 = arith.constant 0.176776692 : f32
    %42 = vector.broadcast %cst_20 : f32 to vector<64x128xf32>
    %43 = arith.mulf %41, %42 : vector<64x128xf32>
    %44 = vector.extract_strided_slice %43 {offsets = [0, 0], sizes = [64, 32], strides = [1, 1]} : vector<64x128xf32> to vector<64x32xf32>
    %45 = arith.truncf %44 : vector<64x32xf32> to vector<64x32xbf16>
    %46 = vector.shape_cast %45 : vector<64x32xbf16> to vector<1x64x32xbf16>
    %47 = vector.extract_strided_slice %43 {offsets = [0, 32], sizes = [64, 32], strides = [1, 1]} : vector<64x128xf32> to vector<64x32xf32>
    %48 = arith.truncf %47 : vector<64x32xf32> to vector<64x32xbf16>
    %49 = vector.shape_cast %48 : vector<64x32xbf16> to vector<1x64x32xbf16>
    %50 = vector.extract_strided_slice %43 {offsets = [0, 64], sizes = [64, 32], strides = [1, 1]} : vector<64x128xf32> to vector<64x32xf32>
    %51 = arith.truncf %50 : vector<64x32xf32> to vector<64x32xbf16>
    %52 = vector.shape_cast %51 : vector<64x32xbf16> to vector<1x64x32xbf16>
    %53 = vector.extract_strided_slice %43 {offsets = [0, 96], sizes = [64, 32], strides = [1, 1]} : vector<64x128xf32> to vector<64x32xf32>
    %54 = arith.truncf %53 : vector<64x32xf32> to vector<64x32xbf16>
    %55 = vector.shape_cast %54 : vector<64x32xbf16> to vector<1x64x32xbf16>
    %56 = tpu.concatenate %46, %49, %52, %55 in 0 : vector<1x64x32xbf16>, vector<1x64x32xbf16>, vector<1x64x32xbf16>, vector<1x64x32xbf16> -> vector<4x64x32xbf16>
    %57 = vector.extract_strided_slice %40 {offsets = [0, 128], sizes = [64, 128], strides = [1, 1]} : vector<64x384xf32> to vector<64x128xf32>
    %58 = vector.extract_strided_slice %57 {offsets = [0, 0], sizes = [64, 32], strides = [1, 1]} : vector<64x128xf32> to vector<64x32xf32>
    %59 = arith.truncf %58 : vector<64x32xf32> to vector<64x32xbf16>
    %60 = vector.shape_cast %59 : vector<64x32xbf16> to vector<1x64x32xbf16>
    %61 = vector.extract_strided_slice %57 {offsets = [0, 32], sizes = [64, 32], strides = [1, 1]} : vector<64x128xf32> to vector<64x32xf32>
    %62 = arith.truncf %61 : vector<64x32xf32> to vector<64x32xbf16>
    %63 = vector.shape_cast %62 : vector<64x32xbf16> to vector<1x64x32xbf16>
    %64 = vector.extract_strided_slice %57 {offsets = [0, 64], sizes = [64, 32], strides = [1, 1]} : vector<64x128xf32> to vector<64x32xf32>
    %65 = arith.truncf %64 : vector<64x32xf32> to vector<64x32xbf16>
    %66 = vector.shape_cast %65 : vector<64x32xbf16> to vector<1x64x32xbf16>
    %67 = vector.extract_strided_slice %57 {offsets = [0, 96], sizes = [64, 32], strides = [1, 1]} : vector<64x128xf32> to vector<64x32xf32>
    %68 = arith.truncf %67 : vector<64x32xf32> to vector<64x32xbf16>
    %69 = vector.shape_cast %68 : vector<64x32xbf16> to vector<1x64x32xbf16>
    %70 = tpu.concatenate %60, %63, %66, %69 in 0 : vector<1x64x32xbf16>, vector<1x64x32xbf16>, vector<1x64x32xbf16>, vector<1x64x32xbf16> -> vector<4x64x32xbf16>
    %71 = vector.extract_strided_slice %40 {offsets = [0, 256], sizes = [64, 128], strides = [1, 1]} : vector<64x384xf32> to vector<64x128xf32>
    %72 = vector.extract_strided_slice %71 {offsets = [0, 0], sizes = [64, 32], strides = [1, 1]} : vector<64x128xf32> to vector<64x32xf32>
    %73 = arith.truncf %72 : vector<64x32xf32> to vector<64x32xbf16>
    %74 = vector.shape_cast %73 : vector<64x32xbf16> to vector<1x64x32xbf16>
    %75 = vector.extract_strided_slice %71 {offsets = [0, 32], sizes = [64, 32], strides = [1, 1]} : vector<64x128xf32> to vector<64x32xf32>
    %76 = arith.truncf %75 : vector<64x32xf32> to vector<64x32xbf16>
    %77 = vector.shape_cast %76 : vector<64x32xbf16> to vector<1x64x32xbf16>
    %78 = vector.extract_strided_slice %71 {offsets = [0, 64], sizes = [64, 32], strides = [1, 1]} : vector<64x128xf32> to vector<64x32xf32>
    %79 = arith.truncf %78 : vector<64x32xf32> to vector<64x32xbf16>
    %80 = vector.shape_cast %79 : vector<64x32xbf16> to vector<1x64x32xbf16>
    %81 = vector.extract_strided_slice %71 {offsets = [0, 96], sizes = [64, 32], strides = [1, 1]} : vector<64x128xf32> to vector<64x32xf32>
    %82 = arith.truncf %81 : vector<64x32xf32> to vector<64x32xbf16>
    %83 = vector.shape_cast %82 : vector<64x32xbf16> to vector<1x64x32xbf16>
    %84 = tpu.concatenate %74, %77, %80, %83 in 0 : vector<1x64x32xbf16>, vector<1x64x32xbf16>, vector<1x64x32xbf16>, vector<1x64x32xbf16> -> vector<4x64x32xbf16>
    %85 = tpu.iota {dimensions = array<i32: 0>} : vector<64x64xi32>
    %86 = tpu.iota {dimensions = array<i32: 1>} : vector<64x64xi32>
    %87 = arith.cmpi sle, %86, %85 : vector<64x64xi32>
    %88 = vector.shape_cast %87 : vector<64x64xi1> to vector<1x64x64xi1>
    %cst_21 = arith.constant dense<0.000000e+00> : vector<4x64x64xf32>
    %89 = tpu.matmul %56, %70, %cst_21 {dimension_numbers = #tpu.dot_dimension_numbers<[2], [2], [1], [1], [0, 0, 0, 1, 1, 1], [0], [0]>} : vector<4x64x32xbf16>, vector<4x64x32xbf16>, vector<4x64x64xf32> -> vector<4x64x64xf32>
    %cst_22 = arith.constant -1.000000e+30 : f32
    %90 = vector.shape_cast %88 : vector<1x64x64xi1> to vector<1x64x64xi1>
    %91 = vector.broadcast %90 : vector<1x64x64xi1> to vector<4x64x64xi1>
    %92 = vector.broadcast %cst_22 : f32 to vector<4x64x64xf32>
    %93 = arith.select %91, %89, %92 : vector<4x64x64xi1>, vector<4x64x64xf32>
    %cst_23 = arith.constant dense<0xFF800000> : vector<4x64xf32>
    %94 = vector.multi_reduction <maximumf>, %93, %cst_23 [2] : vector<4x64x64xf32> to vector<4x64xf32>
    %95 = vector.shape_cast %94 : vector<4x64xf32> to vector<4x64x1xf32>
    %96 = vector.broadcast %95 : vector<4x64x1xf32> to vector<4x64x64xf32>
    %97 = arith.subf %93, %96 : vector<4x64x64xf32>
    %98 = math.exp %97 : vector<4x64x64xf32>
    %cst_24 = arith.constant dense<0.000000e+00> : vector<4x64xf32>
    %99 = vector.multi_reduction <add>, %98, %cst_24 [2] : vector<4x64x64xf32> to vector<4x64xf32>
    %100 = vector.shape_cast %99 : vector<4x64xf32> to vector<4x64x1xf32>
    %101 = tpu.reciprocal %100 {approx = true} : vector<4x64x1xf32> -> vector<4x64x1xf32>
    %102 = vector.broadcast %101 : vector<4x64x1xf32> to vector<4x64x64xf32>
    %103 = arith.mulf %98, %102 : vector<4x64x64xf32>
    %104 = arith.truncf %103 : vector<4x64x64xf32> to vector<4x64x64xbf16>
    %cst_25 = arith.constant dense<0.000000e+00> : vector<4x64x32xf32>
    %105 = tpu.matmul %104, %84, %cst_25 {dimension_numbers = #tpu.dot_dimension_numbers<[2], [1], [1], [2], [0, 0, 0, 1, 1, 2], [0], [0]>} : vector<4x64x64xbf16>, vector<4x64x32xbf16>, vector<4x64x32xf32> -> vector<4x64x32xf32>
    %106 = vector.extract_strided_slice %105 {offsets = [0, 0, 0], sizes = [1, 64, 32], strides = [1, 1, 1]} : vector<4x64x32xf32> to vector<1x64x32xf32>
    %107 = vector.shape_cast %106 : vector<1x64x32xf32> to vector<64x32xf32>
    %108 = vector.extract_strided_slice %105 {offsets = [1, 0, 0], sizes = [1, 64, 32], strides = [1, 1, 1]} : vector<4x64x32xf32> to vector<1x64x32xf32>
    %109 = vector.shape_cast %108 : vector<1x64x32xf32> to vector<64x32xf32>
    %110 = vector.extract_strided_slice %105 {offsets = [2, 0, 0], sizes = [1, 64, 32], strides = [1, 1, 1]} : vector<4x64x32xf32> to vector<1x64x32xf32>
    %111 = vector.shape_cast %110 : vector<1x64x32xf32> to vector<64x32xf32>
    %112 = vector.extract_strided_slice %105 {offsets = [3, 0, 0], sizes = [1, 64, 32], strides = [1, 1, 1]} : vector<4x64x32xf32> to vector<1x64x32xf32>
    %113 = vector.shape_cast %112 : vector<1x64x32xf32> to vector<64x32xf32>
    %114 = tpu.concatenate %107, %109, %111, %113 in 1 : vector<64x32xf32>, vector<64x32xf32>, vector<64x32xf32>, vector<64x32xf32> -> vector<64x128xf32>
    %115 = arith.truncf %114 : vector<64x128xf32> to vector<64x128xbf16>
    %c0_26 = arith.constant 0 : index
    %c0_27 = arith.constant 0 : index
    %c0_28 = arith.constant 0 : index
    %116 = vector.load %arg7[%c0_26, %c0_27, %c0_28] : memref<1x128x128xbf16, #tpu.memory_space<vmem>>, vector<1x128x128xbf16>
    %117 = vector.shape_cast %116 : vector<1x128x128xbf16> to vector<128x128xbf16>
    %cst_29 = arith.constant dense<0.000000e+00> : vector<64x128xf32>
    %118 = tpu.matmul %115, %117, %cst_29 {dimension_numbers = #tpu.dot_dimension_numbers<[1], [0], [0], [1], [0, 0, 1, 1], [], []>} : vector<64x128xbf16>, vector<128x128xbf16>, vector<64x128xf32> -> vector<64x128xf32>
    %c0_30 = arith.constant 0 : index
    %c0_31 = arith.constant 0 : index
    %c0_32 = arith.constant 0 : index
    %119 = vector.load %arg8[%c0_30, %c0_31, %c0_32] : memref<1x1x128xf32, #tpu.memory_space<vmem>>, vector<1x1x128xf32>
    %120 = vector.shape_cast %119 : vector<1x1x128xf32> to vector<1x128xf32>
    %121 = vector.broadcast %120 : vector<1x128xf32> to vector<64x128xf32>
    %122 = arith.addf %118, %121 : vector<64x128xf32>
    %123 = vector.shape_cast %122 : vector<64x128xf32> to vector<1x64x128xf32>
    %124 = arith.addf %3, %123 : vector<1x64x128xf32>
    %c0_33 = arith.constant 0 : index
    %c0_34 = arith.constant 0 : index
    %c0_35 = arith.constant 0 : index
    %125 = vector.load %arg9[%c0_33, %c0_34, %c0_35] : memref<1x1x128xf32, #tpu.memory_space<vmem>>, vector<1x1x128xf32>
    %126 = vector.shape_cast %125 : vector<1x1x128xf32> to vector<1x128xf32>
    %c0_36 = arith.constant 0 : index
    %c0_37 = arith.constant 0 : index
    %c0_38 = arith.constant 0 : index
    %127 = vector.load %arg10[%c0_36, %c0_37, %c0_38] : memref<1x1x128xf32, #tpu.memory_space<vmem>>, vector<1x1x128xf32>
    %128 = vector.shape_cast %127 : vector<1x1x128xf32> to vector<1x128xf32>
    %cst_39 = arith.constant dense<0.000000e+00> : vector<1x64xf32>
    %129 = vector.multi_reduction <add>, %124, %cst_39 [2] : vector<1x64x128xf32> to vector<1x64xf32>
    %130 = vector.shape_cast %129 : vector<1x64xf32> to vector<1x64x1xf32>
    %cst_40 = arith.constant 1.280000e+02 : f32
    %131 = vector.broadcast %cst_40 : f32 to vector<1x64x1xf32>
    %132 = arith.divf %130, %131 : vector<1x64x1xf32>
    %133 = vector.broadcast %132 : vector<1x64x1xf32> to vector<1x64x128xf32>
    %134 = arith.subf %124, %133 : vector<1x64x128xf32>
    %135 = arith.mulf %134, %134 : vector<1x64x128xf32>
    %cst_41 = arith.constant dense<0.000000e+00> : vector<1x64xf32>
    %136 = vector.multi_reduction <add>, %135, %cst_41 [2] : vector<1x64x128xf32> to vector<1x64xf32>
    %137 = vector.shape_cast %136 : vector<1x64xf32> to vector<1x64x1xf32>
    %cst_42 = arith.constant 1.280000e+02 : f32
    %138 = vector.broadcast %cst_42 : f32 to vector<1x64x1xf32>
    %139 = arith.divf %137, %138 : vector<1x64x1xf32>
    %140 = vector.broadcast %132 : vector<1x64x1xf32> to vector<1x64x128xf32>
    %141 = arith.subf %124, %140 : vector<1x64x128xf32>
    %cst_43 = arith.constant 9.99999974E-6 : f32
    %142 = vector.broadcast %cst_43 : f32 to vector<1x64x1xf32>
    %143 = arith.addf %139, %142 : vector<1x64x1xf32>
    %144 = math.rsqrt %143 : vector<1x64x1xf32>
    %145 = vector.broadcast %144 : vector<1x64x1xf32> to vector<1x64x128xf32>
    %146 = arith.mulf %141, %145 : vector<1x64x128xf32>
    %147 = vector.shape_cast %126 : vector<1x128xf32> to vector<1x1x128xf32>
    %148 = vector.broadcast %147 : vector<1x1x128xf32> to vector<1x64x128xf32>
    %149 = arith.mulf %146, %148 : vector<1x64x128xf32>
    %150 = vector.shape_cast %128 : vector<1x128xf32> to vector<1x1x128xf32>
    %151 = vector.broadcast %150 : vector<1x1x128xf32> to vector<1x64x128xf32>
    %152 = arith.addf %149, %151 : vector<1x64x128xf32>
    %153 = vector.shape_cast %152 : vector<1x64x128xf32> to vector<64x128xf32>
    %154 = arith.truncf %153 : vector<64x128xf32> to vector<64x128xbf16>
    %c0_44 = arith.constant 0 : index
    %c0_45 = arith.constant 0 : index
    %c0_46 = arith.constant 0 : index
    %155 = vector.load %arg11[%c0_44, %c0_45, %c0_46] : memref<1x128x512xbf16, #tpu.memory_space<vmem>>, vector<1x128x512xbf16>
    %156 = vector.shape_cast %155 : vector<1x128x512xbf16> to vector<128x512xbf16>
    %cst_47 = arith.constant dense<0.000000e+00> : vector<64x512xf32>
    %157 = tpu.matmul %154, %156, %cst_47 {dimension_numbers = #tpu.dot_dimension_numbers<[1], [0], [0], [1], [0, 0, 1, 1], [], []>} : vector<64x128xbf16>, vector<128x512xbf16>, vector<64x512xf32> -> vector<64x512xf32>
    %c0_48 = arith.constant 0 : index
    %c0_49 = arith.constant 0 : index
    %c0_50 = arith.constant 0 : index
    %158 = vector.load %arg12[%c0_48, %c0_49, %c0_50] : memref<1x1x512xf32, #tpu.memory_space<vmem>>, vector<1x1x512xf32>
    %159 = vector.shape_cast %158 : vector<1x1x512xf32> to vector<1x512xf32>
    %160 = vector.broadcast %159 : vector<1x512xf32> to vector<64x512xf32>
    %161 = arith.addf %157, %160 : vector<64x512xf32>
    %cst_51 = arith.constant 5.000000e-01 : f32
    %162 = vector.broadcast %cst_51 : f32 to vector<64x512xf32>
    %163 = arith.mulf %162, %161 : vector<64x512xf32>
    %cst_52 = arith.constant 4.471500e-02 : f32
    %164 = vector.broadcast %cst_52 : f32 to vector<64x512xf32>
    %165 = arith.mulf %164, %161 : vector<64x512xf32>
    %166 = arith.mulf %165, %161 : vector<64x512xf32>
    %167 = arith.mulf %166, %161 : vector<64x512xf32>
    %168 = arith.addf %161, %167 : vector<64x512xf32>
    %cst_53 = arith.constant 0.797884583 : f32
    %169 = vector.broadcast %cst_53 : f32 to vector<64x512xf32>
    %170 = arith.mulf %169, %168 : vector<64x512xf32>
    %171 = math.tanh %170 : vector<64x512xf32>
    %cst_54 = arith.constant 1.000000e+00 : f32
    %172 = vector.broadcast %cst_54 : f32 to vector<64x512xf32>
    %173 = arith.addf %172, %171 : vector<64x512xf32>
    %174 = arith.mulf %163, %173 : vector<64x512xf32>
    %175 = arith.truncf %174 : vector<64x512xf32> to vector<64x512xbf16>
    %c0_55 = arith.constant 0 : index
    %c0_56 = arith.constant 0 : index
    %c0_57 = arith.constant 0 : index
    %176 = vector.load %arg13[%c0_55, %c0_56, %c0_57] : memref<1x512x128xbf16, #tpu.memory_space<vmem>>, vector<1x512x128xbf16>
    %177 = vector.shape_cast %176 : vector<1x512x128xbf16> to vector<512x128xbf16>
    %cst_58 = arith.constant dense<0.000000e+00> : vector<64x128xf32>
    %178 = tpu.matmul %175, %177, %cst_58 {dimension_numbers = #tpu.dot_dimension_numbers<[1], [0], [0], [1], [0, 0, 1, 1], [], []>} : vector<64x512xbf16>, vector<512x128xbf16>, vector<64x128xf32> -> vector<64x128xf32>
    %c0_59 = arith.constant 0 : index
    %c0_60 = arith.constant 0 : index
    %c0_61 = arith.constant 0 : index
    %179 = vector.load %arg14[%c0_59, %c0_60, %c0_61] : memref<1x1x128xf32, #tpu.memory_space<vmem>>, vector<1x1x128xf32>
    %180 = vector.shape_cast %179 : vector<1x1x128xf32> to vector<1x128xf32>
    %181 = vector.broadcast %180 : vector<1x128xf32> to vector<64x128xf32>
    %182 = arith.addf %178, %181 : vector<64x128xf32>
    %183 = vector.shape_cast %182 : vector<64x128xf32> to vector<1x64x128xf32>
    %184 = arith.addf %124, %183 : vector<1x64x128xf32>
    %c0_62 = arith.constant 0 : index
    %c0_63 = arith.constant 0 : index
    %c0_64 = arith.constant 0 : index
    %185 = vector.load %arg18[%c0_62, %c0_63, %c0_64] : memref<1x64x128xf32, #tpu.memory_space<vmem>>, vector<1x64x128xf32>
    tpu.vector_store %arg18[%c0_62, %c0_63, %c0_64], %184 {strides = array<i32>} : memref<1x64x128xf32, #tpu.memory_space<vmem>>, vector<1x64x128xf32>,
    %c1_i32 = arith.constant 1 : i32
    %186 = arith.cmpi eq, %arg1, %c1_i32 : i32
    %187 = arith.extui %186 : i1 to i32
    %c0_i32_65 = arith.constant 0 : i32
    %188 = arith.cmpi ne, %187, %c0_i32_65 : i32
    scf.if %188 {
      %c0_66 = arith.constant 0 : index
      %c0_67 = arith.constant 0 : index
      %189 = vector.load %arg15[%c0_66, %c0_67] : memref<1x128xf32, #tpu.memory_space<vmem>>, vector<1x128xf32>
      %c0_68 = arith.constant 0 : index
      %c0_69 = arith.constant 0 : index
      %190 = vector.load %arg16[%c0_68, %c0_69] : memref<1x128xf32, #tpu.memory_space<vmem>>, vector<1x128xf32>
      %cst_70 = arith.constant dense<0.000000e+00> : vector<1x64xf32>
      %191 = vector.multi_reduction <add>, %184, %cst_70 [2] : vector<1x64x128xf32> to vector<1x64xf32>
      %192 = vector.shape_cast %191 : vector<1x64xf32> to vector<1x64x1xf32>
      %cst_71 = arith.constant 1.280000e+02 : f32
      %193 = vector.broadcast %cst_71 : f32 to vector<1x64x1xf32>
      %194 = arith.divf %192, %193 : vector<1x64x1xf32>
      %195 = vector.broadcast %194 : vector<1x64x1xf32> to vector<1x64x128xf32>
      %196 = arith.subf %184, %195 : vector<1x64x128xf32>
      %197 = arith.mulf %196, %196 : vector<1x64x128xf32>
      %cst_72 = arith.constant dense<0.000000e+00> : vector<1x64xf32>
      %198 = vector.multi_reduction <add>, %197, %cst_72 [2] : vector<1x64x128xf32> to vector<1x64xf32>
      %199 = vector.shape_cast %198 : vector<1x64xf32> to vector<1x64x1xf32>
      %cst_73 = arith.constant 1.280000e+02 : f32
      %200 = vector.broadcast %cst_73 : f32 to vector<1x64x1xf32>
      %201 = arith.divf %199, %200 : vector<1x64x1xf32>
      %202 = vector.broadcast %194 : vector<1x64x1xf32> to vector<1x64x128xf32>
      %203 = arith.subf %184, %202 : vector<1x64x128xf32>
      %cst_74 = arith.constant 9.99999974E-6 : f32
      %204 = vector.broadcast %cst_74 : f32 to vector<1x64x1xf32>
      %205 = arith.addf %201, %204 : vector<1x64x1xf32>
      %206 = math.rsqrt %205 : vector<1x64x1xf32>
      %207 = vector.broadcast %206 : vector<1x64x1xf32> to vector<1x64x128xf32>
      %208 = arith.mulf %203, %207 : vector<1x64x128xf32>
      %209 = vector.shape_cast %189 : vector<1x128xf32> to vector<1x1x128xf32>
      %210 = vector.broadcast %209 : vector<1x1x128xf32> to vector<1x64x128xf32>
      %211 = arith.mulf %208, %210 : vector<1x64x128xf32>
      %212 = vector.shape_cast %190 : vector<1x128xf32> to vector<1x1x128xf32>
      %213 = vector.broadcast %212 : vector<1x1x128xf32> to vector<1x64x128xf32>
      %214 = arith.addf %211, %213 : vector<1x64x128xf32>
      %215 = arith.truncf %214 : vector<1x64x128xf32> to vector<1x64x128xbf16>
      %c0_75 = arith.constant 0 : index
      %c0_76 = arith.constant 0 : index
      %c0_77 = arith.constant 0 : index
      %216 = vector.load %arg17[%c0_75, %c0_76, %c0_77] : memref<1x64x128xbf16, #tpu.memory_space<vmem>>, vector<1x64x128xbf16>
      tpu.vector_store %arg17[%c0_75, %c0_76, %c0_77], %215 {strides = array<i32>} : memref<1x64x128xbf16, #tpu.memory_space<vmem>>, vector<1x64x128xbf16>,
    } else {
    }
    return
  }
  func.func @transform_0(%arg0: i32, %arg1: i32) -> (i32, i32, i32) {
    %c0_i32 = arith.constant 0 : i32
    %c0_i32_0 = arith.constant 0 : i32
    %c0_i32_1 = arith.constant 0 : i32
    return %arg0, %c0_i32, %c0_i32_0 : i32, i32, i32
  }
  func.func @transform_1(%arg0: i32, %arg1: i32) -> (i32, i32, i32) {
    %c0_i32 = arith.constant 0 : i32
    %c0_i32_0 = arith.constant 0 : i32
    %c0_i32_1 = arith.constant 0 : i32
    return %arg1, %c0_i32, %c0_i32_0 : i32, i32, i32
  }
  func.func @transform_2(%arg0: i32, %arg1: i32) -> (i32, i32, i32) {
    %c0_i32 = arith.constant 0 : i32
    %c0_i32_0 = arith.constant 0 : i32
    %c0_i32_1 = arith.constant 0 : i32
    return %arg1, %c0_i32, %c0_i32_0 : i32, i32, i32
  }
  func.func @transform_3(%arg0: i32, %arg1: i32) -> (i32, i32, i32) {
    %c0_i32 = arith.constant 0 : i32
    %c0_i32_0 = arith.constant 0 : i32
    %c0_i32_1 = arith.constant 0 : i32
    return %arg1, %c0_i32, %c0_i32_0 : i32, i32, i32
  }
  func.func @transform_4(%arg0: i32, %arg1: i32) -> (i32, i32, i32) {
    %c0_i32 = arith.constant 0 : i32
    %c0_i32_0 = arith.constant 0 : i32
    %c0_i32_1 = arith.constant 0 : i32
    return %arg1, %c0_i32, %c0_i32_0 : i32, i32, i32
  }
  func.func @transform_5(%arg0: i32, %arg1: i32) -> (i32, i32, i32) {
    %c0_i32 = arith.constant 0 : i32
    %c0_i32_0 = arith.constant 0 : i32
    %c0_i32_1 = arith.constant 0 : i32
    return %arg1, %c0_i32, %c0_i32_0 : i32, i32, i32
  }
  func.func @transform_6(%arg0: i32, %arg1: i32) -> (i32, i32, i32) {
    %c0_i32 = arith.constant 0 : i32
    %c0_i32_0 = arith.constant 0 : i32
    %c0_i32_1 = arith.constant 0 : i32
    return %arg1, %c0_i32, %c0_i32_0 : i32, i32, i32
  }
  func.func @transform_7(%arg0: i32, %arg1: i32) -> (i32, i32, i32) {
    %c0_i32 = arith.constant 0 : i32
    %c0_i32_0 = arith.constant 0 : i32
    %c0_i32_1 = arith.constant 0 : i32
    return %arg1, %c0_i32, %c0_i32_0 : i32, i32, i32
  }
  func.func @transform_8(%arg0: i32, %arg1: i32) -> (i32, i32, i32) {
    %c0_i32 = arith.constant 0 : i32
    %c0_i32_0 = arith.constant 0 : i32
    %c0_i32_1 = arith.constant 0 : i32
    return %arg1, %c0_i32, %c0_i32_0 : i32, i32, i32
  }
  func.func @transform_9(%arg0: i32, %arg1: i32) -> (i32, i32, i32) {
    %c0_i32 = arith.constant 0 : i32
    %c0_i32_0 = arith.constant 0 : i32
    %c0_i32_1 = arith.constant 0 : i32
    return %arg1, %c0_i32, %c0_i32_0 : i32, i32, i32
  }
  func.func @transform_10(%arg0: i32, %arg1: i32) -> (i32, i32, i32) {
    %c0_i32 = arith.constant 0 : i32
    %c0_i32_0 = arith.constant 0 : i32
    %c0_i32_1 = arith.constant 0 : i32
    return %arg1, %c0_i32, %c0_i32_0 : i32, i32, i32
  }
  func.func @transform_11(%arg0: i32, %arg1: i32) -> (i32, i32, i32) {
    %c0_i32 = arith.constant 0 : i32
    %c0_i32_0 = arith.constant 0 : i32
    %c0_i32_1 = arith.constant 0 : i32
    return %arg1, %c0_i32, %c0_i32_0 : i32, i32, i32
  }
  func.func @transform_12(%arg0: i32, %arg1: i32) -> (i32, i32, i32) {
    %c0_i32 = arith.constant 0 : i32
    %c0_i32_0 = arith.constant 0 : i32
    %c0_i32_1 = arith.constant 0 : i32
    return %arg1, %c0_i32, %c0_i32_0 : i32, i32, i32
  }
  func.func @transform_13(%arg0: i32, %arg1: i32) -> (i32, i32) {
    %c0_i32 = arith.constant 0 : i32
    %c0_i32_0 = arith.constant 0 : i32
    %c0_i32_1 = arith.constant 0 : i32
    return %c0_i32, %c0_i32_0 : i32, i32
  }
  func.func @transform_14(%arg0: i32, %arg1: i32) -> (i32, i32) {
    %c0_i32 = arith.constant 0 : i32
    %c0_i32_0 = arith.constant 0 : i32
    %c0_i32_1 = arith.constant 0 : i32
    return %c0_i32, %c0_i32_0 : i32, i32
  }
  func.func @transform_15(%arg0: i32, %arg1: i32) -> (i32, i32, i32) {
    %c0_i32 = arith.constant 0 : i32
    %c0_i32_0 = arith.constant 0 : i32
    %c0_i32_1 = arith.constant 0 : i32
    return %arg0, %c0_i32, %c0_i32_0 : i32, i32, i32
  }
}

</mosaic_0001>

<bundles_post_ra>
// kernel: gpt_forward.3
= control target key start
LH: loop header
LB: loop body
LE: loop exit
PB: predicated region body
PF: predicated region fallthrough
CT: control target
= control target key end

     0   :  { %s1184_s0 = inlined_call_operand.vmem [shape: bf16[128,128], index: 0, kind: input, shape index: {}]   ;;  %s1185_s1 = inlined_call_operand.vmem [shape: bf16[512,128], index: 1, kind: input, shape index: {}]   ;;  %s1186_s2 = inlined_call_operand.hbm [shape: bf16[128,512], index: 2, kind: output, shape index: {}]  }
   0x1   :  { %v970_v0 = vld [vmem:[%s1185_s1 + $0x40] sm:$0xff]   ;;  %v974_v4 = vld [vmem:[%s1185_s1 + $0x48] sm:$0xff]   ;;  %v978_v8 = vld [vmem:[%s1185_s1 + $0x50] sm:$0xff]  }
   0x2   :  { %v971_v1 = vld [vmem:[%s1185_s1 + $0xc0] sm:$0xff]   ;;  %903 = vmatprep.subr.bf16.mxu0 %v970_v0  ;;  %v975_v5 = vld [vmem:[%s1185_s1 + $0xc8] sm:$0xff]   ;;  %v979_v9 = vld [vmem:[%s1185_s1 + $0xd0] sm:$0xff]  }
   0x3   :  { %v972_v2 = vld [vmem:[%s1185_s1] sm:$0xff]   ;;  %935 = vmatprep.subr.bf16.mxu1 %v971_v1  ;;  %v976_v6 = vld [vmem:[%s1185_s1 + $0x8] sm:$0xff]   ;;  %v980_v10 = vld [vmem:[%s1185_s1 + $0x10] sm:$0xff]  }
   0x4   :  { %v973_v3 = vld [vmem:[%s1185_s1 + $0x80] sm:$0xff]   ;;  %904 = vmatpush3.bf16.xpose.msra.mxu0 %v972_v2  ;;  %v977_v7 = vld [vmem:[%s1185_s1 + $0x88] sm:$0xff]   ;;  %v981_v11 = vld [vmem:[%s1185_s1 + $0x90] sm:$0xff]  }
   0x5   :  { %936 = vmatpush3.bf16.xpose.msra.mxu1 %v973_v3  ;;  %905 = vmatprep.subr.bf16.mxu0 %v974_v4  ;;  %v982_v12 = vld [vmem:[%s1185_s1 + $0x58] sm:$0xff]   ;;  %v986_v16 = vld [vmem:[%s1185_s1 + $0x60] sm:$0xff]   ;;  %v990_v21 = vld [vmem:[%s1185_s1 + $0x68] sm:$0xff]  }
   0x6   :  { %937 = vmatprep.subr.bf16.mxu1 %v975_v5  ;;  %v983_v13 = vld [vmem:[%s1185_s1 + $0xd8] sm:$0xff]   ;;  %v987_v17 = vld [vmem:[%s1185_s1 + $0xe0] sm:$0xff]   ;;  %v991_v22 = vld [vmem:[%s1185_s1 + $0xe8] sm:$0xff]  }
   0x7   :  { %v984_v14 = vld [vmem:[%s1185_s1 + $0x18] sm:$0xff]   ;;  %v988_v18 = vld [vmem:[%s1185_s1 + $0x20] sm:$0xff]   ;;  %v992_v23 = vld [vmem:[%s1185_s1 + $0x28] sm:$0xff]  }
   0x8   :  { %v985_v15 = vld [vmem:[%s1185_s1 + $0x98] sm:$0xff]   ;;  %v989_v19 = vld [vmem:[%s1185_s1 + $0xa0] sm:$0xff]  }
   0x9   :  { %v1002_v20 = vld [vmem:[%s1184_s0] sm:$0xff]  }
   0xa   :  { %919 = vmatprep.mubr.bf16.mxu0 %v1002_v20  ;;  %951 = vmatprep.mubr.bf16.mxu1 %v1002_v20 }
   0xc   :  { %906 = vmatpush3.bf16.xpose.msra.mxu0 %v976_v6 }
   0xd   :  { %938 = vmatpush3.bf16.xpose.msra.mxu1 %v977_v7  ;;  %907 = vmatprep.subr.bf16.mxu0 %v978_v8 }
   0xe   :  { %939 = vmatprep.subr.bf16.mxu1 %v979_v9 }
  0x14   :  { %908 = vmatpush3.bf16.xpose.msra.mxu0 %v980_v10 }
  0x15   :  { %940 = vmatpush3.bf16.xpose.msra.mxu1 %v981_v11  ;;  %909 = vmatprep.subr.bf16.mxu0 %v982_v12 }
  0x16   :  { %941 = vmatprep.subr.bf16.mxu1 %v983_v13 }
  0x1c   :  { %910 = vmatpush3.bf16.xpose.msra.mxu0 %v984_v14 }
  0x1d   :  { %942 = vmatpush3.bf16.xpose.msra.mxu1 %v985_v15  ;;  %911 = vmatprep.subr.bf16.mxu0 %v986_v16 }
  0x1e   :  { %943 = vmatprep.subr.bf16.mxu1 %v987_v17 }
  0x24   :  { %912 = vmatpush3.bf16.xpose.msra.mxu0 %v988_v18 }
  0x25   :  { %944 = vmatpush3.bf16.xpose.msra.mxu1 %v989_v19  ;;  %913 = vmatprep.subr.bf16.mxu0 %v990_v21 }
  0x26   :  { %945 = vmatprep.subr.bf16.mxu1 %v991_v22 }
  0x27   :  { %7 = vsyncpa [#allocation3], 0  ;;  %v993_v24 = vld [vmem:[%s1185_s1 + $0xa8] sm:$0xff]   ;;  %v994_v25 = vld [vmem:[%s1185_s1 + $0x70] sm:$0xff]  }
  0x28   :  { %v995_v26 = vld [vmem:[%s1185_s1 + $0xf0] sm:$0xff]   ;;  %v998_v29 = vld [vmem:[%s1185_s1 + $0x78] sm:$0xff]   ;;  %v1003_v33 = vld [vmem:[%s1184_s0 + $0x8] sm:$0xff]  }
  0x29   :  { %v996_v27 = vld [vmem:[%s1185_s1 + $0x30] sm:$0xff]   ;;  %v999_v30 = vld [vmem:[%s1185_s1 + $0xf8] sm:$0xff]   ;;  %v1006_v36 = vld [vmem:[%s1184_s0 + $0x20] sm:$0xff]  }
  0x2a   :  { %v997_v28 = vld [vmem:[%s1185_s1 + $0xb0] sm:$0xff]   ;;  %v1000_v31 = vld [vmem:[%s1185_s1 + $0x38] sm:$0xff]   ;;  %v1007_v37 = vld [vmem:[%s1184_s0 + $0x28] sm:$0xff]  }
  0x2b   :  { %v1001_v32 = vld [vmem:[%s1185_s1 + $0xb8] sm:$0xff]   ;;  %v1004_v34 = vld [vmem:[%s1184_s0 + $0x10] sm:$0xff]  }
  0x2c   :  { %914 = vmatpush3.bf16.xpose.msra.mxu0 %v992_v23  ;;  %v1005_v35 = vld [vmem:[%s1184_s0 + $0x18] sm:$0xff]   ;;  %v1008_v38 = vld [vmem:[%s1184_s0 + $0x30] sm:$0xff]  }
  0x2d   :  { %946 = vmatpush3.bf16.xpose.msra.mxu1 %v993_v24  ;;  %915 = vmatprep.subr.bf16.mxu0 %v994_v25  ;;  %v1009_v39 = vld [vmem:[%s1184_s0 + $0x38] sm:$0xff]   ;;  %s1034_s0 = smov [#allocation2]  }
  0x2e   :  { %947 = vmatprep.subr.bf16.mxu1 %v995_v26  ;;  %s788_s4 = sshll.u32 %s1034_s0, 4  ;;  %s789_s4 = int_to_ptr.vmem [resolvable:$true] %s788_s4 }
  0x2f   :  { %s1010_s5 = scalar_lea.vmem %s789_s4, 4096  ;;  %p1015_p1 = scmp.lt.s32.totalorder %s789_s4, %s789_s4 }
  0x30   :  { %p1011_p0 = scmp.ne.s32.totalorder %s789_s4, %s1010_s5  ;;  %p1016_p2 = scmp.lt.s32.totalorder %s1010_s5, %s1010_s5 }
  0x32   :  { %p1017_p3 = por %p1016_p2, %p1015_p1 }
  0x34   :  { %916 = vmatpush3.bf16.xpose.msra.mxu0 %v996_v27  ;;  %p1018_p4 = pnand %p1017_p3, %p1011_p0 }
  0x35   :  { %948 = vmatpush3.bf16.xpose.msra.mxu1 %v997_v28  ;;  %917 = vmatprep.subr.bf16.mxu0 %v998_v29 }
  0x36   :  { %949 = vmatprep.subr.bf16.mxu1 %v999_v30 }
  0x3c   :  { %918 = vmatpush3.bf16.xpose.msra.mxu0 %v1000_v31 }
  0x3d   :  { %950 = vmatpush3.bf16.xpose.msra.mxu1 %v1001_v32 }
  0x43   :  { %920 = vmatmul.mubr.bf16.vlgmr.msra.gmra.mrb[0].mxu0 %v1002_v20 }
  0x44   :  { %952 = vmatmul.mubr.bf16.vlgmr.msra.gmra.mrb[0].mxu1 %v1002_v20  ;;  %921 = vmatprep.mubr.bf16.mxu0 %v1003_v33 }
  0x45   :  { %953 = vmatprep.mubr.bf16.mxu1 %v1003_v33 }
  0x4b   :  { %922 = vmatmul.mubr.bf16.gmra.mrb[4].mxu0 %v1003_v33 }
  0x4c   :  { %954 = vmatmul.mubr.bf16.gmra.mrb[4].mxu1 %v1003_v33  ;;  %923 = vmatprep.mubr.bf16.mxu0 %v1004_v34 }
  0x4d   :  { %955 = vmatprep.mubr.bf16.mxu1 %v1004_v34 }
  0x53   :  { %924 = vmatmul.mubr.bf16.gmra.mrb[8].mxu0 %v1004_v34 }
  0x54   :  { %956 = vmatmul.mubr.bf16.gmra.mrb[8].mxu1 %v1004_v34  ;;  %925 = vmatprep.mubr.bf16.mxu0 %v1005_v35 }
  0x55   :  { %957 = vmatprep.mubr.bf16.mxu1 %v1005_v35 }
  0x5b   :  { %926 = vmatmul.mubr.bf16.gmra.mrb[12].mxu0 %v1005_v35 }
  0x5c   :  { %958 = vmatmul.mubr.bf16.gmra.mrb[12].mxu1 %v1005_v35  ;;  %927 = vmatprep.mubr.bf16.mxu0 %v1006_v36 }
  0x5d   :  { %959 = vmatprep.mubr.bf16.mxu1 %v1006_v36 }
  0x63   :  { %928 = vmatmul.mubr.bf16.gmra.mrb[16].mxu0 %v1006_v36 }
  0x64   :  { %960 = vmatmul.mubr.bf16.gmra.mrb[16].mxu1 %v1006_v36  ;;  %929 = vmatprep.mubr.bf16.mxu0 %v1007_v37 }
  0x65   :  { %961 = vmatprep.mubr.bf16.mxu1 %v1007_v37 }
  0x6b   :  { %930 = vmatmul.mubr.bf16.gmra.mrb[20].mxu0 %v1007_v37 }
  0x6c   :  { %962 = vmatmul.mubr.bf16.gmra.mrb[20].mxu1 %v1007_v37  ;;  %931 = vmatprep.mubr.bf16.mxu0 %v1008_v38 }
  0x6d   :  { %963 = vmatprep.mubr.bf16.mxu1 %v1008_v38 }
  0x73   :  { %932 = vmatmul.mubr.bf16.gmra.mrb[24].mxu0 %v1008_v38 }
  0x74   :  { %964 = vmatmul.mubr.bf16.gmra.mrb[24].mxu1 %v1008_v38  ;;  %933 = vmatprep.mubr.bf16.mxu0 %v1009_v39 }
  0x75   :  { %965 = vmatprep.mubr.bf16.mxu1 %v1009_v39 }
  0x7b   :  { %934 = vmatmul.mubr.bf16.gmra.mrb[28].mxu0 %v1009_v39 }
  0x7c   :  { %966 = vmatmul.mubr.bf16.gmra.mrb[28].mxu1 %v1009_v39 }
 0x116   :  { %v367_v40 = vpop.f32.mrb[0].mxu0 }
 0x117   :  { %v480_v41 = vpop.f32.mrb[0].mxu1  ;;  %v369_v42 = vpop.f32.mrb[1].mxu0 }
 0x118   :  { %v871_v43 = vpack.c.bf16 %v369_v42, %v367_v40  ;;  %v482_v44 = vpop.f32.mrb[1].mxu1  ;;  %v371_v45 = vpop.f32.mrb[2].mxu0 }
 0x119   :  { %v872_v46 = vpack.c.bf16 %v482_v44, %v480_v41  ;;  %v484_v47 = vpop.f32.mrb[2].mxu1  ;;  %v373_v48 = vpop.f32.mrb[3].mxu0 }
 0x11a   :  { %751 = vst [vmem:[#allocation2] sm:$0xff] %v871_v43  ;;  %v873_v49 = vpack.c.bf16 %v373_v48, %v371_v45  ;;  %v486_v50 = vpop.f32.mrb[3].mxu1 }
 0x11b   :  { %752 = vst [vmem:[#allocation2 + $0x8] sm:$0xff] %v872_v46  ;;  %v874_v51 = vpack.c.bf16 %v486_v50, %v484_v47 }
 0x11c   :  { %753 = vst [vmem:[#allocation2 + $0x10] sm:$0xff] %v873_v49 }
 0x11d   :  { %754 = vst [vmem:[#allocation2 + $0x18] sm:$0xff] %v874_v51 }
 0x11e   :  { %v377_v52 = vpop.f32.mrb[4].mxu0 }
 0x11f   :  { %v490_v53 = vpop.f32.mrb[4].mxu1  ;;  %v379_v54 = vpop.f32.mrb[5].mxu0 }
 0x120   :  { %v875_v55 = vpack.c.bf16 %v379_v54, %v377_v52  ;;  %v492_v56 = vpop.f32.mrb[5].mxu1  ;;  %v381_v57 = vpop.f32.mrb[6].mxu0 }
 0x121   :  { %v876_v58 = vpack.c.bf16 %v492_v56, %v490_v53  ;;  %v494_v59 = vpop.f32.mrb[6].mxu1  ;;  %v383_v60 = vpop.f32.mrb[7].mxu0 }
 0x122   :  { %755 = vst [vmem:[#allocation2 + $0x20] sm:$0xff] %v875_v55  ;;  %v877_v61 = vpack.c.bf16 %v383_v60, %v381_v57  ;;  %v496_v62 = vpop.f32.mrb[7].mxu1 }
 0x123   :  { %756 = vst [vmem:[#allocation2 + $0x28] sm:$0xff] %v876_v58  ;;  %v878_v63 = vpack.c.bf16 %v496_v62, %v494_v59 }
 0x124   :  { %757 = vst [vmem:[#allocation2 + $0x30] sm:$0xff] %v877_v61 }
 0x125   :  { %758 = vst [vmem:[#allocation2 + $0x38] sm:$0xff] %v878_v63 }
 0x126   :  { %v387_v0 = vpop.f32.mrb[8].mxu0 }
 0x127   :  { %v500_v1 = vpop.f32.mrb[8].mxu1  ;;  %v389_v2 = vpop.f32.mrb[9].mxu0 }
 0x128   :  { %v879_v3 = vpack.c.bf16 %v389_v2, %v387_v0  ;;  %v502_v4 = vpop.f32.mrb[9].mxu1  ;;  %v391_v5 = vpop.f32.mrb[10].mxu0 }
 0x129   :  { %v880_v6 = vpack.c.bf16 %v502_v4, %v500_v1  ;;  %v504_v7 = vpop.f32.mrb[10].mxu1  ;;  %v393_v8 = vpop.f32.mrb[11].mxu0 }
 0x12a   :  { %759 = vst [vmem:[#allocation2 + $0x40] sm:$0xff] %v879_v3  ;;  %v881_v9 = vpack.c.bf16 %v393_v8, %v391_v5  ;;  %v506_v10 = vpop.f32.mrb[11].mxu1 }
 0x12b   :  { %760 = vst [vmem:[#allocation2 + $0x48] sm:$0xff] %v880_v6  ;;  %v882_v11 = vpack.c.bf16 %v506_v10, %v504_v7 }
 0x12c   :  { %761 = vst [vmem:[#allocation2 + $0x50] sm:$0xff] %v881_v9 }
 0x12d   :  { %762 = vst [vmem:[#allocation2 + $0x58] sm:$0xff] %v882_v11 }
 0x12e   :  { %v397_v12 = vpop.f32.mrb[12].mxu0 }
 0x12f   :  { %v510_v13 = vpop.f32.mrb[12].mxu1  ;;  %v399_v14 = vpop.f32.mrb[13].mxu0 }
 0x130   :  { %v883_v15 = vpack.c.bf16 %v399_v14, %v397_v12  ;;  %v512_v16 = vpop.f32.mrb[13].mxu1  ;;  %v401_v17 = vpop.f32.mrb[14].mxu0 }
 0x131   :  { %v884_v18 = vpack.c.bf16 %v512_v16, %v510_v13  ;;  %v514_v19 = vpop.f32.mrb[14].mxu1  ;;  %v403_v20 = vpop.f32.mrb[15].mxu0 }
 0x132   :  { %763 = vst [vmem:[#allocation2 + $0x60] sm:$0xff] %v883_v15  ;;  %v885_v21 = vpack.c.bf16 %v403_v20, %v401_v17  ;;  %v516_v22 = vpop.f32.mrb[15].mxu1 }
 0x133   :  { %764 = vst [vmem:[#allocation2 + $0x68] sm:$0xff] %v884_v18  ;;  %v886_v23 = vpack.c.bf16 %v516_v22, %v514_v19 }
 0x134   :  { %765 = vst [vmem:[#allocation2 + $0x70] sm:$0xff] %v885_v21 }
 0x135   :  { %766 = vst [vmem:[#allocation2 + $0x78] sm:$0xff] %v886_v23 }
 0x136   :  { %v407_v24 = vpop.f32.mrb[16].mxu0 }
 0x137   :  { %v520_v25 = vpop.f32.mrb[16].mxu1  ;;  %v409_v26 = vpop.f32.mrb[17].mxu0 }
 0x138   :  { %v887_v27 = vpack.c.bf16 %v409_v26, %v407_v24  ;;  %v522_v28 = vpop.f32.mrb[17].mxu1  ;;  %v411_v29 = vpop.f32.mrb[18].mxu0 }
 0x139   :  { %v888_v30 = vpack.c.bf16 %v522_v28, %v520_v25  ;;  %v524_v31 = vpop.f32.mrb[18].mxu1  ;;  %v413_v32 = vpop.f32.mrb[19].mxu0 }
 0x13a   :  { %767 = vst [vmem:[#allocation2 + $0x80] sm:$0xff] %v887_v27  ;;  %v889_v33 = vpack.c.bf16 %v413_v32, %v411_v29  ;;  %v526_v34 = vpop.f32.mrb[19].mxu1 }
 0x13b   :  { %768 = vst [vmem:[#allocation2 + $0x88] sm:$0xff] %v888_v30  ;;  %v890_v35 = vpack.c.bf16 %v526_v34, %v524_v31 }
 0x13c   :  { %769 = vst [vmem:[#allocation2 + $0x90] sm:$0xff] %v889_v33 }
 0x13d   :  { %770 = vst [vmem:[#allocation2 + $0x98] sm:$0xff] %v890_v35 }
 0x13e   :  { %v417_v36 = vpop.f32.mrb[20].mxu0 }
 0x13f   :  { %v530_v37 = vpop.f32.mrb[20].mxu1  ;;  %v419_v38 = vpop.f32.mrb[21].mxu0 }
 0x140   :  { %v891_v39 = vpack.c.bf16 %v419_v38, %v417_v36  ;;  %v532_v40 = vpop.f32.mrb[21].mxu1  ;;  %v421_v41 = vpop.f32.mrb[22].mxu0 }
 0x141   :  { %v892_v42 = vpack.c.bf16 %v532_v40, %v530_v37  ;;  %v534_v43 = vpop.f32.mrb[22].mxu1  ;;  %v423_v44 = vpop.f32.mrb[23].mxu0 }
 0x142   :  { %771 = vst [vmem:[#allocation2 + $0xa0] sm:$0xff] %v891_v39  ;;  %v893_v45 = vpack.c.bf16 %v423_v44, %v421_v41  ;;  %v536_v46 = vpop.f32.mrb[23].mxu1 }
 0x143   :  { %772 = vst [vmem:[#allocation2 + $0xa8] sm:$0xff] %v892_v42  ;;  %v894_v47 = vpack.c.bf16 %v536_v46, %v534_v43 }
 0x144   :  { %773 = vst [vmem:[#allocation2 + $0xb0] sm:$0xff] %v893_v45 }
 0x145   :  { %774 = vst [vmem:[#allocation2 + $0xb8] sm:$0xff] %v894_v47 }
 0x146   :  { %v427_v48 = vpop.f32.mrb[24].mxu0 }
 0x147   :  { %v540_v49 = vpop.f32.mrb[24].mxu1  ;;  %v429_v50 = vpop.f32.mrb[25].mxu0 }
 0x148   :  { %v895_v51 = vpack.c.bf16 %v429_v50, %v427_v48  ;;  %v542_v52 = vpop.f32.mrb[25].mxu1  ;;  %v431_v53 = vpop.f32.mrb[26].mxu0 }
 0x149   :  { %v896_v54 = vpack.c.bf16 %v542_v52, %v540_v49  ;;  %v544_v55 = vpop.f32.mrb[26].mxu1  ;;  %v433_v56 = vpop.f32.mrb[27].mxu0 }
 0x14a   :  { %775 = vst [vmem:[#allocation2 + $0xc0] sm:$0xff] %v895_v51  ;;  %v897_v57 = vpack.c.bf16 %v433_v56, %v431_v53  ;;  %v546_v58 = vpop.f32.mrb[27].mxu1 }
 0x14b   :  { %776 = vst [vmem:[#allocation2 + $0xc8] sm:$0xff] %v896_v54  ;;  %v898_v59 = vpack.c.bf16 %v546_v58, %v544_v55 }
 0x14c   :  { %777 = vst [vmem:[#allocation2 + $0xd0] sm:$0xff] %v897_v57 }
 0x14d   :  { %778 = vst [vmem:[#allocation2 + $0xd8] sm:$0xff] %v898_v59 }
 0x14e   :  { %v437_v60 = vpop.f32.mrb[28].mxu0 }
 0x14f   :  { %v550_v61 = vpop.f32.mrb[28].mxu1  ;;  %v439_v62 = vpop.f32.mrb[29].mxu0 }
 0x150   :  { %v899_v63 = vpack.c.bf16 %v439_v62, %v437_v60  ;;  %v552_v0 = vpop.f32.mrb[29].mxu1  ;;  %v441_v1 = vpop.f32.mrb[30].mxu0 }
 0x151   :  { %v900_v2 = vpack.c.bf16 %v552_v0, %v550_v61  ;;  %v554_v3 = vpop.f32.mrb[30].mxu1  ;;  %v443_v4 = vpop.f32.mrb[31].mxu0 }
 0x152   :  { %779 = vst [vmem:[#allocation2 + $0xe0] sm:$0xff] %v899_v63  ;;  %v901_v5 = vpack.c.bf16 %v443_v4, %v441_v1  ;;  %v556_v6 = vpop.f32.mrb[31].mxu1 }
 0x153   :  { %780 = vst [vmem:[#allocation2 + $0xe8] sm:$0xff] %v900_v2  ;;  %v902_v7 = vpack.c.bf16 %v556_v6, %v554_v3 }
 0x154   :  { %781 = vst [vmem:[#allocation2 + $0xf0] sm:$0xff] %v901_v5 }
 0x155   :  { %782 = vst [vmem:[#allocation2 + $0xf8] sm:$0xff] %v902_v7 }
 0x156   :  { %1021 = shalt.err (!%p1018_p4)
}
 0x157   :  { %s1022_s8 = scalar_lea.hbm %s1186_s2, 4096 }
 0x158   :  { %p1023_p5 = scmp.ne.s32.totalorder %s1186_s2, %s1022_s8  ;;  %p1026_p6 = scmp.lt.u32.totalorder %s1022_s8, %s1186_s2 }
 0x15a   :  { %p1028_p7 = pnand %p1026_p6, %p1023_p5 }
 0x15c   :  { %1031 = shalt.err (!%p1028_p7)
}
 0x15d   :  { %s1035_s13 = smov 256   ;;  %s1036_s14 = smov 16  }
 0x15e   :  { %794 = dma.vmem_to_hbm [thread:$0]  %s789_s4, 4096, %s1186_s2, [#allocation3], %s1035_s13, %s1035_s13, %s1036_s14  }
 0x15f   :  { %1032 = dma.done.wait [#allocation3], 4096  }
 0x160   :  { %1033 = vsyncadd [#allocation3], 4294963200 }
 0x161   :  { %798 = vsyncpa [#allocation3], 1 }

// kernel: gpt_forward.2
= control target key start
LH: loop header
LB: loop body
LE: loop exit
PB: predicated region body
PF: predicated region fallthrough
CT: control target
= control target key end

     0   :  { %s8105_s0 = inlined_call_operand.vmem [shape: f32[2,64,128], index: 0, kind: input, shape index: {}]   ;;  %s8106_s1 = inlined_call_operand.hbm [shape: f32[2,1,128], index: 1, kind: input, shape index: {}]   ;;  %s8107_s2 = inlined_call_operand.hbm [shape: f32[2,1,128], index: 2, kind: input, shape index: {}]   ;;  %s8108_s3 = inlined_call_operand.hbm [shape: bf16[2,128,384], index: 3, kind: input, shape index: {}]   ;;  %s8109_s4 = inlined_call_operand.hbm [shape: f32[2,1,384], index: 4, kind: input, shape index: {}]   ;;  %s8110_s5 = inlined_call_operand.hbm [shape: bf16[2,128,128], index: 5, kind: input, shape index: {}]   ;;  %s8111_s6 = inlined_call_operand.hbm [shape: f32[2,1,128], index: 6, kind: input, shape index: {}]   ;;  %s8112_s7 = inlined_call_operand.hbm [shape: f32[2,1,128], index: 7, kind: input, shape index: {}]   ;;  %s8113_s8 = inlined_call_operand.hbm [shape: f32[2,1,128], index: 8, kind: input, shape index: {}]   ;;  %s8114_s9 = inlined_call_operand.vmem [shape: bf16[2,128,512], index: 9, kind: input, shape index: {}]   ;;  %s8115_s10 = inlined_call_operand.hbm [shape: f32[2,1,512], index: 10, kind: input, shape index: {}]   ;;  %s8116_s11 = inlined_call_operand.vmem [shape: bf16[2,512,128], index: 11, kind: input, shape index: {}]   ;;  %s8117_s12 = inlined_call_operand.hbm [shape: f32[2,1,128], index: 12, kind: input, shape index: {}]   ;;  %s8118_s13 = inlined_call_operand.vmem [shape: f32[1,128], index: 13, kind: input, shape index: {}]   ;;  %s8119_s14 = inlined_call_operand.hbm [shape: f32[1,128], index: 14, kind: input, shape index: {}]   ;;  %s8120_s15 = inlined_call_operand.vmem [shape: bf16[2,64,128], index: 15, kind: output, shape index: {}]  }
   0x1   :  { %8156 = sst [smem:[#allocation52_spill]] %s8105_s0 }
   0x2   :  { %8157 = sst [smem:[#allocation53_spill]] %s8106_s1 }
   0x3   :  { %8158 = sst [smem:[#allocation54_spill]] %s8107_s2 }
   0x4   :  { %8159 = sst [smem:[#allocation55_spill]] %s8108_s3 }
   0x5   :  { %8160 = sst [smem:[#allocation56_spill]] %s8109_s4 }
   0x6   :  { %8161 = sst [smem:[#allocation57_spill]] %s8110_s5 }
   0x7   :  { %8162 = sst [smem:[#allocation58_spill]] %s8111_s6 }
   0x8   :  { %8163 = sst [smem:[#allocation59_spill]] %s8112_s7 }
   0x9   :  { %8164 = sst [smem:[#allocation60_spill]] %s8113_s8 }
   0xa   :  { %8165 = sst [smem:[#allocation61_spill]] %s8114_s9 }
   0xb   :  { %8166 = sst [smem:[#allocation62_spill]] %s8115_s10 }
   0xc   :  { %8167 = sst [smem:[#allocation63_spill]] %s8116_s11 }
   0xd   :  { %8168 = sst [smem:[#allocation64_spill]] %s8118_s13 }
   0xe   :  { %8169 = sst [smem:[#allocation65_spill]] %s8119_s14 }
   0xf   :  { %8170 = sst [smem:[#allocation66_spill]] %s8120_s15 }
  0x10   :  { %20 = vsyncpa [#allocation4], 0 }
  0x11   :  { %22 = vsyncpa [#allocation4 + $0x1], 0 }
  0x12   :  { %23 = vsyncpa [#allocation6], 0 }
  0x13   :  { %25 = vsyncpa [#allocation6 + $0x1], 0 }
  0x14   :  { %26 = vsyncpa [#allocation9], 0 }
  0x15   :  { %28 = vsyncpa [#allocation9 + $0x1], 0 }
  0x16   :  { %29 = vsyncpa [#allocation12], 0 }
  0x17   :  { %31 = vsyncpa [#allocation12 + $0x1], 0 }
  0x18   :  { %32 = vsyncpa [#allocation15], 0 }
  0x19   :  { %34 = vsyncpa [#allocation15 + $0x1], 0 }
  0x1a   :  { %35 = vsyncpa [#allocation18], 0 }
  0x1b   :  { %37 = vsyncpa [#allocation18 + $0x1], 0  ;;  %s6181_s18 = smov 0   ;;  %s6183_s19 = smov 0  }
  0x1c   :  { %s6185_s20 = smov 0   ;;  %s6187_s21 = smov 0  }
  0x1d   :  { %s6189_s22 = smov 0   ;;  %s6191_s23 = smov 0  }
  0x1e   :  { %s6193_s24 = smov 0   ;;  %s6195_s25 = smov 0  }
  0x1f LB: > { %8171 = sst [smem:[#allocation27_spill]] %s6060_s20  ;;  %s8122_s26 = sadd.s32 4294967295, %s6080_s25   ;;  %s6080_s25 = sphi %s6195_s25, %s43_s25   ;;  %s6076_s24 = sphi %s6193_s24, %s8265_s24   ;;  %s6072_s23 = sphi %s6191_s23, %s8269_s23   ;;  %s6068_s22 = sphi %s6189_s22, %s8263_s22   ;;  %s6064_s21 = sphi %s6187_s21, %s8268_s21   ;;  %s6060_s20 = sphi %s6185_s20, %s8262_s20   ;;  %s6056_s19 = sphi %s6183_s19, %s8267_s19   ;;  %s6052_s18 = sphi %s6181_s18, %s8266_s18  }
  0x20   : > { %8172 = sst [smem:[#allocation28_spill]] %s6064_s21  ;;  %s52_s27 = sadd.s32 1, %s6072_s23 }
  0x21   : > { %8173 = sst [smem:[#allocation29_spill]] %s6068_s22  ;;  %p53_p0 = scmp.ge.s32.totalorder %s52_s27, 2 }
  0x22   : > { %8174 = sst [smem:[#allocation30_spill]] %s6076_s24  ;;  %s55_s28 = sadd.s32 1, %s6076_s24 }
  0x23   : > { %s88_s29 = sadd.s32 1, %s6060_s20  ;;  %p95_p1 = scmp.ne.s32.totalorder %s6060_s20, %s6056_s19 }
  0x24   : > { %s8271_s27 = smov (%p53_p0, %s52_s27), 0  ;;  %s8273_s28 = smov (!%p53_p0, %s55_s28), %s6076_s24 }
  0x25   : > { %8175 = sst [smem:[#allocation31_spill]] %s8271_s27  ;;  %s85_s30 = ssub.s32 %s6072_s23, %s8271_s27 }
  0x26   : > { %p96_p2 = scmp.eq.s32.totalorder %s6080_s25, 0  ;;  %p57_p3 = scmp.ge.s32.totalorder %s8273_s28, 2 }
  0x27   : > { %p86_p4 = scmp.eq.s32.totalorder %s85_s30, 0  ;;  %p101_p6 = scmp.ne.s32.totalorder %s6056_s19, %s6052_s18 }
  0x28   : > { %p6231_p5 = por %p96_p2, %p95_p1  ;;  %s8275_s28 = smov (%p57_p3, %s8273_s28), 0 }
  0x29   : > { %8177 = sst [smem:[#allocation32_spill]] %s8275_s28  ;;  %p6243_p7 = scmp.eq.s32.totalorder %s8122_s26, 0 }
  0x2a   : > { %s6239_s17 = scalar_select %p86_p4, %s6060_s20, %s88_s29  }
  0x2b   : > { %s8179_s27 = scalar_select %p6243_p7, 1, 0 }
  0x2c   : > { %8178 = sst [smem:[#allocation33_spill]] %s6239_s17  ;;  %p4519_p8 = scmp.ge.s32.totalorder %s6080_s25, 1 }
  0x2d   : > { %8180 = sst [smem:[#allocation34_spill]] %s8179_s27  ;;  %p466_p9 = scmp.lt.s32.totalorder %s6080_s25, 5 }
  0x2e   : > { %p6251_p10 = por %p6243_p7, %p101_p6  ;;  %s6082_s29 = smov [#allocation19]  }
  0x2f   : > { %p6255_p11 = pnand %p4519_p8, %p466_p9  ;;  %s482_s28 = sshll.u32 %s6082_s29, 4  ;;  %s483_s28 = int_to_ptr.vmem [resolvable:$true] %s482_s28 }
  0x30   : > { %s8181_s30 = scalar_select %p6251_p10, 1, 0 }
  0x31   : > { %s8182_s18 = scalar_select %p6255_p11, 1, 0 }
  0x32   : > { %p5123_p12 = pneg %p6255_p11  ;;  %p5159_p13 = scmp.lt.s32.totalorder %s6080_s25, 4 }
  0x33   : > { %s6263_s26 = sand.u32 1, %s6060_s20   ;;  %s6266_s24 = sshll.u32 %s6072_s23, 4 }
  0x34   : > { %p6270_p0 = pnand %p5123_p12, %p6243_p7  ;;  %p6276_p1 = pnand %p5159_p13, %p6231_p5 }
  0x35   : > { %s6281_s29 = sand.u32 1, %s6080_s25   ;;  %s8185_s14 = sld [smem:[#allocation65_spill]] }
  0x36   : > { %s8184_s13 = scalar_select %p6276_p1, 1, 0 }
  0x37   : > { %p5664_p3 = pneg %p6270_p0 }
  0x3b   : > { %s5662_s20 = scalar_lea.hbm %s8185_s14, 16 }
  0x3c   : > { %p5663_p2 = scmp.ne.s32.totalorder %s8185_s14, %s5662_s20  ;;  %p5669_p5 = scmp.lt.u32.totalorder %s5662_s20, %s8185_s14 }
  0x3e   : > { %p5665_p4 = pnand %p5664_p3, %p5663_p2 }
  0x40   : > { %p5666_p6 = pneg %p5665_p4 }
  0x42   : > { %p5671_p8 = pnand %p5669_p5, %p5666_p6 }
  0x44   : > { %5674 = shalt.err (!%p5671_p8)
}
  0x45   : > { %s5675_s22 = scalar_lea.vmem %s483_s28, 16  ;;  %s5682_s11 = scalar_lea.vmem %s483_s28, 32 }
  0x46   : > { %p5676_p9 = scmp.ne.s32.totalorder %s483_s28, %s5675_s22  ;;  %p5683_p7 = scmp.lt.s32.totalorder %s483_s28, %s483_s28 }
  0x47   : > { %p5684_p10 = scmp.lt.s32.totalorder %s5682_s11, %s5675_s22 }
  0x48   : > { %p5678_p12 = pnand %p5676_p9, %p5664_p3 }
  0x49   : > { %p5685_p11 = por %p5684_p10, %p5683_p7 }
  0x4a   : > { %p5679_p13 = pneg %p5678_p12 }
  0x4c   : > { %p5686_p1 = pnand %p5685_p11, %p5679_p13 }
  0x4e   : > { %5689 = shalt.err (!%p5686_p1)
}
  0x4f   : > { %5126 = dma.hbm_to_vmem [thread:$0]  (!%p6270_p0), %s8185_s14, 16, %s483_s28, [#allocation18]  }
  0x50   : > { %s8186_s2 = sld [smem:[#allocation54_spill]]  ;;  %s521_s22 = scalar_lea.vmem [#allocation5], %s6263_s26 }
  0x51   : > { %s528_s17 = sshll.u32 %s521_s22, 4  ;;  %s8134_s11 = scalar_lea.sflag [#allocation6], %s6281_s29  ;;  %s6306_s17 = int_to_ptr.vmem [resolvable:$true] %s528_s17 }
  0x52   : > { %p8187_p10 = scmp.ne.s32.totalorder %s8184_s13, 0 }
  0x54   : > { %p6314_p11 = pneg %p8187_p10 }
  0x56   : > { %s6303_s21 = scalar_lea.hbm %s8186_s2, %s6266_s24  ;;  %s5695_s20 = scalar_lea.hbm %s8186_s2, 32 }
  0x57   : > { %s5690_s0 = scalar_lea.hbm %s6303_s21, 16  ;;  %p5696_p2 = scmp.lt.u32.totalorder %s6303_s21, %s8186_s2 }
  0x58   : > { %p5691_p7 = scmp.ne.s32.totalorder %s6303_s21, %s5690_s0  ;;  %p5697_p3 = scmp.lt.u32.totalorder %s5695_s20, %s5690_s0 }
  0x59   : > { %p5699_p6 = scmp.lt.u32.totalorder %s5690_s0, %s6303_s21 }
  0x5a   : > { %p5693_p0 = pnand %p6314_p11, %p5691_p7  ;;  %p5698_p4 = por %p5697_p3, %p5696_p2 }
  0x5c   : > { %p5694_p1 = pneg %p5693_p0  ;;  %p5700_p5 = por %p5699_p6, %p5698_p4 }
  0x5e   : > { %p5701_p8 = pnand %p5700_p5, %p5694_p1 }
  0x60   : > { %5704 = shalt.err (!%p5701_p8)
}
  0x61   : > { %s5705_s16 = scalar_lea.vmem %s6306_s17, 16  ;;  %s6083_s9 = smov [#allocation5]  }
  0x62   : > { %p5706_p9 = scmp.ne.s32.totalorder %s6306_s17, %s5705_s16  ;;  %s5710_s15 = sshll.u32 %s6083_s9, 4  ;;  %s5711_s15 = int_to_ptr.vmem [resolvable:$false] %s5710_s15 }
  0x63   : > { %s5712_s14 = scalar_lea.vmem %s5711_s15, 32  ;;  %p5713_p7 = scmp.lt.s32.totalorder %s6306_s17, %s5711_s15 }
  0x64   : > { %p5708_p12 = pnand %p5706_p9, %p6314_p11  ;;  %p5714_p0 = scmp.lt.s32.totalorder %s5712_s14, %s5705_s16 }
  0x66   : > { %p5709_p13 = pneg %p5708_p12  ;;  %p5715_p2 = por %p5714_p0, %p5713_p7 }
  0x68   : > { %p5716_p3 = pnand %p5715_p2, %p5709_p13 }
  0x6a   : > { %5719 = shalt.err (!%p5716_p3)
}
  0x6b   : > { %5133 = dma.hbm_to_vmem [thread:$0]  (!%p8187_p10), %s6303_s21, 16, %s6306_s17, %s8134_s11  }
  0x6c   : > { %s5096_s0 = smul.u32 48, %s6072_s23  ;;  %s8190_s4 = sld [smem:[#allocation56_spill]] }
  0x6d   : > { %s8189_s20 = smul.u32 3, %s6263_s26  ;;  %s8136_s2 = scalar_lea.sflag [#allocation9], %s6281_s29 }
  0x6f   : > { %s560_s22 = scalar_lea.vmem [#allocation8], %s8189_s20 }
  0x70   : > { %s568_s9 = sshll.u32 %s560_s22, 4  ;;  %s569_s9 = int_to_ptr.vmem [resolvable:$true] %s568_s9 }
  0x72   : > { %s6345_s14 = scalar_lea.hbm %s8190_s4, %s5096_s0  ;;  %s5725_s20 = scalar_lea.hbm %s8190_s4, 96 }
  0x73   : > { %s5720_s27 = scalar_lea.hbm %s6345_s14, 48  ;;  %p5726_p5 = scmp.lt.u32.totalorder %s6345_s14, %s8190_s4 }
  0x74   : > { %p5721_p1 = scmp.ne.s32.totalorder %s6345_s14, %s5720_s27  ;;  %p5727_p8 = scmp.lt.u32.totalorder %s5725_s20, %s5720_s27 }
  0x75   : > { %p5729_p12 = scmp.lt.u32.totalorder %s5720_s27, %s6345_s14 }
  0x76   : > { %p5723_p4 = pnand %p5721_p1, %p6314_p11  ;;  %p5728_p9 = por %p5727_p8, %p5726_p5 }
  0x78   : > { %p5724_p6 = pneg %p5723_p4  ;;  %p5730_p13 = por %p5729_p12, %p5728_p9 }
  0x7a   : > { %p5731_p7 = pnand %p5730_p13, %p5724_p6 }
  0x7c   : > { %5734 = shalt.err (!%p5731_p7)
}
  0x7d   : > { %s5735_s0 = scalar_lea.vmem %s569_s9, 48  ;;  %s6084_s15 = smov [#allocation8]  }
  0x7e   : > { %p5736_p0 = scmp.ne.s32.totalorder %s569_s9, %s5735_s0  ;;  %s5740_s16 = sshll.u32 %s6084_s15, 4  ;;  %s5741_s16 = int_to_ptr.vmem [resolvable:$false] %s5740_s16 }
  0x7f   : > { %s5742_s21 = scalar_lea.vmem %s5741_s16, 96  ;;  %p5743_p1 = scmp.lt.s32.totalorder %s569_s9, %s5741_s16 }
  0x80   : > { %p5738_p2 = pnand %p5736_p0, %p6314_p11  ;;  %p5744_p4 = scmp.lt.s32.totalorder %s5742_s21, %s5735_s0 }
  0x82   : > { %p5739_p3 = pneg %p5738_p2  ;;  %p5745_p10 = por %p5744_p4, %p5743_p1 }
  0x84   : > { %p5746_p5 = pnand %p5745_p10, %p5739_p3 }
  0x86   : > { %5749 = shalt.err (!%p5746_p5)
}
  0x87   : > { %p8191_p8 = scmp.ne.s32.totalorder %s8184_s13, 0  ;;  %s8192_s6 = sld [smem:[#allocation58_spill]] }
  0x88   : > { %s599_s20 = scalar_lea.vmem [#allocation11], %s6263_s26  ;;  %s8137_s0 = scalar_lea.sflag [#allocation12], %s6281_s29 }
  0x89   : > { %5139 = dma.hbm_to_vmem [thread:$0]  (!%p8191_p8), %s6345_s14, 48, %s569_s9, %s8136_s2  }
  0x8a   : > { %s606_s22 = sshll.u32 %s599_s20, 4  ;;  %s607_s22 = int_to_ptr.vmem [resolvable:$true] %s606_s22 }
  0x8d   : > { %s6371_s17 = scalar_lea.hbm %s8192_s6, %s6266_s24  ;;  %s5755_s14 = scalar_lea.hbm %s8192_s6, 32 }
  0x8e   : > { %s5750_s15 = scalar_lea.hbm %s6371_s17, 16  ;;  %p5756_p12 = scmp.lt.u32.totalorder %s6371_s17, %s8192_s6 }
  0x8f   : > { %p5751_p10 = scmp.ne.s32.totalorder %s6371_s17, %s5750_s15  ;;  %p5757_p13 = scmp.lt.u32.totalorder %s5755_s14, %s5750_s15 }
  0x90   : > { %p5759_p0 = scmp.lt.u32.totalorder %s5750_s15, %s6371_s17 }
  0x91   : > { %p5753_p6 = pnand %p5751_p10, %p6314_p11  ;;  %p5758_p7 = por %p5757_p13, %p5756_p12 }
  0x93   : > { %p5754_p9 = pneg %p5753_p6  ;;  %p5760_p2 = por %p5759_p0, %p5758_p7 }
  0x95   : > { %p5761_p3 = pnand %p5760_p2, %p5754_p9 }
  0x97   : > { %5764 = shalt.err (!%p5761_p3)
}
  0x98   : > { %s5765_s11 = scalar_lea.vmem %s607_s22, 16  ;;  %s6085_s20 = smov [#allocation11]  }
  0x99   : > { %p5766_p1 = scmp.ne.s32.totalorder %s607_s22, %s5765_s11  ;;  %s5770_s2 = sshll.u32 %s6085_s20, 4  ;;  %s5771_s2 = int_to_ptr.vmem [resolvable:$false] %s5770_s2 }
  0x9a   : > { %s5772_s16 = scalar_lea.vmem %s5771_s2, 32  ;;  %p5773_p10 = scmp.lt.s32.totalorder %s607_s22, %s5771_s2 }
  0x9b   : > { %p5768_p4 = pnand %p5766_p1, %p6314_p11  ;;  %p5774_p6 = scmp.lt.s32.totalorder %s5772_s16, %s5765_s11 }
  0x9d   : > { %p5769_p5 = pneg %p5768_p4  ;;  %p5775_p8 = por %p5774_p6, %p5773_p10 }
  0x9f   : > { %p5776_p12 = pnand %p5775_p8, %p5769_p5 }
  0xa1   : > { %5779 = shalt.err (!%p5776_p12)
}
  0xa2   : > { %p8193_p13 = scmp.ne.s32.totalorder %s8184_s13, 0  ;;  %s8194_s8 = sld [smem:[#allocation60_spill]] }
  0xa3   : > { %s633_s2 = scalar_lea.vmem [#allocation14], %s6263_s26  ;;  %s8138_s27 = scalar_lea.sflag [#allocation15], %s6281_s29 }
  0xa4   : > { %5145 = dma.hbm_to_vmem [thread:$0]  (!%p8193_p13), %s6371_s17, 16, %s607_s22, %s8137_s0  }
  0xa5   : > { %s640_s21 = sshll.u32 %s633_s2, 4  ;;  %s641_s21 = int_to_ptr.vmem [resolvable:$true] %s640_s21 }
  0xa8   : > { %s6398_s14 = scalar_lea.hbm %s8194_s8, %s6266_s24  ;;  %s5785_s22 = scalar_lea.hbm %s8194_s8, 32 }
  0xa9   : > { %s5780_s11 = scalar_lea.hbm %s6398_s14, 16  ;;  %p5786_p0 = scmp.lt.u32.totalorder %s6398_s14, %s8194_s8 }
  0xaa   : > { %p5781_p8 = scmp.ne.s32.totalorder %s6398_s14, %s5780_s11  ;;  %p5787_p2 = scmp.lt.u32.totalorder %s5785_s22, %s5780_s11 }
  0xab   : > { %p5789_p1 = scmp.lt.u32.totalorder %s5780_s11, %s6398_s14 }
  0xac   : > { %p5783_p9 = pnand %p5781_p8, %p6314_p11  ;;  %p5788_p3 = por %p5787_p2, %p5786_p0 }
  0xae   : > { %p5784_p7 = pneg %p5783_p9  ;;  %p5790_p4 = por %p5789_p1, %p5788_p3 }
  0xb0   : > { %p5791_p5 = pnand %p5790_p4, %p5784_p7 }
  0xb2   : > { %5794 = shalt.err (!%p5791_p5)
}
  0xb3   : > { %s5795_s9 = scalar_lea.vmem %s641_s21, 16  ;;  %s6086_s2 = smov [#allocation14]  }
  0xb4   : > { %p5796_p10 = scmp.ne.s32.totalorder %s641_s21, %s5795_s9  ;;  %s5800_s0 = sshll.u32 %s6086_s2, 4  ;;  %s5801_s0 = int_to_ptr.vmem [resolvable:$false] %s5800_s0 }
  0xb5   : > { %s5802_s20 = scalar_lea.vmem %s5801_s0, 32  ;;  %p5803_p8 = scmp.lt.s32.totalorder %s641_s21, %s5801_s0 }
  0xb6   : > { %p5798_p6 = pnand %p5796_p10, %p6314_p11  ;;  %p5804_p9 = scmp.lt.s32.totalorder %s5802_s20, %s5795_s9 }
  0xb8   : > { %p5799_p12 = pneg %p5798_p6  ;;  %p5805_p13 = por %p5804_p9, %p5803_p8 }
  0xba   : > { %p5806_p0 = pnand %p5805_p13, %p5799_p12 }
  0xbc   : > { %5809 = shalt.err (!%p5806_p0)
}
  0xbd   : > { %p8195_p2 = scmp.ne.s32.totalorder %s8184_s13, 0  ;;  %s8196_s1 = sld [smem:[#allocation53_spill]] }
  0xbe   : > { %s504_s22 = scalar_lea.vmem [#allocation3], %s6263_s26  ;;  %s5093_s15 = smul.u32 192, %s6263_s26 }
  0xbf   : > { %5151 = dma.hbm_to_vmem [thread:$0]  (!%p8195_p2), %s6398_s14, 16, %s641_s21, %s8138_s27  }
  0xc0   : > { %s511_s16 = sshll.u32 %s504_s22, 4  ;;  %s5094_s9 = smul.u32 3072, %s6072_s23  ;;  %s6429_s16 = int_to_ptr.vmem [resolvable:$true] %s511_s16 }
  0xc1   : > { %s502_s2 = scalar_lea.sflag [#allocation4], %s6263_s26 }
  0xc3   : > { %s6425_s0 = scalar_lea.hbm %s8196_s1, %s6266_s24  ;;  %s5815_s11 = scalar_lea.hbm %s8196_s1, 32 }
  0xc4   : > { %s5810_s20 = scalar_lea.hbm %s6425_s0, 16  ;;  %p5816_p1 = scmp.lt.u32.totalorder %s6425_s0, %s8196_s1 }
  0xc5   : > { %p5811_p13 = scmp.ne.s32.totalorder %s6425_s0, %s5810_s20  ;;  %p5817_p4 = scmp.lt.u32.totalorder %s5815_s11, %s5810_s20 }
  0xc6   : > { %p5819_p10 = scmp.lt.u32.totalorder %s5810_s20, %s6425_s0 }
  0xc7   : > { %p5813_p7 = pnand %p5811_p13, %p6314_p11  ;;  %p5818_p5 = por %p5817_p4, %p5816_p1 }
  0xc9   : > { %p5814_p3 = pneg %p5813_p7  ;;  %p5820_p6 = por %p5819_p10, %p5818_p5 }
  0xcb   : > { %p5821_p12 = pnand %p5820_p6, %p5814_p3 }
  0xcd   : > { %5824 = shalt.err (!%p5821_p12)
}
  0xce   : > { %s5825_s22 = scalar_lea.vmem %s6429_s16, 16  ;;  %s6087_s14 = smov [#allocation3]  }
  0xcf   : > { %p5826_p8 = scmp.ne.s32.totalorder %s6429_s16, %s5825_s22  ;;  %s5830_s21 = sshll.u32 %s6087_s14, 4  ;;  %s5831_s21 = int_to_ptr.vmem [resolvable:$false] %s5830_s21 }
  0xd0   : > { %s5832_s27 = scalar_lea.vmem %s5831_s21, 32  ;;  %p5833_p13 = scmp.lt.s32.totalorder %s6429_s16, %s5831_s21 }
  0xd1   : > { %p5828_p9 = pnand %p5826_p8, %p6314_p11  ;;  %p5834_p7 = scmp.lt.s32.totalorder %s5832_s27, %s5825_s22 }
  0xd3   : > { %p5829_p0 = pneg %p5828_p9  ;;  %p5835_p1 = por %p5834_p7, %p5833_p13 }
  0xd5   : > { %p5836_p4 = pnand %p5835_p1, %p5829_p0 }
  0xd7   : > { %5839 = shalt.err (!%p5836_p4)
}
  0xd8   : > { %5130 = dma.hbm_to_vmem [thread:$0]  (!%p8195_p2), %s6425_s0, 16, %s6429_s16, %s502_s2  }
  0xd9   : > { %s8197_s3 = sld [smem:[#allocation55_spill]]  ;;  %s539_s22 = scalar_lea.vmem [#allocation7], %s5093_s15 }
  0xda   : > { %s546_s14 = sshll.u32 %s539_s22, 4  ;;  %s6463_s14 = int_to_ptr.vmem [resolvable:$true] %s546_s14 }
  0xdf   : > { %s6459_s17 = scalar_lea.hbm %s8197_s3, %s5094_s9  ;;  %s5845_s2 = scalar_lea.hbm %s8197_s3, 6144 }
  0xe0   : > { %s5840_s21 = scalar_lea.hbm %s6459_s17, 3072  ;;  %p5846_p6 = scmp.lt.u32.totalorder %s6459_s17, %s8197_s3 }
  0xe1   : > { %p5841_p3 = scmp.ne.s32.totalorder %s6459_s17, %s5840_s21  ;;  %p5847_p12 = scmp.lt.u32.totalorder %s5845_s2, %s5840_s21 }
  0xe2   : > { %p5849_p9 = scmp.lt.u32.totalorder %s5840_s21, %s6459_s17 }
  0xe3   : > { %p5843_p5 = pnand %p5841_p3, %p6314_p11  ;;  %p5848_p8 = por %p5847_p12, %p5846_p6 }
  0xe5   : > { %p5844_p10 = pneg %p5843_p5  ;;  %p5850_p0 = por %p5849_p9, %p5848_p8 }
  0xe7   : > { %p5851_p13 = pnand %p5850_p0, %p5844_p10 }
  0xe9   : > { %5854 = shalt.err (!%p5851_p13)
}
  0xea   : > { %s5855_s15 = scalar_lea.vmem %s6463_s14, 3072  ;;  %s6088_s20 = smov [#allocation7]  }
  0xeb   : > { %p5856_p7 = scmp.ne.s32.totalorder %s6463_s14, %s5855_s15  ;;  %s5860_s11 = sshll.u32 %s6088_s20, 4  ;;  %s5861_s11 = int_to_ptr.vmem [resolvable:$false] %s5860_s11 }
  0xec   : > { %s5862_s22 = scalar_lea.vmem %s5861_s11, 6144  ;;  %p5863_p3 = scmp.lt.s32.totalorder %s6463_s14, %s5861_s11 }
  0xed   : > { %p5858_p1 = pnand %p5856_p7, %p6314_p11  ;;  %p5864_p5 = scmp.lt.s32.totalorder %s5862_s22, %s5855_s15 }
  0xef   : > { %p5859_p4 = pneg %p5858_p1  ;;  %p5865_p6 = por %p5864_p5, %p5863_p3 }
  0xf1   : > { %p5866_p12 = pnand %p5865_p6, %p5859_p4 }
  0xf3   : > { %5869 = shalt.err (!%p5866_p12)
}
  0xf4   : > { %s6089_s21 = smov 192   ;;  %s6090_s0 = smov 12  }
  0xf5   : > { %s8198_s16 = scalar_lea.sflag [#allocation6], %s6281_s29  ;;  %s4526_s2 = sshll.u32 %s6263_s26, 6 }
  0xf6   : > { %5136 = dma.hbm_to_vmem [thread:$0]  (!%p8195_p2), %s6459_s17, 3072, %s6463_s14, %s8198_s16, %s6089_s21, %s6089_s21, %s6090_s0  }
  0xf7   : > { %s4696_s9 = sshll.u32 %s6072_s23, 10  ;;  %s8199_s5 = sld [smem:[#allocation57_spill]] }
  0xf8   : > { %s579_s11 = scalar_lea.vmem [#allocation10], %s4526_s2 }
  0xf9   : > { %s586_s22 = sshll.u32 %s579_s11, 4  ;;  %s6495_s22 = int_to_ptr.vmem [resolvable:$true] %s586_s22 }
  0xfd   : > { %s6493_s15 = scalar_lea.hbm %s8199_s5, %s4696_s9  ;;  %s5875_s21 = scalar_lea.hbm %s8199_s5, 2048 }
  0xfe   : > { %s5870_s1 = scalar_lea.hbm %s6493_s15, 1024  ;;  %p5876_p0 = scmp.lt.u32.totalorder %s6493_s15, %s8199_s5 }
  0xff   : > { %p5871_p10 = scmp.ne.s32.totalorder %s6493_s15, %s5870_s1  ;;  %p5877_p13 = scmp.lt.u32.totalorder %s5875_s21, %s5870_s1 }
 0x100   : > { %p5879_p1 = scmp.lt.u32.totalorder %s5870_s1, %s6493_s15 }
 0x101   : > { %p5873_p8 = pnand %p5871_p10, %p6314_p11  ;;  %p5878_p7 = por %p5877_p13, %p5876_p0 }
 0x103   : > { %p5874_p9 = pneg %p5873_p8  ;;  %p5880_p4 = por %p5879_p1, %p5878_p7 }
 0x105   : > { %p5881_p3 = pnand %p5880_p4, %p5874_p9 }
 0x107   : > { %5884 = shalt.err (!%p5881_p3)
}
 0x108   : > { %s5885_s2 = scalar_lea.vmem %s6495_s22, 1024  ;;  %s6091_s9 = smov [#allocation10]  }
 0x109   : > { %p5886_p5 = scmp.ne.s32.totalorder %s6495_s22, %s5885_s2  ;;  %s5890_s27 = sshll.u32 %s6091_s9, 4  ;;  %s5891_s27 = int_to_ptr.vmem [resolvable:$false] %s5890_s27 }
 0x10a   : > { %s5892_s20 = scalar_lea.vmem %s5891_s27, 2048  ;;  %p5893_p10 = scmp.lt.s32.totalorder %s6495_s22, %s5891_s27 }
 0x10b   : > { %p5888_p6 = pnand %p5886_p5, %p6314_p11  ;;  %p5894_p8 = scmp.lt.s32.totalorder %s5892_s20, %s5885_s2 }
 0x10d   : > { %p5889_p12 = pneg %p5888_p6  ;;  %p5895_p0 = por %p5894_p8, %p5893_p10 }
 0x10f   : > { %p5896_p13 = pnand %p5895_p0, %p5889_p12 }
 0x111   : > { %5899 = shalt.err (!%p5896_p13)
}
 0x112   : > { %s6092_s1 = smov 64   ;;  %s6093_s11 = smov 4  }
 0x113   : > { %s8200_s17 = scalar_lea.sflag [#allocation9], %s6281_s29  ;;  %s8201_s7 = sld [smem:[#allocation59_spill]] }
 0x114   : > { %5142 = dma.hbm_to_vmem [thread:$0]  (!%p8195_p2), %s6493_s15, 1024, %s6495_s22, %s8200_s17, %s6092_s1, %s6092_s1, %s6093_s11  }
 0x115   : > { %s616_s16 = scalar_lea.vmem [#allocation13], %s6263_s26  ;;  %s4532_s9 = sshll.u32 %s6263_s26, 2 }
 0x116   : > { %s623_s2 = sshll.u32 %s616_s16, 4  ;;  %s624_s2 = int_to_ptr.vmem [resolvable:$true] %s623_s2 }
 0x119   : > { %s6524_s0 = scalar_lea.hbm %s8201_s7, %s6266_s24  ;;  %s5905_s22 = scalar_lea.hbm %s8201_s7, 32 }
 0x11a   : > { %s5900_s27 = scalar_lea.hbm %s6524_s0, 16  ;;  %p5906_p4 = scmp.lt.u32.totalorder %s6524_s0, %s8201_s7 }
 0x11b   : > { %p5901_p9 = scmp.ne.s32.totalorder %s6524_s0, %s5900_s27  ;;  %p5907_p3 = scmp.lt.u32.totalorder %s5905_s22, %s5900_s27 }
 0x11c   : > { %p5909_p6 = scmp.lt.u32.totalorder %s5900_s27, %s6524_s0 }
 0x11d   : > { %p5903_p7 = pnand %p5901_p9, %p6314_p11  ;;  %p5908_p5 = por %p5907_p3, %p5906_p4 }
 0x11f   : > { %p5904_p1 = pneg %p5903_p7  ;;  %p5910_p12 = por %p5909_p6, %p5908_p5 }
 0x121   : > { %p5911_p10 = pnand %p5910_p12, %p5904_p1 }
 0x123   : > { %5914 = shalt.err (!%p5911_p10)
}
 0x124   : > { %s5915_s17 = scalar_lea.vmem %s624_s2, 16  ;;  %s6094_s14 = smov [#allocation13]  }
 0x125   : > { %p5916_p8 = scmp.ne.s32.totalorder %s624_s2, %s5915_s17  ;;  %s5920_s21 = sshll.u32 %s6094_s14, 4  ;;  %s5921_s21 = int_to_ptr.vmem [resolvable:$false] %s5920_s21 }
 0x126   : > { %s5922_s16 = scalar_lea.vmem %s5921_s21, 32  ;;  %p5923_p9 = scmp.lt.s32.totalorder %s624_s2, %s5921_s21 }
 0x127   : > { %p5918_p0 = pnand %p5916_p8, %p6314_p11  ;;  %p5924_p7 = scmp.lt.s32.totalorder %s5922_s16, %s5915_s17 }
 0x129   : > { %p5919_p13 = pneg %p5918_p0  ;;  %p5925_p2 = por %p5924_p7, %p5923_p9 }
 0x12b   : > { %p5926_p3 = pnand %p5925_p2, %p5919_p13 }
 0x12d   : > { %5929 = shalt.err (!%p5926_p3)
}
 0x12e   : > { %p8202_p4 = scmp.ne.s32.totalorder %s8184_s13, 0  ;;  %s8203_s27 = scalar_lea.sflag [#allocation12], %s6281_s29 }
 0x12f   : > { %s4697_s20 = sshll.u32 %s6072_s23, 6  ;;  %s659_s15 = scalar_lea.vmem [#allocation16], %s4532_s9 }
 0x130   : > { %5148 = dma.hbm_to_vmem [thread:$0]  (!%p8202_p4), %s6524_s0, 16, %s624_s2, %s8203_s27  }
 0x131   : > { %s667_s22 = sshll.u32 %s659_s15, 4  ;;  %s8204_s10 = sld [smem:[#allocation62_spill]]  ;;  %s668_s22 = int_to_ptr.vmem [resolvable:$true] %s667_s22 }
 0x137   : > { %s665_s17 = scalar_lea.hbm %s8204_s10, %s4697_s20  ;;  %s5935_s3 = scalar_lea.hbm %s8204_s10, 128 }
 0x138   : > { %s5930_s14 = scalar_lea.hbm %s665_s17, 64  ;;  %p5936_p6 = scmp.lt.u32.totalorder %s665_s17, %s8204_s10 }
 0x139   : > { %p5931_p2 = scmp.ne.s32.totalorder %s665_s17, %s5930_s14  ;;  %p5937_p12 = scmp.lt.u32.totalorder %s5935_s3, %s5930_s14 }
 0x13a   : > { %p5939_p8 = scmp.lt.u32.totalorder %s5930_s14, %s665_s17 }
 0x13b   : > { %p5933_p1 = pnand %p5931_p2, %p6314_p11  ;;  %p5938_p10 = por %p5937_p12, %p5936_p6 }
 0x13d   : > { %p5934_p5 = pneg %p5933_p1  ;;  %p5940_p0 = por %p5939_p8, %p5938_p10 }
 0x13f   : > { %p5941_p13 = pnand %p5940_p0, %p5934_p5 }
 0x141   : > { %5944 = shalt.err (!%p5941_p13)
}
 0x142   : > { %s5945_s2 = scalar_lea.vmem %s668_s22, 64  ;;  %s6095_s9 = smov [#allocation16]  }
 0x143   : > { %p5946_p9 = scmp.ne.s32.totalorder %s668_s22, %s5945_s2  ;;  %s5950_s27 = sshll.u32 %s6095_s9, 4  ;;  %s5951_s27 = int_to_ptr.vmem [resolvable:$false] %s5950_s27 }
 0x144   : > { %s5952_s20 = scalar_lea.vmem %s5951_s27, 128  ;;  %p5953_p2 = scmp.lt.s32.totalorder %s668_s22, %s5951_s27 }
 0x145   : > { %p5948_p7 = pnand %p5946_p9, %p6314_p11  ;;  %p5954_p1 = scmp.lt.s32.totalorder %s5952_s20, %s5945_s2 }
 0x147   : > { %p5949_p3 = pneg %p5948_p7  ;;  %p5955_p4 = por %p5954_p1, %p5953_p2 }
 0x149   : > { %p5956_p6 = pnand %p5955_p4, %p5949_p3 }
 0x14b   : > { %5959 = shalt.err (!%p5956_p6)
}
 0x14c   : > { %p8205_p12 = scmp.ne.s32.totalorder %s8184_s13, 0  ;;  %s8206_s3 = scalar_lea.sflag [#allocation15], %s6281_s29 }
 0x14d   : > { %s6571_s1 = scalar_lea.hbm %s8117_s12, %s6266_s24  ;;  %s685_s11 = scalar_lea.vmem [#allocation17], %s6263_s26 }
 0x14e   : > { %5154 = dma.hbm_to_vmem [thread:$0]  (!%p8205_p12), %s665_s17, 64, %s668_s22, %s8206_s3  }
 0x14f   : > { %s692_s14 = sshll.u32 %s685_s11, 4  ;;  %s683_s21 = scalar_lea.sflag [#allocation18], %s6281_s29  ;;  %s693_s14 = int_to_ptr.vmem [resolvable:$true] %s692_s14 }
 0x150   : > { %s5960_s16 = scalar_lea.hbm %s6571_s1, 16  ;;  %s5965_s17 = scalar_lea.hbm %s8117_s12, 32 }
 0x151   : > { %p5961_p4 = scmp.ne.s32.totalorder %s6571_s1, %s5960_s16  ;;  %p5966_p8 = scmp.lt.u32.totalorder %s6571_s1, %s8117_s12 }
 0x152   : > { %p5967_p0 = scmp.lt.u32.totalorder %s5965_s17, %s5960_s16  ;;  %p5969_p9 = scmp.lt.u32.totalorder %s5960_s16, %s6571_s1 }
 0x153   : > { %p5963_p5 = pnand %p5961_p4, %p6314_p11 }
 0x154   : > { %p5968_p13 = por %p5967_p0, %p5966_p8 }
 0x155   : > { %p5964_p10 = pneg %p5963_p5 }
 0x156   : > { %p5970_p7 = por %p5969_p9, %p5968_p13 }
 0x158   : > { %p5971_p3 = pnand %p5970_p7, %p5964_p10 }
 0x15a   : > { %5974 = shalt.err (!%p5971_p3)
}
 0x15b   : > { %s5975_s26 = scalar_lea.vmem %s693_s14, 16  ;;  %s6096_s29 = smov [#allocation17]  }
 0x15c   : > { %p5976_p2 = scmp.ne.s32.totalorder %s693_s14, %s5975_s26  ;;  %s5980_s9 = sshll.u32 %s6096_s29, 4  ;;  %s5981_s9 = int_to_ptr.vmem [resolvable:$false] %s5980_s9 }
 0x15d   : > { %s5982_s27 = scalar_lea.vmem %s5981_s9, 32  ;;  %p5983_p4 = scmp.lt.s32.totalorder %s693_s14, %s5981_s9 }
 0x15e   : > { %p5978_p1 = pnand %p5976_p2, %p6314_p11  ;;  %p5984_p5 = scmp.lt.s32.totalorder %s5982_s27, %s5975_s26 }
 0x160   : > { %p5979_p6 = pneg %p5978_p1  ;;  %p5985_p12 = por %p5984_p5, %p5983_p4 }
 0x162   : > { %p5986_p0 = pnand %p5985_p12, %p5979_p6 }
 0x164   : > { %5989 = shalt.err (!%p5986_p0)
}
 0x165   : > { %p8207_p8 = scmp.ne.s32.totalorder %s8184_s13, 0  ;;  %p8208_p10 = scmp.ne.s32.totalorder %s8182_s18, 0 }
 0x167   : > { %5157 = dma.hbm_to_vmem [thread:$0]  (!%p8207_p8), %s6571_s1, 16, %s693_s14, %s683_s21  }
 0x168   : > { %701 = sbr.rel (%p8208_p10) target bundleno = 3431 (0xd67), region = 80 }
 0x16f   : > { %s6595_s28 = sand.u32 1, %s6056_s19   ;;  %p8209_p11 = scmp.ne.s32.totalorder %s8181_s30, 0 }
 0x170   : > { %s704_s20 = scalar_lea.sflag [#allocation4], %s6595_s28 }
 0x171   : > { %6023 = dma.done.wait (%p8209_p11), %s704_s20, 16  }
 0x172   : > { %6025 = vsyncadd (%p8209_p11), %s704_s20, 4294967280  ;;  %s8210_s13 = sadd.s32 4294967295, %s6080_s25  }
 0x173   : > { %s711_s4 = sand.u32 1, %s8210_s13  }
 0x174   : > { %s712_s18 = scalar_lea.sflag [#allocation6], %s711_s4 }
 0x175   : > { %6027 = dma.done.wait (%p8209_p11), %s712_s18, 3088  }
 0x176   : > { %6029 = vsyncadd (%p8209_p11), %s712_s18, 4294964208  ;;  %s5097_s1 = smul.u32 192, %s6595_s28  ;;  %s729_s21 = scalar_lea.sflag [#allocation9], %s711_s4 }
 0x177   : > { %s5098_s11 = smul.u32 3, %s6595_s28 }
 0x178   : > { %s6612_s14 = scalar_lea.vmem [#allocation7], %s5097_s1 }
 0x179   : > { %s6614_s16 = scalar_lea.vmem [#allocation8], %s5098_s11 }
 0x17a   : > { %6031 = dma.done.wait (%p8209_p11), %s729_s21, 1072  }
 0x17b   : > { %6033 = vsyncadd (%p8209_p11), %s729_s21, 4294966224  ;;  %s4537_s0 = sshll.u32 %s6595_s28, 6  ;;  %s747_s17 = scalar_lea.sflag [#allocation12], %s711_s4 }
 0x17c   : > { %s6621_s22 = scalar_lea.vmem [#allocation10], %s4537_s0 }
 0x17d   : > { %6035 = dma.done.wait (%p8209_p11), %s747_s17, 32  }
 0x17e   : > { %6037 = vsyncadd (%p8209_p11), %s747_s17, 4294967264  ;;  %s763_s26 = scalar_lea.sflag [#allocation15], %s711_s4 }
 0x17f   : > { %6039 = dma.done.wait (%p8209_p11), %s763_s26, 80  }
 0x180   : > { %6041 = vsyncadd (%p8209_p11), %s763_s26, 4294967216  ;;  %s4538_s9 = sshll.u32 %s6595_s28, 2  ;;  %s780_s20 = scalar_lea.sflag [#allocation18], %s711_s4 }
 0x181   : > { %s6635_s27 = scalar_lea.vmem [#allocation16], %s4538_s9 }
 0x182   : > { %6043 = dma.done.wait (%p8209_p11), %s780_s20, 16  }
 0x183   : > { %6045 = vsyncadd (%p8209_p11), %s780_s20, 4294967280  ;;  %s8211_s18 = sld [smem:[#allocation34_spill]] }
 0x189   : > { %p8212_p12 = scmp.ne.s32.totalorder %s8211_s18, 0 }
 0x18b   : > { %6047 = dma.done.wait (%p8212_p12), [#allocation18], 16  }
 0x18c   : > { %6049 = vsyncadd (%p8212_p12), [#allocation18], 4294967280  ;;  %s8213_s1 = sld [smem:[#allocation29_spill]]  ;;  %s8214_s11 = sld [smem:[#allocation28_spill]] }
 0x18d   : > { %s8215_s30 = sld [smem:[#allocation52_spill]]  ;;  %s8216_s24 = sld [smem:[#allocation61_spill]] }
 0x18e   : > { %s8217_s3 = sld [smem:[#allocation63_spill]]  ;;  %s8218_s8 = sld [smem:[#allocation66_spill]] }
 0x192   : > { %p887_p13 = scmp.lt.s32.totalorder %s8213_s1, 1  ;;  %p892_p9 = scmp.lt.s32.totalorder %s8214_s11, 1 }
 0x193   : > { %p4548_p7 = scmp.ne.s32.totalorder %s8214_s11, 0 }
 0x194   : > { %s8277_s1 = smov (!%p887_p13, %s8213_s1), 1 }
 0x195   : > { %s893_s4 = scalar_select %p892_p9, %s8214_s11, 1 }
 0x196   : > { %s4698_s21 = sshll.u32 %s8277_s1, 6  ;;  %s4701_s0 = sshll.u32 %s8277_s1, 5 }
 0x197   : > { %s891_s9 = scalar_lea.vmem %s8215_s30, %s4698_s21  ;;  %s4699_s20 = sshll.u32 %s893_s4, 8 }
 0x198   : > { %s6656_s18 = scalar_lea.vmem %s8216_s24, %s4699_s20  ;;  %s6661_s5 = scalar_lea.vmem %s8217_s3, %s4699_s20  ;;  %v912_v0 = vld [vmem:[%s891_s9] sm:$0xff] (!%p4548_p7)  ;;  %v913_v1 = vld [vmem:[%s891_s9 + $0x8] sm:$0xff] (!%p4548_p7)  ;;  %v914_v2 = vld [vmem:[%s891_s9 + $0x10] sm:$0xff] (!%p4548_p7) }
 0x199   : > { %s6666_s10 = scalar_lea.vmem %s8218_s8, %s4701_s0  ;;  %911 = sbr.rel (%p4548_p7) target bundleno = 416 (0x1a0), region = 128  ;;  %920 = vst [vmem:[#allocation2] sm:$0xff] (!%p4548_p7), %v912_v0  ;;  %921 = vst [vmem:[#allocation2 + $0x8] sm:$0xff] (!%p4548_p7), %v913_v1  ;;  %v915_v3 = vld [vmem:[%s891_s9 + $0x18] sm:$0xff] (!%p4548_p7)  ;;  %v916_v4 = vld [vmem:[%s891_s9 + $0x20] sm:$0xff] (!%p4548_p7) }
 0x19a   : > { %922 = vst [vmem:[#allocation2 + $0x10] sm:$0xff] (!%p4548_p7), %v914_v2  ;;  %v917_v5 = vld [vmem:[%s891_s9 + $0x28] sm:$0xff] (!%p4548_p7)  ;;  %923 = vst [vmem:[#allocation2 + $0x18] sm:$0xff] (!%p4548_p7), %v915_v3  ;;  %v918_v6 = vld [vmem:[%s891_s9 + $0x30] sm:$0xff] (!%p4548_p7) }
 0x19b   : > { %924 = vst [vmem:[#allocation2 + $0x20] sm:$0xff] (!%p4548_p7), %v916_v4  ;;  %925 = vst [vmem:[#allocation2 + $0x28] sm:$0xff] (!%p4548_p7), %v917_v5  ;;  %v919_v7 = vld [vmem:[%s891_s9 + $0x38] sm:$0xff] (!%p4548_p7) }
 0x19c   : > { %926 = vst [vmem:[#allocation2 + $0x30] sm:$0xff] (!%p4548_p7), %v918_v6  ;;  %927 = vst [vmem:[#allocation2 + $0x38] sm:$0xff] (!%p4548_p7), %v919_v7 }
 0x1a0 PF: > { %v928_v8 = vld [vmem:[#allocation2] sm:$0xff]  ;;  %v929_v10 = vld [vmem:[#allocation2 + $0x8] sm:$0xff]  ;;  %v5305_v56 = vld [vmem:[%s6612_s14 + $0x4c] ss:$12 sps:$4 sm:$0xff]   ;;  %v6097_v7 = vmov 0   ;;  %s8219_s6 = scalar_lea.vmem [#allocation3], %s6595_s28 }
 0x1a1   : > { %v930_v9 = vld [vmem:[#allocation2 + $0x10] sm:$0xff]  ;;  %938 = vadd.xlane.f32.xlu0 %v928_v8  ;;  %v931_v11 = vld [vmem:[#allocation2 + $0x18] sm:$0xff]  ;;  %v5297_v18 = vld [vmem:[%s6612_s14 + $0x1c] ss:$12 sps:$4 sm:$0xff]   ;;  %1268 = vmatprep.mubr.bf16.mxu0 %v6097_v7  ;;  %s8220_s7 = scalar_lea.vmem [#allocation5], %s6595_s28  ;;  %vm1509_vm0 = vcmask 261120  }
 0x1a2   : > { %942 = vadd.xlane.f32.xlu1 %v930_v9  ;;  %v932_v12 = vld [vmem:[#allocation2 + $0x20] sm:$0xff]  ;;  %v933_v13 = vld [vmem:[#allocation2 + $0x28] sm:$0xff]  ;;  %v5321_v4 = vld [vmem:[%s6612_s14 + $0xac] ss:$12 sps:$4 sm:$0xff]   ;;  %s6098_s8 = smov 96   ;;  %s6099_s3 = smov 64  }
 0x1a3   : > { %v934_v14 = vld [vmem:[#allocation2 + $0x30] sm:$0xff]  ;;  %v935_v15 = vld [vmem:[#allocation2 + $0x38] sm:$0xff]  ;;  %v5313_v62 = vld [vmem:[%s6612_s14 + $0x7c] ss:$12 sps:$4 sm:$0xff]   ;;  %s6100_s15 = smov 32   ;;  %vm1914_vm2 = vcmask 523264  }
 0x1a4   : > { %v5294_v16 = vld [vmem:[%s6612_s14 + $0x4] ss:$12 sps:$4 sm:$0xff]   ;;  %v5296_v17 = vld [vmem:[%s6612_s14] ss:$12 sps:$4 sm:$0xff]   ;;  %v5299_v19 = vld [vmem:[%s6612_s14 + $0x8] ss:$12 sps:$4 sm:$0xff]  }
 0x1a5   : > { %940 = vadd.xlane.f32.xlu0 %v929_v10  ;;  %1236 = vmatprep.subr.bf16.mxu0 %v5294_v16  ;;  %v5300_v52 = vld [vmem:[%s6612_s14 + $0x18] ss:$12 sps:$4 sm:$0xff]   ;;  %v5301_v53 = vld [vmem:[%s6612_s14 + $0x34] ss:$12 sps:$4 sm:$0xff]   ;;  %v5304_v55 = vld [vmem:[%s6612_s14 + $0x30] ss:$12 sps:$4 sm:$0xff]  }
 0x1a6   : > { %944 = vadd.xlane.f32.xlu1 %v931_v11  ;;  %1237 = vmatpush1.bf16.msra.mxu0 %v5296_v17  ;;  %v5303_v54 = vld [vmem:[%s6612_s14 + $0x20] ss:$12 sps:$4 sm:$0xff]   ;;  %v5307_v57 = vld [vmem:[%s6612_s14 + $0x38] ss:$12 sps:$4 sm:$0xff]   ;;  %v5308_v58 = vld [vmem:[%s6612_s14 + $0x48] ss:$12 sps:$4 sm:$0xff]  }
 0x1a7   : > { %4901 = vmatprep.subr.bf16.mxu1 %v5299_v19  ;;  %1238 = vmatprep.subr.bf16.mxu0 %v5297_v18  ;;  %v5309_v59 = vld [vmem:[%s6612_s14 + $0x64] ss:$12 sps:$4 sm:$0xff]   ;;  %v5312_v61 = vld [vmem:[%s6612_s14 + $0x60] ss:$12 sps:$4 sm:$0xff]   ;;  %v5315_v63 = vld [vmem:[%s6612_s14 + $0x68] ss:$12 sps:$4 sm:$0xff]  }
 0x1a8   : > { %4902 = vmatpush3.bf16.msra.mxu1 %v5299_v19  ;;  %v5311_v60 = vld [vmem:[%s6612_s14 + $0x50] ss:$12 sps:$4 sm:$0xff]   ;;  %v5316_v0 = vld [vmem:[%s6612_s14 + $0x78] ss:$12 sps:$4 sm:$0xff]   ;;  %v5317_v1 = vld [vmem:[%s6612_s14 + $0x94] ss:$12 sps:$4 sm:$0xff]  }
 0x1a9   : > { %946 = vadd.xlane.f32.xlu0 %v932_v12  ;;  %4903 = vmatprep.subr.bf16.mxu1 %v5303_v54  ;;  %v5319_v2 = vld [vmem:[%s6612_s14 + $0x80] ss:$12 sps:$4 sm:$0xff]   ;;  %v5320_v3 = vld [vmem:[%s6612_s14 + $0x90] ss:$12 sps:$4 sm:$0xff]   ;;  %v5323_v5 = vld [vmem:[%s6612_s14 + $0x98] ss:$12 sps:$4 sm:$0xff]  }
 0x1aa   : > { %948 = vadd.xlane.f32.xlu1 %v933_v13  ;;  %1239 = vmatpush1.bf16.msra.mxu0 %v5300_v52  ;;  %v5324_v6 = vld [vmem:[%s6612_s14 + $0xa8] ss:$12 sps:$4 sm:$0xff]   ;;  %vm2703_vm10 = vcmask 785408  }
 0x1ab   : > { %1240 = vmatprep.subr.bf16.mxu0 %v5301_v53 }
 0x1ac   : > { %4904 = vmatpush3.bf16.msra.mxu1 %v5303_v54 }
 0x1ad   : > { %950 = vadd.xlane.f32.xlu0 %v934_v14  ;;  %4905 = vmatprep.subr.bf16.mxu1 %v5307_v57 }
 0x1ae   : > { %952 = vadd.xlane.f32.xlu1 %v935_v15  ;;  %1241 = vmatpush1.bf16.msra.mxu0 %v5304_v55 }
 0x1af   : > { %1242 = vmatprep.subr.bf16.mxu0 %v5305_v56 }
 0x1b0   : > { %4906 = vmatpush3.bf16.msra.mxu1 %v5307_v57 }
 0x1b1   : > { %4907 = vmatprep.subr.bf16.mxu1 %v5311_v60 }
 0x1b2   : > { %1243 = vmatpush1.bf16.msra.mxu0 %v5308_v58 }
 0x1b3   : > { %1244 = vmatprep.subr.bf16.mxu0 %v5309_v59 }
 0x1b4   : > { %4908 = vmatpush3.bf16.msra.mxu1 %v5311_v60 }
 0x1b5   : > { %4909 = vmatprep.subr.bf16.mxu1 %v5315_v63 }
 0x1b6   : > { %1245 = vmatpush1.bf16.msra.mxu0 %v5312_v61 }
 0x1b7   : > { %1246 = vmatprep.subr.bf16.mxu0 %v5313_v62 }
 0x1b8   : > { %4910 = vmatpush3.bf16.msra.mxu1 %v5315_v63 }
 0x1b9   : > { %4911 = vmatprep.subr.bf16.mxu1 %v5319_v2 }
 0x1ba   : > { %1247 = vmatpush1.bf16.msra.mxu0 %v5316_v0 }
 0x1bb   : > { %1248 = vmatprep.subr.bf16.mxu0 %v5317_v1 }
 0x1bc   : > { %4912 = vmatpush3.bf16.msra.mxu1 %v5319_v2 }
 0x1bd   : > { %4913 = vmatprep.subr.bf16.mxu1 %v5323_v5 }
 0x1be   : > { %1249 = vmatpush1.bf16.msra.mxu0 %v5320_v3 }
 0x1bf   : > { %1250 = vmatprep.subr.bf16.mxu0 %v5321_v4 }
 0x1c0   : > { %4914 = vmatpush3.bf16.msra.mxu1 %v5323_v5 }
 0x1c2   : > { %1251 = vmatpush1.bf16.msra.mxu0 %v5324_v6 }
 0x22e   : > { %v939_v20 = vpop.xlane.xlu0 %938 }
 0x22f   : > { %v943_v21 = vpop.xlane.xlu1 %942  ;;  %v955_v22 = vmul.f32 0.0078125, %v939_v20 }
 0x230   : > { %v957_v23 = vmul.f32 0.0078125, %v943_v21 }
 0x231   : > { %v6673_v24 = vsub.f32 %v928_v8, %v955_v22  ;;  %v5325_v8 = vld [vmem:[%s6612_s14 + $0xb0] ss:$12 sps:$4 sm:$0xff]   ;;  %s8221_s14 = scalar_lea.vmem [#allocation11], %s6595_s28 }
 0x232   : > { %v6675_v25 = vsub.f32 %v930_v9, %v957_v23  ;;  %v941_v26 = vpop.xlane.xlu0 %940  ;;  %4915 = vmatprep.subr.bf16.mxu1 %v5325_v8 }
 0x233   : > { %v945_v27 = vpop.xlane.xlu1 %944  ;;  %v956_v28 = vmul.f32 0.0078125, %v941_v26  ;;  %v971_v29 = vmul.f32 %v6673_v24, %v6673_v24  ;;  %4916 = vmatpush3.bf16.msra.mxu1 %v5325_v8 }
 0x234   : > { %v958_v30 = vmul.f32 0.0078125, %v945_v27  ;;  %v973_v31 = vmul.f32 %v6675_v25, %v6675_v25 }
 0x235   : > { %979 = vadd.xlane.f32.xlu0 %v971_v29  ;;  %v6681_v32 = vsub.f32 %v929_v10, %v956_v28 }
 0x236   : > { %v6683_v33 = vsub.f32 %v931_v11, %v958_v30  ;;  %v947_v34 = vpop.xlane.xlu0 %946 }
 0x237   : > { %v949_v35 = vpop.xlane.xlu1 %948  ;;  %v959_v36 = vmul.f32 0.0078125, %v947_v34  ;;  %v972_v37 = vmul.f32 %v6681_v32, %v6681_v32 }
 0x238   : > { %v960_v38 = vmul.f32 0.0078125, %v949_v35  ;;  %v974_v39 = vmul.f32 %v6683_v33, %v6683_v33 }
 0x239   : > { %983 = vadd.xlane.f32.xlu0 %v973_v31  ;;  %981 = vadd.xlane.f32.xlu1 %v972_v37  ;;  %v6689_v40 = vsub.f32 %v932_v12, %v959_v36 }
 0x23a   : > { %v6691_v41 = vsub.f32 %v933_v13, %v960_v38  ;;  %v951_v42 = vpop.xlane.xlu0 %950  ;;  %v4549_v38 = vld [vmem:[%s8219_s6] ss:$0 sm:$0xff] }
 0x23b   : > { %v953_v43 = vpop.xlane.xlu1 %952  ;;  %v961_v44 = vmul.f32 0.0078125, %v951_v42  ;;  %v975_v45 = vmul.f32 %v6689_v40, %v6689_v40 }
 0x23c   : > { %v962_v46 = vmul.f32 0.0078125, %v953_v43  ;;  %v976_v47 = vmul.f32 %v6691_v41, %v6691_v41 }
 0x23d   : > { %985 = vadd.xlane.f32.xlu1 %v974_v39  ;;  %987 = vadd.xlane.f32.xlu0 %v975_v45  ;;  %v6697_v48 = vsub.f32 %v934_v14, %v961_v44 }
 0x23e   : > { %v6699_v49 = vsub.f32 %v935_v15, %v962_v46  ;;  %v4550_v46 = vld [vmem:[%s8220_s7] ss:$0 sm:$0xff] }
 0x23f   : > { %v977_v50 = vmul.f32 %v6697_v48, %v6697_v48 }
 0x240   : > { %v978_v51 = vmul.f32 %v6699_v49, %v6699_v49 }
 0x241   : > { %989 = vadd.xlane.f32.xlu1 %v976_v47  ;;  %991 = vadd.xlane.f32.xlu0 %v977_v50 }
 0x245   : > { %993 = vadd.xlane.f32.xlu1 %v978_v51 }
 0x2c2   : > { %v980_v9 = vpop.xlane.xlu0 %979 }
 0x2c3   : > { %v995_v10 = vmul.f32 0.0078125, %v980_v9 }
 0x2c5   : > { %v1003_v11 = vadd.f32 1e-05, %v995_v10 }
 0x2c6   : > { %v982_v12 = vpop.xlane.xlu1 %981  ;;  %v984_v13 = vpop.xlane.xlu0 %983 }
 0x2c7   : > { %5414 = vrsqrt.f32 %v1003_v11  ;;  %v996_v14 = vmul.f32 0.0078125, %v982_v12  ;;  %v997_v15 = vmul.f32 0.0078125, %v984_v13  ;;  %v1091_v11 = vld [vmem:[%s6614_s16] sm:$0x7]  ;;  %s8230_s16 = scalar_lea.vmem [#allocation13], %s6595_s28 }
 0x2c9   : > { %v1004_v16 = vadd.f32 1e-05, %v996_v14  ;;  %v1005_v17 = vadd.f32 1e-05, %v997_v15 }
 0x2ca   : > { %v986_v18 = vpop.xlane.xlu1 %985  ;;  %v988_v19 = vpop.xlane.xlu0 %987 }
 0x2cb   : > { %5416 = vrsqrt.f32 %v1004_v16  ;;  %v998_v20 = vmul.f32 0.0078125, %v986_v18  ;;  %v999_v21 = vmul.f32 0.0078125, %v988_v19 }
 0x2cc   : > { %5418 = vrsqrt.f32 %v1005_v17 }
 0x2cd   : > { %v1006_v22 = vadd.f32 1e-05, %v998_v20  ;;  %v1007_v23 = vadd.f32 1e-05, %v999_v21 }
 0x2ce   : > { %v990_v26 = vpop.xlane.xlu1 %989  ;;  %v992_v27 = vpop.xlane.xlu0 %991 }
 0x2cf   : > { %5420 = vrsqrt.f32 %v1006_v22  ;;  %v1000_v28 = vmul.f32 0.0078125, %v990_v26  ;;  %v1001_v29 = vmul.f32 0.0078125, %v992_v27 }
 0x2d0   : > { %5422 = vrsqrt.f32 %v1007_v23 }
 0x2d1   : > { %v5415_v30 = vpop.eup %5414  ;;  %v1008_v31 = vadd.f32 1e-05, %v1000_v28  ;;  %v1009_v34 = vadd.f32 1e-05, %v1001_v29 }
 0x2d2   : > { %v994_v35 = vpop.xlane.xlu1 %993  ;;  %v1019_v36 = vmul.f32 %v5415_v30, %v6673_v24 }
 0x2d3   : > { %5424 = vrsqrt.f32 %v1008_v31  ;;  %v1002_v37 = vmul.f32 0.0078125, %v994_v35 }
 0x2d4   : > { %5426 = vrsqrt.f32 %v1009_v34  ;;  %v1033_v45 = vmul.f32 %v4549_v38, %v1019_v36 }
 0x2d5   : > { %v5417_v39 = vpop.eup %5416  ;;  %v1010_v42 = vadd.f32 1e-05, %v1002_v37 }
 0x2d6   : > { %v5419_v43 = vpop.eup %5418  ;;  %v1020_v44 = vmul.f32 %v5417_v39, %v6681_v32  ;;  %v1047_v53 = vadd.f32 %v4550_v46, %v1033_v45 }
 0x2d7   : > { %5428 = vrsqrt.f32 %v1010_v42  ;;  %v1021_v47 = vmul.f32 %v5419_v43, %v6675_v25 }
 0x2d8   : > { %v1034_v50 = vmul.f32 %v4549_v38, %v1020_v44 }
 0x2d9   : > { %v5421_v51 = vpop.eup %5420  ;;  %v1035_v52 = vmul.f32 %v4549_v38, %v1021_v47 }
 0x2da   : > { %v5423_v24 = vpop.eup %5422  ;;  %v1048_v54 = vadd.f32 %v4550_v46, %v1034_v50  ;;  %v1022_v55 = vmul.f32 %v5421_v51, %v6683_v33 }
 0x2db   : > { %v1023_v56 = vmul.f32 %v5423_v24, %v6689_v40  ;;  %v1049_v32 = vadd.f32 %v4550_v46, %v1035_v52 }
 0x2dc   : > { %v1055_v57 = vpack.c.bf16 %v1048_v54, %v1047_v53  ;;  %v1036_v58 = vmul.f32 %v4549_v38, %v1022_v55 }
 0x2dd   : > { %v5425_v59 = vpop.eup %5424  ;;  %v1037_v62 = vmul.f32 %v4549_v38, %v1023_v56 }
 0x2de   : > { %v5427_v60 = vpop.eup %5426  ;;  %1269 = vmatmul.mubr.bf16.vlgmr.msra.gmra.mrb[0].mxu0 %v1055_v57  ;;  %4917 = vmatprep.mubr.bf16.mxu1 %v1055_v57  ;;  %v1050_v61 = vadd.f32 %v4550_v46, %v1036_v58  ;;  %v1024_v25 = vmul.f32 %v5425_v59, %v6691_v41 }
 0x2df   : > { %1278 = vmatprep.mubr.bf16.mxu0 %v6097_v7  ;;  %v1025_v63 = vmul.f32 %v5427_v60, %v6697_v48  ;;  %v1051_v40 = vadd.f32 %v4550_v46, %v1037_v62  ;;  %v1093_v48 = vlaneseq }
 0x2e0   : > { %v1056_v0 = vpack.c.bf16 %v1050_v61, %v1049_v32  ;;  %v1038_v1 = vmul.f32 %v4549_v38, %v1024_v25 }
 0x2e1   : > { %v5429_v33 = vpop.eup %5428  ;;  %v1039_v4 = vmul.f32 %v4549_v38, %v1025_v63  ;;  %v6742_v10 = vshrl.u32 %v1093_v48, 7 }
 0x2e2   : > { %4918 = vmatmul.mubr.bf16.vlgmr.msra.gmra.mrb[0].mxu1 %v1056_v0  ;;  %v1052_v2 = vadd.f32 %v4550_v46, %v1038_v1  ;;  %v1026_v3 = vmul.f32 %v5429_v33, %v6699_v49 }
 0x2e3   : > { %v1053_v41 = vadd.f32 %v4550_v46, %v1039_v4  ;;  %v1095_v49 = vsub.s32 0, %v6742_v10  ;;  %v1099_v12 = vsub.s32 1, %v6742_v10  ;;  %v1103_v14 = vsub.s32 2, %v6742_v10 }
 0x2e4   : > { %v1057_v5 = vpack.c.bf16 %v1052_v2, %v1051_v40  ;;  %v1040_v6 = vmul.f32 %v4549_v38, %v1026_v3 }
 0x2e5   : > { %v6749_v13 = vrot.slane %v1091_v11, %v1095_v49  ;;  %v6754_v16 = vrot.slane %v1091_v11, %v1099_v12  ;;  %v1104_v22 = vrot.slane %v1091_v11, %v1103_v14 }
 0x2e6   : > { %1279 = vmatmul.mubr.bf16.gmra.mrb[4].mxu0 %v1056_v0  ;;  %4921 = vmatprep.mubr.bf16.mxu1 %v1057_v5  ;;  %v1054_v8 = vadd.f32 %v4550_v46, %v1040_v6 }
 0x2e7   : > { %1288 = vmatprep.mubr.bf16.mxu0 %v6097_v7 }
 0x2e8   : > { %v1058_v9 = vpack.c.bf16 %v1054_v8, %v1053_v41 }
 0x2ea   : > { %4922 = vmatmul.mubr.bf16.gmra.mrb[4].mxu1 %v1058_v9 }
 0x2ee   : > { %1289 = vmatmul.mubr.bf16.gmra.mrb[8].mxu0 %v1057_v5 }
 0x2ef   : > { %1298 = vmatprep.mubr.bf16.mxu0 %v6097_v7 }
 0x2f6   : > { %1299 = vmatmul.mubr.bf16.gmra.mrb[12].mxu0 %v1058_v9 }
 0x3b1   : > { %v1270_v15 = vpop.f32.mrb[0].mxu0 }
 0x3b2   : > { %v1271_v17 = vadd.f32 %v1270_v15, %v6749_v13  ;;  %v1272_v18 = vpop.f32.mrb[1].mxu0 }
 0x3b3   : > { %v1274_v19 = vpop.f32.mrb[2].mxu0  ;;  %v1273_v23 = vadd.f32 %v1272_v18, %v6754_v16 }
 0x3b4   : > { %v1275_v20 = vadd.f32 %v1274_v19, %v6749_v13  ;;  %v1276_v21 = vpop.f32.mrb[3].mxu0  ;;  %v1374_v28 = vmul.f32 0.17677669, %v1271_v17 }
 0x3b5   : > { %v1277_v26 = vadd.f32 %v1276_v21, %v6754_v16  ;;  %v4919_v27 = vpop.f32.mrb[0].mxu1 }
 0x3b6   : > { %v1375_v29 = vmul.f32 0.17677669, %v1275_v20  ;;  %v1343_v30 = vpop.f32.mrb[1].mxu1  ;;  %v1352_v36 = vadd.f32 %v4919_v27, %v1104_v22 }
 0x3b7   : > { %v1414_v31 = vpack.c.bf16 %v1277_v26, %v1273_v23  ;;  %v4920_v34 = vpop.f32.mrb[2].mxu1  ;;  %v1344_v39 = vadd.f32 %v1343_v30, %v1104_v22 }
 0x3b8   : > { %v6762_v35 = vpack.c.bf16 %v1375_v29, %v1374_v28  ;;  %v1355_v37 = vadd.f32 %v4920_v34, %v1104_v22  ;;  %v1346_v38 = vpop.f32.mrb[3].mxu1 }
 0x3b9   : > { %v1347_v42 = vadd.f32 %v1346_v38, %v1104_v22  ;;  %1422 = vrot.lane.b32.xlu0 %v1414_v31, %s6098_s8  ;;  %v1280_v43 = vpop.f32.mrb[4].mxu0  ;;  %5077 = vmatprep.subr.msk.bf16.mxu0 %vm1509_vm0, %v1414_v31  ;;  %v1523_v44 = vsel %vm1509_vm0, %v1414_v31, 0 }
 0x3ba   : > { %v6767_v45 = vpack.c.bf16 %v1355_v37, %v1352_v36  ;;  %v1281_v46 = vadd.f32 %v1280_v43, %v6749_v13  ;;  %v1282_v47 = vpop.f32.mrb[5].mxu0  ;;  %4926 = vmatpush3.bf16.xpose.msra.mxu0 %v1523_v44  ;;  %4933 = vmatprep.mubr.msk.bf16.mxu0 %vm1509_vm0, %v6762_v35 }
 0x3bb   : > { %v6772_v50 = vpack.c.bf16 %v1347_v42, %v1344_v39  ;;  %v1284_v51 = vpop.f32.mrb[6].mxu0  ;;  %v1283_v53 = vadd.f32 %v1282_v47, %v6754_v16 }
 0x3bc   : > { %v1285_v52 = vadd.f32 %v1284_v51, %v6749_v13  ;;  %v1286_v24 = vpop.f32.mrb[7].mxu0  ;;  %v1376_v56 = vmul.f32 0.17677669, %v1281_v46 }
 0x3bd   : > { %v1287_v54 = vadd.f32 %v1286_v24, %v6754_v16  ;;  %1430 = vrot.lane.b32.xlu0 %v1414_v31, %s6099_s3  ;;  %v4923_v55 = vpop.f32.mrb[4].mxu1 }
 0x3be   : > { %v1377_v57 = vmul.f32 0.17677669, %v1285_v52  ;;  %v1359_v58 = vpop.f32.mrb[5].mxu1  ;;  %v1368_v61 = vadd.f32 %v4923_v55, %v1104_v22 }
 0x3bf   : > { %v1415_v59 = vpack.c.bf16 %v1287_v54, %v1283_v53  ;;  %v4924_v32 = vpop.f32.mrb[6].mxu1  ;;  %v1360_v63 = vadd.f32 %v1359_v58, %v1104_v22 }
 0x3c0   : > { %v6778_v60 = vpack.c.bf16 %v1377_v57, %v1376_v56  ;;  %v1371_v25 = vadd.f32 %v4924_v32, %v1104_v22  ;;  %v1362_v62 = vpop.f32.mrb[7].mxu1 }
 0x3c1   : > { %v1363_v0 = vadd.f32 %v1362_v62, %v1104_v22  ;;  %1438 = vrot.lane.b32.xlu0 %v1414_v31, %s6100_s15  ;;  %1424 = vrot.lane.b32.xlu1 %v1415_v59, %s6098_s8  ;;  %v1290_v1 = vpop.f32.mrb[8].mxu0  ;;  %v1526_v33 = vsel %vm1509_vm0, %v1415_v59, 0 }
 0x3c2   : > { %v6783_v40 = vpack.c.bf16 %v1371_v25, %v1368_v61  ;;  %v1291_v2 = vadd.f32 %v1290_v1, %v6749_v13  ;;  %5078 = vmatprep.subr.msk.bf16.mxu0 %vm1509_vm0, %v1415_v59  ;;  %v1292_v3 = vpop.f32.mrb[9].mxu0 }
 0x3c3   : > { %v6787_v4 = vpack.c.bf16 %v1363_v0, %v1360_v63  ;;  %4928 = vmatpush3.bf16.xpose.msra.mxu0 %v1526_v33  ;;  %v1294_v5 = vpop.f32.mrb[10].mxu0  ;;  %v1293_v8 = vadd.f32 %v1292_v3, %v6754_v16 }
 0x3c4   : > { %v1295_v6 = vadd.f32 %v1294_v5, %v6749_v13  ;;  %v1296_v41 = vpop.f32.mrb[11].mxu0  ;;  %v1378_v11 = vmul.f32 0.17677669, %v1291_v2 }
 0x3c5   : > { %v1297_v9 = vadd.f32 %v1296_v41, %v6754_v16  ;;  %1432 = vrot.lane.b32.xlu0 %v1415_v59, %s6099_s3 }
 0x3c6   : > { %v1379_v15 = vmul.f32 0.17677669, %v1295_v6 }
 0x3c7   : > { %v1416_v17 = vpack.c.bf16 %v1297_v9, %v1293_v8 }
 0x3c8   : > { %v1384_v18 = vpack.c.bf16 %v1379_v15, %v1378_v11 }
 0x3c9   : > { %1434 = vrot.lane.b32.xlu0 %v1416_v17, %s6099_s3  ;;  %1426 = vrot.lane.b32.xlu1 %v1416_v17, %s6098_s8  ;;  %v1300_v19 = vpop.f32.mrb[12].mxu0  ;;  %v1529_v20 = vsel %vm1509_vm0, %v1416_v17, 0 }
 0x3ca   : > { %v1301_v21 = vadd.f32 %v1300_v19, %v6749_v13  ;;  %5079 = vmatprep.subr.msk.bf16.mxu0 %vm1509_vm0, %v1416_v17  ;;  %v1302_v22 = vpop.f32.mrb[13].mxu0  ;;  %v6896_v19 = vadd.s32 16, %v6742_v10 }
 0x3cb   : > { %4930 = vmatpush3.bf16.xpose.msra.mxu0 %v1529_v20  ;;  %v1304_v23 = vpop.f32.mrb[14].mxu0  ;;  %v1303_v28 = vadd.f32 %v1302_v22, %v6754_v16 }
 0x3cc   : > { %v1305_v26 = vadd.f32 %v1304_v23, %v6749_v13  ;;  %v1306_v27 = vpop.f32.mrb[15].mxu0  ;;  %v1380_v30 = vmul.f32 0.17677669, %v1301_v21  ;;  %v6909_v21 = vadd.s32 24, %v6742_v10 }
 0x3cd   : > { %v1307_v29 = vadd.f32 %v1306_v27, %v6754_v16  ;;  %1394 = vrot.lane.b32.xlu0 %v1384_v18, %s6098_s8 }
 0x3ce   : > { %v1381_v31 = vmul.f32 0.17677669, %v1305_v26 }
 0x3cf   : > { %v1417_v34 = vpack.c.bf16 %v1307_v29, %v1303_v28 }
 0x3d0   : > { %v1385_v36 = vpack.c.bf16 %v1381_v31, %v1380_v30  ;;  %v6933_v30 = vadd.s32 48, %v6742_v10  ;;  %v6936_v31 = vadd.s32 56, %v6742_v10 }
 0x3d1   : > { %1428 = vrot.lane.b32.xlu1 %v1417_v34, %s6098_s8  ;;  %5080 = vmatprep.subr.msk.bf16.mxu0 %vm1509_vm0, %v1417_v34  ;;  %v1532_v37 = vsel %vm1509_vm0, %v1417_v34, 0 }
 0x3d2   : > { %1396 = vrot.lane.b32.xlu0 %v1385_v36, %s6098_s8 }
 0x3d3   : > { %4932 = vmatpush3.bf16.xpose.msra.mxu0 %v1532_v37  ;;  %v6943_v37 = vadd.s32 40, %v6742_v10 }
 0x3d5   : > { %1390 = vrot.lane.b32.xlu1 %v6762_v35, %s6098_s8 }
 0x3d6   : > { %1398 = vrot.lane.b32.xlu0 %v6762_v35, %s6099_s3 }
 0x3d9   : > { %1392 = vrot.lane.b32.xlu1 %v6778_v60, %s6098_s8 }
 0x3da   : > { %4934 = vmatmul.mubr.msk.bf16.vlgmr.msra.gmra.mrb[16].mxu0 %vm1509_vm0, %v6778_v60  ;;  %1406 = vrot.lane.b32.xlu0 %v6762_v35, %s6100_s15 }
 0x3db   : > { %4937 = vmatprep.mubr.msk.bf16.mxu0 %vm1509_vm0, %v1384_v18 }
 0x3dd   : > { %1440 = vrot.lane.b32.xlu1 %v1415_v59, %s6100_s15 }
 0x3de   : > { %1402 = vrot.lane.b32.xlu0 %v1384_v18, %s6099_s3 }
 0x3e1   : > { %1442 = vrot.lane.b32.xlu1 %v1416_v17, %s6100_s15 }
 0x3e2   : > { %4938 = vmatmul.mubr.msk.bf16.gmra.mrb[20].mxu0 %vm1509_vm0, %v1385_v36  ;;  %1410 = vrot.lane.b32.xlu0 %v1384_v18, %s6100_s15 }
 0x3e5   : > { %1436 = vrot.lane.b32.xlu1 %v1417_v34, %s6099_s3 }
 0x3e6   : > { %1454 = vrot.lane.b32.xlu0 %v6772_v50, %s6098_s8 }
 0x3e9   : > { %1444 = vrot.lane.b32.xlu1 %v1417_v34, %s6100_s15 }
 0x3ea   : > { %1466 = vrot.lane.b32.xlu0 %v6772_v50, %s6099_s3 }
 0x3ed   : > { %1400 = vrot.lane.b32.xlu1 %v6778_v60, %s6099_s3 }
 0x3ee   : > { %1468 = vrot.lane.b32.xlu0 %v6767_v45, %s6099_s3 }
 0x3f1   : > { %1408 = vrot.lane.b32.xlu1 %v6778_v60, %s6100_s15 }
 0x3f2   : > { %1470 = vrot.lane.b32.xlu0 %v6787_v4, %s6099_s3 }
 0x3f5   : > { %1404 = vrot.lane.b32.xlu1 %v1385_v36, %s6099_s3 }
 0x3f9   : > { %1412 = vrot.lane.b32.xlu1 %v1385_v36, %s6100_s15 }
 0x3fd   : > { %1456 = vrot.lane.b32.xlu1 %v6767_v45, %s6098_s8 }
 0x401   : > { %1458 = vrot.lane.b32.xlu1 %v6787_v4, %s6098_s8 }
 0x405   : > { %1460 = vrot.lane.b32.xlu1 %v6783_v40, %s6098_s8 }
 0x409   : > { %1478 = vrot.lane.b32.xlu1 %v6772_v50, %s6100_s15 }
 0x40d   : > { %1480 = vrot.lane.b32.xlu1 %v6767_v45, %s6100_s15 }
 0x42b   : > { %v1423_v13 = vpop.permute.xlu0 %1422 }
 0x42c   : > { %5081 = vmatprep.subr.msk.bf16.mxu1 %vm1509_vm0, %v1423_v13  ;;  %v1612_v16 = vsel %vm1509_vm0, %v1423_v13, 0 }
 0x42d   : > { %4942 = vmatpush3.bf16.xpose.msra.mxu1 %v1612_v16 }
 0x42f   : > { %v1431_v35 = vpop.permute.xlu0 %1430 }
 0x430   : > { %5085 = vmatprep.subr.msk.bf16.mxu0 %vm1509_vm0, %v1431_v35  ;;  %v1701_v38 = vsel %vm1509_vm0, %v1431_v35, 0  ;;  %v6953_v35 = vadd.s32 32, %v6742_v10 }
 0x431   : > { %4958 = vmatpush3.bf16.xpose.msra.mxu0 %v1701_v38 }
 0x433   : > { %v1425_v39 = vpop.permute.xlu1 %1424  ;;  %v1439_v42 = vpop.permute.xlu0 %1438 }
 0x434   : > { %5082 = vmatprep.subr.msk.bf16.mxu1 %vm1509_vm0, %v1425_v39  ;;  %v1615_v43 = vsel %vm1509_vm0, %v1425_v39, 0  ;;  %v1790_v60 = vsel %vm1509_vm0, %v1439_v42, 0 }
 0x435   : > { %4944 = vmatpush3.bf16.xpose.msra.mxu1 %v1615_v43 }
 0x437   : > { %v1433_v44 = vpop.permute.xlu0 %1432 }
 0x438   : > { %5086 = vmatprep.subr.msk.bf16.mxu0 %vm1509_vm0, %v1433_v44  ;;  %v1704_v46 = vsel %vm1509_vm0, %v1433_v44, 0 }
 0x439   : > { %4960 = vmatpush3.bf16.xpose.msra.mxu0 %v1704_v46 }
 0x43b   : > { %v1427_v47 = vpop.permute.xlu1 %1426  ;;  %v1435_v51 = vpop.permute.xlu0 %1434 }
 0x43c   : > { %5083 = vmatprep.subr.msk.bf16.mxu1 %vm1509_vm0, %v1427_v47  ;;  %5087 = vmatprep.subr.msk.bf16.mxu0 %vm1509_vm0, %v1435_v51  ;;  %v1618_v52 = vsel %vm1509_vm0, %v1427_v47, 0  ;;  %v1707_v53 = vsel %vm1509_vm0, %v1435_v51, 0 }
 0x43d   : > { %4946 = vmatpush3.bf16.xpose.msra.mxu1 %v1618_v52 }
 0x43f   : > { %v1395_v24 = vpop.permute.xlu0 %1394 }
 0x441   : > { %4962 = vmatpush3.bf16.xpose.msra.mxu0 %v1707_v53 }
 0x443   : > { %v1429_v54 = vpop.permute.xlu1 %1428 }
 0x444   : > { %5084 = vmatprep.subr.msk.bf16.mxu1 %vm1509_vm0, %v1429_v54  ;;  %v1397_v55 = vpop.permute.xlu0 %1396  ;;  %v1621_v56 = vsel %vm1509_vm0, %v1429_v54, 0 }
 0x445   : > { %4948 = vmatpush3.bf16.xpose.msra.mxu1 %v1621_v56 }
 0x446   : > { %5089 = vmatprep.subr.msk.bf16.mxu1 %vm1509_vm0, %v1439_v42 }
 0x447   : > { %v1391_v57 = vpop.permute.xlu1 %1390 }
 0x448   : > { %4949 = vmatprep.mubr.msk.bf16.mxu1 %vm1509_vm0, %v1391_v57  ;;  %v1399_v58 = vpop.permute.xlu0 %1398 }
 0x449   : > { %4965 = vmatprep.mubr.msk.bf16.mxu0 %vm1509_vm0, %v1399_v58 }
 0x44b   : > { %v1393_v59 = vpop.permute.xlu1 %1392 }
 0x44c   : > { %4950 = vmatmul.mubr.msk.bf16.vlgmr.msra.gmra.mrb[8].mxu1 %vm1509_vm0, %v1393_v59  ;;  %v1407_v32 = vpop.permute.xlu0 %1406 }
 0x44d   : > { %4953 = vmatprep.mubr.msk.bf16.mxu1 %vm1509_vm0, %v1395_v24  ;;  %4974 = vmatpush3.bf16.xpose.msra.mxu1 %v1790_v60 }
 0x44f   : > { %v1441_v61 = vpop.permute.xlu1 %1440 }
 0x450   : > { %5090 = vmatprep.subr.msk.bf16.mxu1 %vm1509_vm0, %v1441_v61  ;;  %v1403_v25 = vpop.permute.xlu0 %1402  ;;  %v1793_v0 = vsel %vm1509_vm0, %v1441_v61, 0 }
 0x453   : > { %v1443_v62 = vpop.permute.xlu1 %1442 }
 0x454   : > { %4954 = vmatmul.mubr.msk.bf16.gmra.mrb[12].mxu1 %vm1509_vm0, %v1397_v55  ;;  %v1411_v63 = vpop.permute.xlu0 %1410  ;;  %v1796_v6 = vsel %vm1509_vm0, %v1443_v62, 0 }
 0x455   : > { %4976 = vmatpush3.bf16.xpose.msra.mxu1 %v1793_v0  ;;  %4981 = vmatprep.mubr.msk.bf16.mxu1 %vm1509_vm0, %v1407_v32 }
 0x456   : > { %5091 = vmatprep.subr.msk.bf16.mxu1 %vm1509_vm0, %v1443_v62 }
 0x457   : > { %v1437_v1 = vpop.permute.xlu1 %1436 }
 0x458   : > { %5088 = vmatprep.subr.msk.bf16.mxu0 %vm1509_vm0, %v1437_v1  ;;  %v6874_v33 = vpop.permute.xlu0 %1454  ;;  %v1710_v2 = vsel %vm1509_vm0, %v1437_v1, 0 }
 0x459   : > { %4964 = vmatpush3.bf16.xpose.msra.mxu0 %v1710_v2 }
 0x45b   : > { %v1445_v3 = vpop.permute.xlu1 %1444 }
 0x45c   : > { %v1467_v5 = vpop.permute.xlu0 %1466  ;;  %v1799_v15 = vsel %vm1509_vm0, %v1445_v3, 0 }
 0x45d   : > { %4978 = vmatpush3.bf16.xpose.msra.mxu1 %v1796_v6  ;;  %5021 = vmatprep.subr.bf16.mxu0 %v1467_v5 }
 0x45e   : > { %5092 = vmatprep.subr.msk.bf16.mxu1 %vm1509_vm0, %v1445_v3 }
 0x45f   : > { %v1401_v41 = vpop.permute.xlu1 %1400 }
 0x460   : > { %4966 = vmatmul.mubr.msk.bf16.vlgmr.msra.gmra.mrb[24].mxu0 %vm1509_vm0, %v1401_v41  ;;  %v1469_v8 = vpop.permute.xlu0 %1468 }
 0x461   : > { %4969 = vmatprep.mubr.msk.bf16.mxu0 %vm1509_vm0, %v1403_v25  ;;  %5022 = vmatpush3.bf16.msra.mxu0 %v1467_v5 }
 0x462   : > { %5023 = vmatprep.subr.bf16.mxu0 %v1469_v8 }
 0x463   : > { %v1409_v9 = vpop.permute.xlu1 %1408 }
 0x464   : > { %v1471_v11 = vpop.permute.xlu0 %1470 }
 0x465   : > { %4980 = vmatpush3.bf16.xpose.msra.mxu1 %v1799_v15  ;;  %5024 = vmatpush3.bf16.msra.mxu0 %v1469_v8 }
 0x466   : > { %4989 = vmatprep.subr.bf16.mxu1 %v6772_v50  ;;  %5025 = vmatprep.subr.bf16.mxu0 %v1471_v11 }
 0x467   : > { %v1405_v17 = vpop.permute.xlu1 %1404 }
 0x468   : > { %4970 = vmatmul.mubr.msk.bf16.gmra.mrb[28].mxu0 %vm1509_vm0, %v1405_v17 }
 0x469   : > { %5026 = vmatpush3.bf16.msra.mxu0 %v1471_v11 }
 0x46b   : > { %v1413_v18 = vpop.permute.xlu1 %1412 }
 0x46c   : > { %4982 = vmatmul.mubr.msk.bf16.vlgmr.msra.gmra.mrb[16].mxu1 %vm1509_vm0, %v1409_v9 }
 0x46d   : > { %4985 = vmatprep.mubr.msk.bf16.mxu1 %vm1509_vm0, %v1411_v63  ;;  %4990 = vmatpush3.bf16.msra.mxu1 %v6772_v50  ;;  %v6899_v50 = vand.u32 127, %v1093_v48 }
 0x46e   : > { %4991 = vmatprep.subr.bf16.mxu1 %v6767_v45 }
 0x46f   : > { %vm1503_vm1 = vcmp.le.s32.totalorder %v6899_v50, %v6896_v19  ;;  %vm1501_vm3 = vcmp.le.s32.totalorder %v6899_v50, %v6742_v10  ;;  %vm1504_vm5 = vcmp.le.s32.totalorder %v6899_v50, %v6909_v21  ;;  %vm1507_vm6 = vcmp.le.s32.totalorder %v6899_v50, %v6933_v30  ;;  %v7005_v1 = vpop.permute.xlu1 %1456 }
 0x470   : > { %vm1508_vm7 = vcmp.le.s32.totalorder %v6899_v50, %v6936_v31  ;;  %vm1506_vm8 = vcmp.le.s32.totalorder %v6899_v50, %v6943_v37  ;;  %vm1505_vm9 = vcmp.le.s32.totalorder %v6899_v50, %v6953_v35 }
 0x471   : > { %4992 = vmatpush3.bf16.msra.mxu1 %v6767_v45  ;;  %v6902_v45 = vadd.s32 8, %v6742_v10 }
 0x472   : > { %4993 = vmatprep.subr.bf16.mxu1 %v6787_v4 }
 0x473   : > { %vm1502_vm4 = vcmp.le.s32.totalorder %v6899_v50, %v6902_v45  ;;  %v7024_v15 = vpop.permute.xlu1 %1458 }
 0x474   : > { %4986 = vmatmul.mubr.msk.bf16.gmra.mrb[20].mxu1 %vm1509_vm0, %v1413_v18 }
 0x475   : > { %4994 = vmatpush3.bf16.msra.mxu1 %v6787_v4 }
 0x476   : > { %4995 = vmatprep.subr.bf16.mxu1 %v6783_v40 }
 0x479   : > { %4996 = vmatpush3.bf16.msra.mxu1 %v6783_v40 }
 0x47a   : > { %5005 = vmatprep.subr.bf16.mxu1 %v6874_v33 }
 0x4ad   : > { %v4935_v20 = vpop.f32.mrb[16].mxu0 }
 0x4ae   : > { %v6914_v22 = vsel %vm1503_vm1, %v4935_v20, -1e+30  ;;  %v1568_v48 = vpop.f32.mrb[17].mxu0 }
 0x4af   : > { %v4936_v23 = vpop.f32.mrb[18].mxu0  ;;  %v1921_v26 = vsel %vm1914_vm2, %v6914_v22, -inf  ;;  %v6923_v27 = vsel %vm1501_vm3, %v1568_v48, -1e+30 }
 0x4b0   : > { %v1571_v28 = vpop.f32.mrb[19].mxu0  ;;  %1922 = vmax.xlane.f32.xlu0 %v1921_v26  ;;  %v1915_v36 = vsel %vm1914_vm2, %v6923_v27, -inf  ;;  %v6948_v13 = vsel %vm1504_vm5, %v4936_v23, -1e+30 }
 0x4b1   : > { %v6930_v29 = vsel %vm1502_vm4, %v1571_v28, -1e+30  ;;  %v1924_v42 = vsel %vm1914_vm2, %v6948_v13, -inf }
 0x4b2   : > { %v1918_v34 = vsel %vm1914_vm2, %v6930_v29, -inf }
 0x4b3   : > { %1919 = vmax.xlane.f32.xlu1 %v1918_v34 }
 0x4b4   : > { %1916 = vmax.xlane.f32.xlu0 %v1915_v36  ;;  %v7047_v36 = vpop.permute.xlu1 %1460 }
 0x4b5   : > { %v4939_v16 = vpop.f32.mrb[20].mxu0 }
 0x4b6   : > { %v1584_v38 = vpop.f32.mrb[21].mxu0  ;;  %v6964_v43 = vsel %vm1507_vm6, %v4939_v16, -1e+30 }
 0x4b7   : > { %v4940_v39 = vpop.f32.mrb[22].mxu0  ;;  %v1933_v52 = vsel %vm1914_vm2, %v6964_v43, -inf  ;;  %v6985_v24 = vsel %vm1505_vm9, %v1584_v38, -1e+30 }
 0x4b8   : > { %v6969_v44 = vsel %vm1508_vm7, %v4940_v39, -1e+30  ;;  %1925 = vmax.xlane.f32.xlu0 %v1924_v42  ;;  %v1587_v46 = vpop.f32.mrb[23].mxu0  ;;  %v1927_v54 = vsel %vm1914_vm2, %v6985_v24, -inf }
 0x4b9   : > { %v1936_v47 = vsel %vm1914_vm2, %v6969_v44, -inf  ;;  %v6978_v51 = vsel %vm1506_vm8, %v1587_v46, -1e+30 }
 0x4ba   : > { %1937 = vmax.xlane.f32.xlu1 %v1936_v47  ;;  %v1930_v53 = vsel %vm1914_vm2, %v6978_v51, -inf }
 0x4bc   : > { %1934 = vmax.xlane.f32.xlu0 %v1933_v52 }
 0x4be   : > { %1931 = vmax.xlane.f32.xlu1 %v1930_v53 }
 0x4c0   : > { %1928 = vmax.xlane.f32.xlu0 %v1927_v54 }
 0x51f   : > { %v4951_v55 = vpop.f32.mrb[8].mxu1 }
 0x520   : > { %v6994_v56 = vsel %vm1503_vm1, %v4951_v55, -1e+30  ;;  %v1657_v57 = vpop.f32.mrb[9].mxu1 }
 0x521   : > { %v4952_v58 = vpop.f32.mrb[10].mxu1  ;;  %v1945_v59 = vsel %vm1914_vm2, %v6994_v56, -inf  ;;  %v7017_v8 = vsel %vm1501_vm3, %v1657_v57, -1e+30 }
 0x522   : > { %v7001_v32 = vsel %vm1504_vm5, %v4952_v58, -1e+30  ;;  %1946 = vmax.xlane.f32.xlu0 %v1945_v59  ;;  %v1660_v60 = vpop.f32.mrb[11].mxu1  ;;  %v1939_v20 = vsel %vm1914_vm2, %v7017_v8, -inf }
 0x523   : > { %v1948_v61 = vsel %vm1914_vm2, %v7001_v32, -inf  ;;  %v7031_v18 = vsel %vm1502_vm4, %v1660_v60, -1e+30  ;;  %v7072_v60 = vpop.permute.xlu1 %1478 }
 0x524   : > { %1949 = vmax.xlane.f32.xlu1 %v1948_v61  ;;  %v1942_v26 = vsel %vm1914_vm2, %v7031_v18, -inf }
 0x527   : > { %v4955_v25 = vpop.f32.mrb[12].mxu1 }
 0x528   : > { %v1673_v62 = vpop.f32.mrb[13].mxu1  ;;  %v7054_v39 = vsel %vm1507_vm6, %v4955_v25, -1e+30 }
 0x529   : > { %v4956_v63 = vpop.f32.mrb[14].mxu1  ;;  %v1957_v57 = vsel %vm1914_vm2, %v7054_v39, -inf }
 0x52a   : > { %v1676_v0 = vpop.f32.mrb[15].mxu1  ;;  %v7063_v53 = vsel %vm1508_vm7, %v4956_v63, -1e+30 }
 0x52b   : > { %v1960_v61 = vsel %vm1914_vm2, %v7063_v53, -inf }
 0x533   : > { %v4967_v2 = vpop.f32.mrb[24].mxu0 }
 0x534   : > { %v7010_v3 = vsel %vm1503_vm1, %v4967_v2, -1e+30  ;;  %v1746_v5 = vpop.f32.mrb[25].mxu0 }
 0x535   : > { %v4968_v6 = vpop.f32.mrb[26].mxu0  ;;  %v1969_v41 = vsel %vm1914_vm2, %v7010_v3, -inf  ;;  %v7038_v48 = vsel %vm1501_vm3, %v1746_v5, -1e+30  ;;  %v7088_v5 = vsel %vm1505_vm9, %v1673_v62, -1e+30 }
 0x536   : > { %v7022_v9 = vsel %vm1504_vm5, %v4968_v6, -1e+30  ;;  %1970 = vmax.xlane.f32.xlu0 %v1969_v41  ;;  %v1749_v11 = vpop.f32.mrb[27].mxu0  ;;  %v1963_v38 = vsel %vm1914_vm2, %v7038_v48, -inf }
 0x537   : > { %v1972_v17 = vsel %vm1914_vm2, %v7022_v9, -inf  ;;  %v7045_v28 = vsel %vm1502_vm4, %v1749_v11, -1e+30  ;;  %v7095_v11 = vsel %vm1506_vm8, %v1676_v0, -1e+30 }
 0x538   : > { %1973 = vmax.xlane.f32.xlu1 %v1972_v17  ;;  %v1966_v52 = vsel %vm1914_vm2, %v7045_v28, -inf  ;;  %v1954_v0 = vsel %vm1914_vm2, %v7095_v11, -inf }
 0x53a   : > { %1940 = vmax.xlane.f32.xlu0 %v1939_v20  ;;  %v7097_v20 = vpop.permute.xlu1 %1480 }
 0x53b   : > { %v4971_v23 = vpop.f32.mrb[28].mxu0 }
 0x53c   : > { %1943 = vmax.xlane.f32.xlu1 %v1942_v26  ;;  %v1762_v34 = vpop.f32.mrb[29].mxu0  ;;  %v7070_v58 = vsel %vm1507_vm6, %v4971_v23, -1e+30  ;;  %v1951_v26 = vsel %vm1914_vm2, %v7088_v5, -inf }
 0x53d   : > { %v4972_v16 = vpop.f32.mrb[30].mxu0  ;;  %v7056_v46 = vpop.xlane.xlu0 %1922  ;;  %v1981_v2 = vsel %vm1914_vm2, %v7070_v58, -inf  ;;  %v7104_v62 = vsel %vm1505_vm9, %v1762_v34, -1e+30 }
 0x53e   : > { %1964 = vmax.xlane.f32.xlu0 %v1963_v38  ;;  %v1765_v42 = vpop.f32.mrb[31].mxu0  ;;  %v7079_v25 = vsel %vm1508_vm7, %v4972_v16, -1e+30 }
 0x53f   : > { %v4983_v47 = vpop.f32.mrb[16].mxu1  ;;  %v1984_v41 = vsel %vm1914_vm2, %v7079_v25, -inf }
 0x540   : > { %1967 = vmax.xlane.f32.xlu1 %v1966_v52  ;;  %v1835_v54 = vpop.f32.mrb[17].mxu1  ;;  %v7111_v52 = vsel %vm1506_vm8, %v1765_v42, -1e+30  ;;  %v7118_v34 = vsel %vm1503_vm1, %v4983_v47, -1e+30 }
 0x541   : > { %v4984_v55 = vpop.f32.mrb[18].mxu1  ;;  %v7081_v63 = vpop.xlane.xlu0 %1916 }
 0x542   : > { %1958 = vmax.xlane.f32.xlu0 %v1957_v57  ;;  %v1838_v59 = vpop.f32.mrb[19].mxu1  ;;  %v1920_v57 = vpop.xlane.xlu1 %1919  ;;  %v7126_v42 = vsel %vm1504_vm5, %v4984_v55, -1e+30 }
 0x543   : > { %v2012_v19 = vsub.f32 %v6930_v29, %v1920_v57  ;;  %v7141_v21 = vsel %vm1502_vm4, %v1838_v59, -1e+30 }
 0x544   : > { %1961 = vmax.xlane.f32.xlu1 %v1960_v61  ;;  %v1975_v61 = vsel %vm1914_vm2, %v7104_v62, -inf  ;;  %v1990_v45 = vsel %vm1914_vm2, %v7141_v21, -inf }
 0x545   : > { %v1926_v38 = vpop.xlane.xlu0 %1925  ;;  %v2045_v29 = vmul.f32 1.442695, %v2012_v19 }
 0x546   : > { %1982 = vmax.xlane.f32.xlu0 %v1981_v2  ;;  %v2014_v2 = vsub.f32 %v6948_v13, %v1926_v38  ;;  %v7134_v13 = vsel %vm1501_vm3, %v1835_v54, -1e+30  ;;  %v1996_v38 = vsel %vm1914_vm2, %v7126_v42, -inf }
 0x547   : > { %v4987_v6 = vpop.f32.mrb[20].mxu1  ;;  %v1987_v55 = vsel %vm1914_vm2, %v7134_v13, -inf }
 0x548   : > { %1985 = vmax.xlane.f32.xlu1 %v1984_v41  ;;  %v1851_v17 = vpop.f32.mrb[21].mxu1  ;;  %v1978_v41 = vsel %vm1914_vm2, %v7111_v52, -inf  ;;  %v2049_v47 = vmul.f32 1.442695, %v2014_v2  ;;  %v7149_v54 = vsel %vm1507_vm6, %v4987_v6, -1e+30 }
 0x549   : > { %v4988_v23 = vpop.f32.mrb[22].mxu1  ;;  %v2005_v2 = vsel %vm1914_vm2, %v7149_v54, -inf  ;;  %v7163_v30 = vsel %vm1505_vm9, %v1851_v17, -1e+30 }
 0x54a   : > { %1952 = vmax.xlane.f32.xlu0 %v1951_v26  ;;  %v1854_v16 = vpop.f32.mrb[23].mxu1  ;;  %v1938_v26 = vpop.xlane.xlu1 %1937  ;;  %5430 = vpow2.f32 %v2049_v47  ;;  %v7156_v59 = vsel %vm1508_vm7, %v4988_v23, -1e+30  ;;  %v1999_v23 = vsel %vm1914_vm2, %v7163_v30, -inf }
 0x54b   : > { %v2018_v57 = vsub.f32 %v6969_v44, %v1938_v26  ;;  %5432 = vpow2.f32 %v2045_v29  ;;  %v7171_v31 = vsel %vm1506_vm8, %v1854_v16, -1e+30 }
 0x54c   : > { %1955 = vmax.xlane.f32.xlu1 %v1954_v0  ;;  %v1993_v0 = vsel %vm1914_vm2, %v7118_v34, -inf  ;;  %v2002_v35 = vsel %vm1914_vm2, %v7171_v31, -inf }
 0x54d   : > { %v2057_v44 = vmul.f32 1.442695, %v2018_v57  ;;  %v2011_v57 = vsub.f32 %v6923_v27, %v7081_v63 }
 0x54e   : > { %1976 = vmax.xlane.f32.xlu0 %v1975_v61  ;;  %v1932_v61 = vpop.xlane.xlu1 %1931 }
 0x54f   : > { %v2016_v6 = vsub.f32 %v6978_v51, %v1932_v61  ;;  %5434 = vpow2.f32 %v2057_v44  ;;  %v2043_v61 = vmul.f32 1.442695, %v2011_v57 }
 0x550   : > { %1979 = vmax.xlane.f32.xlu1 %v1978_v41  ;;  %v2008_v41 = vsel %vm1914_vm2, %v7156_v59, -inf }
 0x551   : > { %v2053_v26 = vmul.f32 1.442695, %v2016_v6 }
 0x552   : > { %1994 = vmax.xlane.f32.xlu0 %v1993_v0 }
 0x553   : > { %5436 = vpow2.f32 %v2053_v26 }
 0x554   : > { %1997 = vmax.xlane.f32.xlu1 %v1996_v38  ;;  %v7177_v51 = vpop.eup %5430  ;;  %v2013_v38 = vsub.f32 %v6914_v22, %v7056_v46 }
 0x555   : > { %v2116_v17 = vsel %vm1914_vm2, %v7177_v51, 0.0  ;;  %v7181_v50 = vpop.eup %5432 }
 0x556   : > { %1988 = vmax.xlane.f32.xlu0 %v1987_v55  ;;  %v2110_v37 = vsel %vm1914_vm2, %v7181_v50, 0.0  ;;  %v1935_v55 = vpop.xlane.xlu0 %1934  ;;  %v2047_v29 = vmul.f32 1.442695, %v2013_v38 }
 0x558   : > { %1991 = vmax.xlane.f32.xlu1 %v1990_v45  ;;  %5438 = vpow2.f32 %v2047_v29  ;;  %v2017_v45 = vsub.f32 %v6964_v43, %v1935_v55 }
 0x559   : > { %v7185_v16 = vpop.eup %5434  ;;  %5440 = vpow2.f32 %v2043_v61 }
 0x55a   : > { %2006 = vmax.xlane.f32.xlu0 %v2005_v2  ;;  %v2128_v0 = vsel %vm1914_vm2, %v7185_v16, 0.0  ;;  %v1929_v2 = vpop.xlane.xlu0 %1928  ;;  %v2055_v44 = vmul.f32 1.442695, %v2017_v45 }
 0x55b   : > { %v2015_v6 = vsub.f32 %v6985_v24, %v1929_v2 }
 0x55c   : > { %2009 = vmax.xlane.f32.xlu1 %v2008_v41  ;;  %5442 = vpow2.f32 %v2055_v44 }
 0x55d   : > { %v7189_v19 = vpop.eup %5436  ;;  %v2051_v41 = vmul.f32 1.442695, %v2015_v6 }
 0x55e   : > { %2000 = vmax.xlane.f32.xlu0 %v1999_v23  ;;  %v2122_v47 = vsel %vm1914_vm2, %v7189_v19, 0.0 }
 0x55f   : > { %5444 = vpow2.f32 %v2051_v41 }
 0x560   : > { %2003 = vmax.xlane.f32.xlu1 %v2002_v35 }
 0x564   : > { %2117 = vadd.xlane.f32.xlu1 %v2116_v17 }
 0x568   : > { %2111 = vadd.xlane.f32.xlu1 %v2110_v37 }
 0x56c   : > { %2129 = vadd.xlane.f32.xlu1 %v2128_v0 }
 0x570   : > { %2123 = vadd.xlane.f32.xlu1 %v2122_v47 }
 0x574   : > { %1482 = vrot.lane.b32.xlu0 %v6787_v4, %s6100_s15  ;;  %v7201_v4 = vpop.eup %5438 }
 0x575   : > { %v2113_v22 = vsel %vm1914_vm2, %v7201_v4, 0.0  ;;  %v7205_v46 = vpop.eup %5440 }
 0x576   : > { %v2107_v27 = vsel %vm1914_vm2, %v7205_v46, 0.0  ;;  %v7209_v43 = vpop.eup %5442 }
 0x577   : > { %v2125_v24 = vsel %vm1914_vm2, %v7209_v43, 0.0  ;;  %v7213_v63 = vpop.eup %5444 }
 0x578   : > { %v2119_v23 = vsel %vm1914_vm2, %v7213_v63, 0.0 }
 0x593   : > { %2114 = vadd.xlane.f32.xlu0 %v2113_v22 }
 0x597   : > { %2108 = vadd.xlane.f32.xlu0 %v2107_v27 }
 0x59b   : > { %2126 = vadd.xlane.f32.xlu0 %v2125_v24 }
 0x59f   : > { %2120 = vadd.xlane.f32.xlu0 %v2119_v23 }
 0x5af   : > { %v1947_v26 = vpop.xlane.xlu0 %1946 }
 0x5b0   : > { %v2021_v35 = vsub.f32 %v6994_v56, %v1947_v26 }
 0x5b1   : > { %v1950_v47 = vpop.xlane.xlu1 %1949 }
 0x5b2   : > { %v2063_v17 = vmul.f32 1.442695, %v2021_v35  ;;  %v2022_v56 = vsub.f32 %v7001_v32, %v1950_v47 }
 0x5b4   : > { %5446 = vpow2.f32 %v2063_v17  ;;  %v2065_v27 = vmul.f32 1.442695, %v2022_v56 }
 0x5be   : > { %v7218_v37 = vpop.eup %5446 }
 0x5bf   : > { %v2137_v0 = vsel %vm1914_vm2, %v7218_v37, 0.0 }
 0x5c0   : > { %2138 = vadd.xlane.f32.xlu0 %v2137_v0 }
 0x5c3   : > { %v1971_v38 = vpop.xlane.xlu0 %1970 }
 0x5c4   : > { %v2029_v55 = vsub.f32 %v7010_v3, %v1971_v38 }
 0x5c5   : > { %v1974_v29 = vpop.xlane.xlu1 %1973 }
 0x5c6   : > { %v2079_v57 = vmul.f32 1.442695, %v2029_v55  ;;  %v2030_v24 = vsub.f32 %v7022_v9, %v1974_v29 }
 0x5c7   : > { %v1941_v61 = vpop.xlane.xlu0 %1940 }
 0x5c8   : > { %5448 = vpow2.f32 %v2079_v57  ;;  %v2019_v45 = vsub.f32 %v7017_v8, %v1941_v61  ;;  %v2081_v8 = vmul.f32 1.442695, %v2030_v24 }
 0x5c9   : > { %v1944_v2 = vpop.xlane.xlu1 %1943 }
 0x5ca   : > { %v2059_v44 = vmul.f32 1.442695, %v2019_v45  ;;  %v2020_v32 = vsub.f32 %v7031_v18, %v1944_v2 }
 0x5cb   : > { %v1965_v6 = vpop.xlane.xlu0 %1964 }
 0x5cc   : > { %5450 = vpow2.f32 %v2059_v44  ;;  %v2027_v41 = vsub.f32 %v7038_v48, %v1965_v6  ;;  %v2061_v55 = vmul.f32 1.442695, %v2020_v32 }
 0x5cd   : > { %v1968_v22 = vpop.xlane.xlu1 %1967 }
 0x5ce   : > { %v2075_v23 = vmul.f32 1.442695, %v2027_v41 }
 0x5cf   : > { %v1959_v3 = vpop.xlane.xlu0 %1958 }
 0x5d0   : > { %5452 = vpow2.f32 %v2075_v23  ;;  %v2025_v26 = vsub.f32 %v7054_v39, %v1959_v3  ;;  %v2028_v39 = vsub.f32 %v7045_v28, %v1968_v22 }
 0x5d1   : > { %v1962_v35 = vpop.xlane.xlu1 %1961  ;;  %5454 = vpow2.f32 %v2065_v27 }
 0x5d2   : > { %v7228_v17 = vpop.eup %5448  ;;  %v2071_v0 = vmul.f32 1.442695, %v2025_v26  ;;  %v2077_v56 = vmul.f32 1.442695, %v2028_v39 }
 0x5d3   : > { %v1983_v47 = vpop.xlane.xlu0 %1982  ;;  %v2161_v48 = vsel %vm1914_vm2, %v7228_v17, 0.0 }
 0x5d4   : > { %5456 = vpow2.f32 %v2071_v0  ;;  %2162 = vadd.xlane.f32.xlu1 %v2161_v48  ;;  %v2033_v61 = vsub.f32 %v7070_v58, %v1983_v47  ;;  %v2026_v47 = vsub.f32 %v7063_v53, %v1962_v35 }
 0x5d5   : > { %v1986_v9 = vpop.xlane.xlu1 %1985  ;;  %5458 = vpow2.f32 %v2081_v8 }
 0x5d6   : > { %v7233_v38 = vpop.eup %5450  ;;  %5460 = vpow2.f32 %v2061_v55  ;;  %v2087_v22 = vmul.f32 1.442695, %v2033_v61 }
 0x5d7   : > { %v1953_v29 = vpop.xlane.xlu0 %1952  ;;  %v2131_v57 = vsel %vm1914_vm2, %v7233_v38, 0.0 }
 0x5d8   : > { %v2023_v18 = vsub.f32 %v7088_v5, %v1953_v29  ;;  %2132 = vadd.xlane.f32.xlu0 %v2131_v57  ;;  %v2073_v29 = vmul.f32 1.442695, %v2026_v47 }
 0x5d9   : > { %v1956_v45 = vpop.xlane.xlu1 %1955 }
 0x5da   : > { %v7240_v2 = vpop.eup %5452  ;;  %v2067_v44 = vmul.f32 1.442695, %v2023_v18  ;;  %v2024_v61 = vsub.f32 %v7095_v11, %v1956_v45 }
 0x5db   : > { %v1977_v6 = vpop.xlane.xlu0 %1976  ;;  %v2155_v41 = vsel %vm1914_vm2, %v7240_v2, 0.0  ;;  %v7244_v28 = vpop.eup %5454 }
 0x5dc   : > { %5462 = vpow2.f32 %v2067_v44  ;;  %2156 = vadd.xlane.f32.xlu1 %v2155_v41  ;;  %v2031_v58 = vsub.f32 %v7104_v62, %v1977_v6  ;;  %v2140_v3 = vsel %vm1914_vm2, %v7244_v28, 0.0 }
 0x5dd   : > { %v1980_v27 = vpop.xlane.xlu1 %1979  ;;  %5464 = vpow2.f32 %v2077_v56 }
 0x5de   : > { %v7246_v5 = vpop.eup %5456  ;;  %v2032_v24 = vsub.f32 %v7111_v52, %v1980_v27  ;;  %5466 = vpow2.f32 %v2087_v22  ;;  %v2083_v62 = vmul.f32 1.442695, %v2031_v58  ;;  %v2069_v27 = vmul.f32 1.442695, %v2024_v61 }
 0x5df   : > { %v1995_v23 = vpop.xlane.xlu0 %1994  ;;  %v2149_v26 = vsel %vm1914_vm2, %v7246_v5, 0.0  ;;  %v7254_v8 = vpop.eup %5458 }
 0x5e0   : > { %v2085_v32 = vmul.f32 1.442695, %v2032_v24  ;;  %v2037_v0 = vsub.f32 %v7118_v34, %v1995_v23  ;;  %2141 = vadd.xlane.f32.xlu1 %v2140_v3  ;;  %2150 = vadd.xlane.f32.xlu0 %v2149_v26  ;;  %v2164_v48 = vsel %vm1914_vm2, %v7254_v8, 0.0  ;;  %v7260_v55 = vpop.eup %5460  ;;  %v2034_v34 = vsub.f32 %v7079_v25, %v1986_v9 }
 0x5e1   : > { %v2134_v57 = vsel %vm1914_vm2, %v7260_v55, 0.0  ;;  %v1998_v6 = vpop.xlane.xlu1 %1997 }
 0x5e2   : > { %5468 = vpow2.f32 %v2085_v32  ;;  %v2095_v52 = vmul.f32 1.442695, %v2037_v0  ;;  %v2089_v18 = vmul.f32 1.442695, %v2034_v34  ;;  %v2038_v23 = vsub.f32 %v7126_v42, %v1998_v6 }
 0x5e3   : > { %v1989_v44 = vpop.xlane.xlu0 %1988 }
 0x5e4   : > { %5470 = vpow2.f32 %v2095_v52  ;;  %2165 = vadd.xlane.f32.xlu1 %v2164_v48  ;;  %v2035_v58 = vsub.f32 %v7134_v13, %v1989_v44  ;;  %v2097_v47 = vmul.f32 1.442695, %v2038_v23 }
 0x5e5   : > { %5472 = vpow2.f32 %v2083_v62  ;;  %v1992_v26 = vpop.xlane.xlu1 %1991 }
 0x5e6   : > { %v7262_v39 = vpop.eup %5462  ;;  %5474 = vpow2.f32 %v2073_v29  ;;  %v2091_v3 = vmul.f32 1.442695, %v2035_v58  ;;  %v2036_v62 = vsub.f32 %v7141_v21, %v1992_v26 }
 0x5e7   : > { %v2143_v53 = vsel %vm1914_vm2, %v7262_v39, 0.0  ;;  %v7269_v35 = vpop.eup %5464  ;;  %5476 = vpow2.f32 %v2089_v18  ;;  %v2007_v0 = vpop.xlane.xlu0 %2006 }
 0x5e8   : > { %2135 = vadd.xlane.f32.xlu1 %v2134_v57  ;;  %2144 = vadd.xlane.f32.xlu0 %v2143_v53  ;;  %v7272_v56 = vpop.eup %5466  ;;  %v2158_v25 = vsel %vm1914_vm2, %v7269_v35, 0.0  ;;  %5478 = vpow2.f32 %v2069_v27  ;;  %v2093_v42 = vmul.f32 1.442695, %v2036_v62  ;;  %v2041_v29 = vsub.f32 %v7149_v54, %v2007_v0 }
 0x5e9   : > { %v2173_v11 = vsel %vm1914_vm2, %v7272_v56, 0.0  ;;  %5480 = vpow2.f32 %v2091_v3  ;;  %v2010_v18 = vpop.xlane.xlu1 %2009 }
 0x5ea   : > { %5482 = vpow2.f32 %v2097_v47  ;;  %v2103_v21 = vmul.f32 1.442695, %v2041_v29  ;;  %v2042_v54 = vsub.f32 %v7156_v59, %v2010_v18 }
 0x5eb   : > { %v2001_v34 = vpop.xlane.xlu0 %2000  ;;  %5484 = vpow2.f32 %v2093_v42 }
 0x5ec   : > { %v7276_v9 = vpop.eup %5468  ;;  %2159 = vadd.xlane.f32.xlu1 %v2158_v25  ;;  %v2039_v61 = vsub.f32 %v7163_v30, %v2001_v34  ;;  %5486 = vpow2.f32 %v2103_v21 }
 0x5ed   : > { %v2170_v41 = vsel %vm1914_vm2, %v7276_v9, 0.0 }
 0x5ee   : > { %v7280_v22 = vpop.eup %5470  ;;  %2171 = vadd.xlane.f32.xlu0 %v2170_v41  ;;  %v2099_v6 = vmul.f32 1.442695, %v2039_v61  ;;  %v2004_v41 = vpop.xlane.xlu1 %2003 }
 0x5ef   : > { %v7285_v45 = vpop.eup %5472  ;;  %v2185_v24 = vsel %vm1914_vm2, %v7280_v22, 0.0  ;;  %v2040_v30 = vsub.f32 %v7171_v31, %v2004_v41  ;;  %v7339_v34 = vpop.permute.xlu0 %1482 }
 0x5f0   : > { %2174 = vadd.xlane.f32.xlu1 %v2173_v11  ;;  %v2167_v32 = vsel %vm1914_vm2, %v7285_v45, 0.0  ;;  %v7292_v13 = vpop.eup %5474  ;;  %v2105_v11 = vmul.f32 1.442695, %v2042_v54  ;;  %5488 = vpow2.f32 %v2099_v6 }
 0x5f1   : > { %v2152_v52 = vsel %vm1914_vm2, %v7292_v13, 0.0  ;;  %v7297_v48 = vpop.eup %5476  ;;  %v2101_v59 = vmul.f32 1.442695, %v2040_v30 }
 0x5f2   : > { %2186 = vadd.xlane.f32.xlu0 %v2185_v24  ;;  %v2176_v57 = vsel %vm1914_vm2, %v7297_v48, 0.0  ;;  %v7302_v53 = vpop.eup %5478  ;;  %5490 = vpow2.f32 %v2105_v11  ;;  %v2118_v62 = vpop.xlane.xlu1 %2117 }
 0x5f3   : > { %v2146_v44 = vsel %vm1914_vm2, %v7302_v53, 0.0  ;;  %v7307_v25 = vpop.eup %5480  ;;  %5492 = vpow2.f32 %v2101_v59 }
 0x5f4   : > { %2168 = vadd.xlane.f32.xlu1 %v2167_v32  ;;  %v2179_v27 = vsel %vm1914_vm2, %v7307_v25, 0.0  ;;  %v7312_v58 = vpop.eup %5482 }
 0x5f5   : > { %v2188_v24 = vsel %vm1914_vm2, %v7312_v58, 0.0  ;;  %v7317_v23 = vpop.eup %5484 }
 0x5f6   : > { %v2182_v3 = vsel %vm1914_vm2, %v7317_v23, 0.0  ;;  %v7323_v26 = vpop.eup %5486 }
 0x5f7   : > { %v2197_v31 = vsel %vm1914_vm2, %v7323_v26, 0.0 }
 0x5f8   : > { %2153 = vadd.xlane.f32.xlu1 %v2152_v52 }
 0x5fa   : > { %v7327_v32 = vpop.eup %5488 }
 0x5fb   : > { %v2191_v0 = vsel %vm1914_vm2, %v7327_v32, 0.0 }
 0x5fc   : > { %2177 = vadd.xlane.f32.xlu1 %v2176_v57  ;;  %v7331_v47 = vpop.eup %5490  ;;  %v2112_v57 = vpop.xlane.xlu1 %2111 }
 0x5fd   : > { %v2200_v52 = vsel %vm1914_vm2, %v7331_v47, 0.0  ;;  %v7335_v42 = vpop.eup %5492 }
 0x5fe   : > { %v2194_v29 = vsel %vm1914_vm2, %v7335_v42, 0.0 }
 0x600   : > { %2147 = vadd.xlane.f32.xlu1 %v2146_v44  ;;  %v2130_v21 = vpop.xlane.xlu1 %2129 }
 0x604   : > { %2180 = vadd.xlane.f32.xlu1 %v2179_v27  ;;  %v2124_v44 = vpop.xlane.xlu1 %2123 }
 0x608   : > { %1484 = vrot.lane.b32.xlu0 %v6783_v40, %s6100_s15  ;;  %2189 = vadd.xlane.f32.xlu1 %v2188_v24 }
 0x60c   : > { %2183 = vadd.xlane.f32.xlu1 %v2182_v3 }
 0x610   : > { %2198 = vadd.xlane.f32.xlu1 %v2197_v31 }
 0x614   : > { %2192 = vadd.xlane.f32.xlu1 %v2191_v0 }
 0x618   : > { %2201 = vadd.xlane.f32.xlu1 %v2200_v52 }
 0x61c   : > { %2195 = vadd.xlane.f32.xlu1 %v2194_v29 }
 0x620   : > { %v2115_v18 = vpop.xlane.xlu0 %2114 }
 0x621   : > { %5494 = vrcp.f32 %v2115_v18 }
 0x622   : > { %5496 = vrcp.f32 %v2112_v57 }
 0x623   : > { %5498 = vrcp.f32 %v2118_v62 }
 0x624   : > { %v2109_v61 = vpop.xlane.xlu0 %2108 }
 0x625   : > { %5500 = vrcp.f32 %v2109_v61 }
 0x628   : > { %v2127_v54 = vpop.xlane.xlu0 %2126 }
 0x629   : > { %5502 = vrcp.f32 %v2127_v54 }
 0x62a   : > { %5504 = vrcp.f32 %v2124_v44 }
 0x62b   : > { %v5495_v6 = vpop.eup %5494  ;;  %5506 = vrcp.f32 %v2130_v21 }
 0x62c   : > { %v2121_v41 = vpop.xlane.xlu0 %2120  ;;  %v5497_v27 = vpop.eup %5496  ;;  %v2237_v24 = vmul.f32 %v5495_v6, %v7201_v4 }
 0x62d   : > { %5508 = vrcp.f32 %v2121_v41  ;;  %1472 = vrot.lane.b32.xlu1 %v6783_v40, %s6099_s3  ;;  %v5499_v11 = vpop.eup %5498  ;;  %v2236_v3 = vmul.f32 %v5497_v27, %v7181_v50 }
 0x62e   : > { %v2238_v31 = vmul.f32 %v5499_v11, %v7177_v51 }
 0x62f   : > { %v5501_v30 = vpop.eup %5500 }
 0x630   : > { %v2235_v59 = vmul.f32 %v5501_v30, %v7205_v46  ;;  %v2268_v62 = vpack.c.bf16 %v2238_v31, %v2237_v24 }
 0x632   : > { %v2267_v0 = vpack.c.bf16 %v2236_v3, %v2235_v59 }
 0x633   : > { %v5503_v52 = vpop.eup %5502 }
 0x634   : > { %4997 = vmatprep.mubr.msk.bf16.mxu1 %vm1914_vm2, %v2267_v0  ;;  %v5505_v29 = vpop.eup %5504  ;;  %v2241_v4 = vmul.f32 %v5503_v52, %v7209_v43 }
 0x635   : > { %4998 = vmatmul.mubr.msk.bf16.vlgmr.msra.gmra.mrb[24].mxu1 %vm1914_vm2, %v2268_v62  ;;  %v5507_v57 = vpop.eup %5506  ;;  %v2240_v51 = vmul.f32 %v5505_v29, %v7189_v19 }
 0x636   : > { %5006 = vmatpush3.bf16.msra.mxu1 %v6874_v33  ;;  %v2242_v46 = vmul.f32 %v5507_v57, %v7185_v16 }
 0x637   : > { %v5509_v40 = vpop.eup %5508  ;;  %5007 = vmatprep.subr.bf16.mxu1 %v7005_v1 }
 0x638   : > { %v2239_v50 = vmul.f32 %v5509_v40, %v7213_v63  ;;  %v2270_v21 = vpack.c.bf16 %v2242_v46, %v2241_v4 }
 0x63a   : > { %5008 = vmatpush3.bf16.msra.mxu1 %v7005_v1  ;;  %v2269_v18 = vpack.c.bf16 %v2240_v51, %v2239_v50 }
 0x63b   : > { %5009 = vmatprep.subr.bf16.mxu1 %v7024_v15 }
 0x63c   : > { %5001 = vmatprep.mubr.msk.bf16.mxu1 %vm1914_vm2, %v2269_v18 }
 0x63d   : > { %5002 = vmatmul.mubr.msk.bf16.gmra.mrb[28].mxu1 %vm1914_vm2, %v2270_v21 }
 0x63e   : > { %5010 = vmatpush3.bf16.msra.mxu1 %v7024_v15 }
 0x63f   : > { %5011 = vmatprep.subr.bf16.mxu1 %v7047_v36 }
 0x642   : > { %5012 = vmatpush3.bf16.msra.mxu1 %v7047_v36 }
 0x643   : > { %5037 = vmatprep.subr.bf16.mxu1 %v7072_v60 }
 0x64d   : > { %v2139_v1 = vpop.xlane.xlu0 %2138 }
 0x661   : > { %v7363_v33 = vpop.xlane.xlu1 %2162 }
 0x665   : > { %v2133_v43 = vpop.xlane.xlu0 %2132 }
 0x669   : > { %v2157_v16 = vpop.xlane.xlu1 %2156 }
 0x66d   : > { %v2142_v19 = vpop.xlane.xlu1 %2141  ;;  %v2151_v44 = vpop.xlane.xlu0 %2150 }
 0x66e   : > { %5510 = vrcp.f32 %v2142_v19 }
 0x66f   : > { %5512 = vrcp.f32 %v2133_v43 }
 0x670   : > { %5514 = vrcp.f32 %v2139_v1 }
 0x671   : > { %v7365_v63 = vpop.xlane.xlu1 %2165 }
 0x675   : > { %v2136_v61 = vpop.xlane.xlu1 %2135  ;;  %v2145_v27 = vpop.xlane.xlu0 %2144 }
 0x676   : > { %5516 = vrcp.f32 %v2136_v61 }
 0x677   : > { %5518 = vrcp.f32 %v2157_v16 }
 0x678   : > { %v5511_v36 = vpop.eup %5510 }
 0x679   : > { %v2160_v15 = vpop.xlane.xlu1 %2159  ;;  %v5513_v6 = vpop.eup %5512  ;;  %v2246_v30 = vmul.f32 %v5511_v36, %v7244_v28 }
 0x67a   : > { %5520 = vrcp.f32 %v2160_v15  ;;  %v5515_v41 = vpop.eup %5514  ;;  %v2243_v59 = vmul.f32 %v5513_v6, %v7233_v38 }
 0x67b   : > { %v2245_v0 = vmul.f32 %v5515_v41, %v7218_v37  ;;  %v2172_v62 = vpop.xlane.xlu0 %2171 }
 0x67d   : > { %v7367_v54 = vpop.xlane.xlu1 %2174  ;;  %v2272_v57 = vpack.c.bf16 %v2246_v30, %v2245_v0 }
 0x67f   : > { %v2187_v28 = vpop.xlane.xlu0 %2186 }
 0x680   : > { %v5517_v11 = vpop.eup %5516 }
 0x681   : > { %v2169_v24 = vpop.xlane.xlu1 %2168  ;;  %v2244_v3 = vmul.f32 %v5517_v11, %v7260_v55  ;;  %v5519_v31 = vpop.eup %5518 }
 0x682   : > { %v2251_v4 = vmul.f32 %v5519_v31, %v7240_v2 }
 0x683   : > { %v2271_v52 = vpack.c.bf16 %v2244_v3, %v2243_v59  ;;  %v1485_v55 = vpop.permute.xlu0 %1484 }
 0x684   : > { %v5521_v29 = vpop.eup %5520 }
 0x685   : > { %v2154_v40 = vpop.xlane.xlu1 %2153  ;;  %5013 = vmatprep.mubr.msk.bf16.mxu1 %vm1914_vm2, %v2271_v52  ;;  %v2252_v50 = vmul.f32 %v5521_v29, %v7269_v35 }
 0x686   : > { %5014 = vmatmul.mubr.msk.bf16.vlgmr.msra.gmra.mrb[32].mxu1 %vm1914_vm2, %v2272_v57  ;;  %5522 = vrcp.f32 %v2154_v40 }
 0x687   : > { %5038 = vmatpush3.bf16.msra.mxu1 %v7072_v60  ;;  %v2275_v38 = vpack.c.bf16 %v2252_v50, %v2251_v4  ;;  %5524 = vrcp.f32 %v2145_v27 }
 0x688   : > { %5039 = vmatprep.subr.bf16.mxu1 %v7097_v20  ;;  %5526 = vrcp.f32 %v2151_v44 }
 0x689   : > { %5029 = vmatprep.mubr.msk.bf16.mxu0 %vm1914_vm2, %v2275_v38  ;;  %v2178_v37 = vpop.xlane.xlu1 %2177 }
 0x68b   : > { %5040 = vmatpush3.bf16.msra.mxu1 %v7097_v20 }
 0x68c   : > { %5041 = vmatprep.subr.bf16.mxu1 %v7339_v34 }
 0x68d   : > { %v2148_v2 = vpop.xlane.xlu1 %2147 }
 0x68e   : > { %5528 = vrcp.f32 %v2148_v2 }
 0x68f   : > { %5042 = vmatpush3.bf16.msra.mxu1 %v7339_v34 }
 0x690   : > { %5043 = vmatprep.subr.bf16.mxu1 %v1485_v55  ;;  %v5523_v35 = vpop.eup %5522 }
 0x691   : > { %v2181_v60 = vpop.xlane.xlu1 %2180  ;;  %v5525_v46 = vpop.eup %5524  ;;  %v2250_v20 = vmul.f32 %v5523_v35, %v7292_v13 }
 0x692   : > { %v5527_v18 = vpop.eup %5526  ;;  %v2247_v1 = vmul.f32 %v5525_v46, %v7262_v39  ;;  %v5327_v46 = vld [vmem:[%s6621_s22 + $0x8] sm:$0xff]  }
 0x693   : > { %5044 = vmatpush3.bf16.msra.mxu1 %v1485_v55  ;;  %v2249_v34 = vmul.f32 %v5527_v18, %v7246_v5  ;;  %v5328_v18 = vld [vmem:[%s6621_s22 + $0x10] sm:$0xff]  }
 0x695   : > { %v2190_v51 = vpop.xlane.xlu1 %2189  ;;  %v2274_v61 = vpack.c.bf16 %v2250_v20, %v2249_v34  ;;  %v5329_v34 = vld [vmem:[%s6621_s22 + $0x18] sm:$0xff]  }
 0x696   : > { %5530 = vrcp.f32 %v2190_v51  ;;  %v5326_v51 = vld [vmem:[%s6621_s22] sm:$0xff]  }
 0x697   : > { %5532 = vrcp.f32 %v2181_v60 }
 0x698   : > { %v5529_v21 = vpop.eup %5528  ;;  %5534 = vrcp.f32 %v2187_v28 }
 0x699   : > { %v2184_v16 = vpop.xlane.xlu1 %2183  ;;  %v2248_v19 = vmul.f32 %v5529_v21, %v7302_v53 }
 0x69a   : > { %5536 = vrcp.f32 %v2184_v16 }
 0x69b   : > { %v2273_v43 = vpack.c.bf16 %v2248_v19, %v2247_v1  ;;  %5538 = vrcp.f32 %v7365_v63 }
 0x69c   : > { %5540 = vrcp.f32 %v2169_v24 }
 0x69d   : > { %v2199_v15 = vpop.xlane.xlu1 %2198  ;;  %5017 = vmatprep.mubr.msk.bf16.mxu1 %vm1914_vm2, %v2273_v43  ;;  %5542 = vrcp.f32 %v7363_v33 }
 0x69e   : > { %5018 = vmatmul.mubr.msk.bf16.gmra.mrb[36].mxu1 %vm1914_vm2, %v2274_v61  ;;  %5544 = vrcp.f32 %v2172_v62  ;;  %v5330_v61 = vld [vmem:[%s6621_s22 + $0x20] sm:$0xff]  }
 0x69f   : > { %5546 = vrcp.f32 %v7367_v54 }
 0x6a0   : > { %v5531_v13 = vpop.eup %5530  ;;  %5548 = vrcp.f32 %v2178_v37 }
 0x6a1   : > { %v2193_v44 = vpop.xlane.xlu1 %2192  ;;  %v5533_v39 = vpop.eup %5532  ;;  %v2262_v5 = vmul.f32 %v5531_v13, %v7312_v58 }
 0x6a2   : > { %v5535_v53 = vpop.eup %5534  ;;  %v2259_v41 = vmul.f32 %v5533_v39, %v7307_v25 }
 0x6a3   : > { %v2261_v63 = vmul.f32 %v5535_v53, %v7280_v22 }
 0x6a4   : > { %v5537_v36 = vpop.eup %5536 }
 0x6a5   : > { %v2202_v6 = vpop.xlane.xlu1 %2201  ;;  %v2260_v27 = vmul.f32 %v5537_v36, %v7317_v23  ;;  %v2280_v33 = vpack.c.bf16 %v2262_v5, %v2261_v63  ;;  %v5539_v30 = vpop.eup %5538  ;;  %v5332_v63 = vld [vmem:[%s6621_s22 + $0x30] sm:$0xff]  }
 0x6a6   : > { %5550 = vrcp.f32 %v2202_v6  ;;  %v5541_v58 = vpop.eup %5540  ;;  %v2254_v23 = vmul.f32 %v5539_v30, %v7254_v8 }
 0x6a7   : > { %v2279_v11 = vpack.c.bf16 %v2260_v27, %v2259_v41  ;;  %5552 = vrcp.f32 %v2193_v44  ;;  %v5543_v54 = vpop.eup %5542  ;;  %v2255_v22 = vmul.f32 %v5541_v58, %v7285_v45 }
 0x6a8   : > { %5554 = vrcp.f32 %v2199_v15  ;;  %v5545_v25 = vpop.eup %5544  ;;  %v2253_v3 = vmul.f32 %v5543_v54, %v7228_v17  ;;  %v5331_v15 = vld [vmem:[%s6621_s22 + $0x28] sm:$0xff]  }
 0x6a9   : > { %v2196_v24 = vpop.xlane.xlu1 %2195  ;;  %5045 = vmatprep.mubr.msk.bf16.mxu1 %vm1914_vm2, %v2279_v11  ;;  %v5547_v31 = vpop.eup %5546  ;;  %v2256_v0 = vmul.f32 %v5545_v25, %v7276_v9 }
 0x6aa   : > { %5556 = vrcp.f32 %v2196_v24  ;;  %5046 = vmatmul.mubr.msk.bf16.vlgmr.msra.gmra.mrb[40].mxu1 %vm1914_vm2, %v2280_v33  ;;  %v5549_v62 = vpop.eup %5548  ;;  %v2276_v52 = vpack.c.bf16 %v2254_v23, %v2253_v3  ;;  %v2257_v9 = vmul.f32 %v5547_v31, %v7272_v56  ;;  %v5333_v24 = vld [vmem:[%s6621_s22 + $0x38] sm:$0xff]   ;;  %s8231_s22 = scalar_lea.vmem [#allocation14], %s6595_s28 }
 0x6ab   : > { %v2277_v57 = vpack.c.bf16 %v2256_v0, %v2255_v22  ;;  %v2258_v45 = vmul.f32 %v5549_v62, %v7297_v48 }
 0x6ad   : > { %v1473_v59 = vpop.permute.xlu1 %1472  ;;  %v2278_v2 = vpack.c.bf16 %v2258_v45, %v2257_v9 }
 0x6ae   : > { %5027 = vmatprep.subr.bf16.mxu0 %v1473_v59 }
 0x6af   : > { %5028 = vmatpush3.bf16.msra.mxu0 %v1473_v59 }
 0x6b0   : > { %v5551_v29 = vpop.eup %5550  ;;  %5053 = vmatprep.subr.bf16.mxu0 %v5326_v51 }
 0x6b1   : > { %v5553_v40 = vpop.eup %5552  ;;  %v2266_v17 = vmul.f32 %v5551_v29, %v7331_v47 }
 0x6b2   : > { %5030 = vmatmul.mubr.msk.bf16.vlgmr.msra.gmra.mrb[32].mxu0 %vm1914_vm2, %v2276_v52  ;;  %v5555_v4 = vpop.eup %5554  ;;  %v2263_v50 = vmul.f32 %v5553_v40, %v7327_v32 }
 0x6b3   : > { %5033 = vmatprep.mubr.msk.bf16.mxu0 %vm1914_vm2, %v2277_v57  ;;  %v2265_v28 = vmul.f32 %v5555_v4, %v7323_v26  ;;  %5054 = vmatpush3.bf16.msra.mxu0 %v5326_v51 }
 0x6b4   : > { %v5557_v8 = vpop.eup %5556  ;;  %5055 = vmatprep.subr.bf16.mxu0 %v5327_v46 }
 0x6b5   : > { %v2264_v38 = vmul.f32 %v5557_v8, %v7335_v42  ;;  %v2282_v55 = vpack.c.bf16 %v2266_v17, %v2265_v28 }
 0x6b7   : > { %v2281_v37 = vpack.c.bf16 %v2264_v38, %v2263_v50  ;;  %5056 = vmatpush3.bf16.msra.mxu0 %v5327_v46 }
 0x6b8   : > { %5057 = vmatprep.subr.bf16.mxu0 %v5328_v18 }
 0x6b9   : > { %5049 = vmatprep.mubr.msk.bf16.mxu1 %vm1914_vm2, %v2281_v37 }
 0x6ba   : > { %5034 = vmatmul.mubr.msk.bf16.gmra.mrb[36].mxu0 %vm1914_vm2, %v2278_v2  ;;  %5050 = vmatmul.mubr.msk.bf16.gmra.mrb[44].mxu1 %vm1914_vm2, %v2282_v55 }
 0x6bb   : > { %3228 = vmatprep.mubr.bf16.mxu1 %v6097_v7  ;;  %5058 = vmatpush3.bf16.msra.mxu0 %v5328_v18 }
 0x6bc   : > { %5059 = vmatprep.subr.bf16.mxu0 %v5329_v34 }
 0x6bf   : > { %5060 = vmatpush3.bf16.msra.mxu0 %v5329_v34 }
 0x6c0   : > { %5061 = vmatprep.subr.bf16.mxu0 %v5330_v61 }
 0x6c3   : > { %5062 = vmatpush3.bf16.msra.mxu0 %v5330_v61 }
 0x6c4   : > { %5063 = vmatprep.subr.bf16.mxu0 %v5331_v15 }
 0x6c7   : > { %5064 = vmatpush3.bf16.msra.mxu0 %v5331_v15 }
 0x6c8   : > { %5065 = vmatprep.subr.bf16.mxu0 %v5332_v63 }
 0x6cb   : > { %5066 = vmatpush3.bf16.msra.mxu0 %v5332_v63 }
 0x6cc   : > { %5067 = vmatprep.subr.bf16.mxu0 %v5333_v24 }
 0x6cf   : > { %5068 = vmatpush3.bf16.msra.mxu0 %v5333_v24 }
 0x708   : > { %v7414_v48 = vpop.f32.mrb[24].mxu1 }
 0x709   : > { %v7416_v32 = vpop.f32.mrb[25].mxu1 }
 0x70a   : > { %v7418_v56 = vpop.f32.mrb[26].mxu1 }
 0x70b   : > { %v7420_v26 = vpop.f32.mrb[27].mxu1 }
 0x710   : > { %v7422_v47 = vpop.f32.mrb[28].mxu1 }
 0x711   : > { %v7424_v42 = vpop.f32.mrb[29].mxu1 }
 0x712   : > { %v7426_v60 = vpop.f32.mrb[30].mxu1 }
 0x713   : > { %v7428_v35 = vpop.f32.mrb[31].mxu1 }
 0x759   : > { %v5015_v21 = vpop.f32.mrb[32].mxu1 }
 0x75a   : > { %v2406_v20 = vpop.f32.mrb[33].mxu1 }
 0x75b   : > { %v5016_v16 = vpop.f32.mrb[34].mxu1 }
 0x75c   : > { %v5234_v1 = vpack.i.bf16 %v5016_v16, %v5015_v21  ;;  %v2409_v19 = vpop.f32.mrb[35].mxu1 }
 0x75d   : > { %v5244_v43 = vpack.i.bf16 %v2409_v19, %v2406_v20 }
 0x75e   : > { %5235 = vrot.lane.b32.xlu0 %v5234_v1, %s6100_s15 }
 0x75f   : > { %5245 = vrot.lane.b32.xlu1 %v5244_v43, %s6100_s15 }
 0x771   : > { %v5019_v13 = vpop.f32.mrb[36].mxu1 }
 0x772   : > { %v2422_v44 = vpop.f32.mrb[37].mxu1 }
 0x773   : > { %v5020_v39 = vpop.f32.mrb[38].mxu1 }
 0x774   : > { %v5269_v53 = vpack.i.bf16 %v5020_v39, %v5019_v13  ;;  %v2425_v36 = vpop.f32.mrb[39].mxu1 }
 0x775   : > { %v5264_v5 = vpack.i.bf16 %v2425_v36, %v2422_v44 }
 0x77d   : > { %v5047_v6 = vpop.f32.mrb[40].mxu1 }
 0x77e   : > { %v2560_v41 = vpop.f32.mrb[41].mxu1 }
 0x77f   : > { %v5048_v27 = vpop.f32.mrb[42].mxu1 }
 0x780   : > { %v5259_v11 = vpack.i.bf16 %v5048_v27, %v5047_v6  ;;  %v2563_v33 = vpop.f32.mrb[43].mxu1 }
 0x781   : > { %v5254_v30 = vpack.i.bf16 %v2563_v33, %v2560_v41 }
 0x785   : > { %v5031_v58 = vpop.f32.mrb[32].mxu0 }
 0x786   : > { %v2483_v54 = vpop.f32.mrb[33].mxu0 }
 0x787   : > { %v5032_v25 = vpop.f32.mrb[34].mxu0 }
 0x788   : > { %v5239_v23 = vpack.i.bf16 %v5032_v25, %v5031_v58  ;;  %v2486_v59 = vpop.f32.mrb[35].mxu0 }
 0x789   : > { %v5249_v22 = vpack.i.bf16 %v2486_v59, %v2483_v54 }
 0x78a   : > { %5240 = vrot.lane.b32.xlu0 %v5239_v23, %s6099_s3 }
 0x78b   : > { %5250 = vrot.lane.b32.xlu1 %v5249_v22, %s6099_s3 }
 0x78d   : > { %v5035_v3 = vpop.f32.mrb[36].mxu0  ;;  %v5051_v31 = vpop.f32.mrb[44].mxu1 }
 0x78e   : > { %v2499_v0 = vpop.f32.mrb[37].mxu0  ;;  %5260 = vrot.lane.b32.xlu0 %v5259_v11, %s6098_s8  ;;  %v2576_v62 = vpop.f32.mrb[45].mxu1 }
 0x78f   : > { %v5036_v52 = vpop.f32.mrb[38].mxu0  ;;  %5255 = vrot.lane.b32.xlu1 %v5254_v30, %s6098_s8  ;;  %v5052_v29 = vpop.f32.mrb[46].mxu1 }
 0x790   : > { %v5279_v57 = vpack.i.bf16 %v5036_v52, %v5035_v3  ;;  %v5289_v40 = vpack.i.bf16 %v5052_v29, %v5051_v31  ;;  %v2502_v4 = vpop.f32.mrb[39].mxu0  ;;  %v2579_v8 = vpop.f32.mrb[47].mxu1 }
 0x791   : > { %v5274_v45 = vpack.i.bf16 %v2502_v4, %v2499_v0  ;;  %v5284_v17 = vpack.i.bf16 %v2579_v8, %v2576_v62 }
 0x792   : > { %5270 = vrot.lane.b32.xlu0 %v5269_v53, %s6100_s15 }
 0x793   : > { %5265 = vrot.lane.b32.xlu1 %v5264_v5, %s6100_s15 }
 0x796   : > { %5280 = vrot.lane.b32.xlu0 %v5279_v57, %s6099_s3 }
 0x797   : > { %5275 = vrot.lane.b32.xlu1 %v5274_v45, %s6099_s3 }
 0x79a   : > { %5290 = vrot.lane.b32.xlu0 %v5289_v40, %s6098_s8 }
 0x79b   : > { %5285 = vrot.lane.b32.xlu1 %v5284_v17, %s6098_s8 }
 0x7d0   : > { %v5236_v50 = vpop.permute.xlu0 %5235 }
 0x7d1   : > { %v5246_v38 = vpop.permute.xlu1 %5245  ;;  %v5238_v9 = vunpack.i.h.bf16 %v5236_v50  ;;  %v5237_v28 = vunpack.i.l.bf16 %v5236_v50 }
 0x7d2   : > { %v5248_v2 = vunpack.i.h.bf16 %v5246_v38  ;;  %v5247_v55 = vunpack.i.l.bf16 %v5246_v38 }
 0x7d3   : > { %v2690_v16 = vsel %vm1509_vm0, %v7418_v56, %v5238_v9  ;;  %v2689_v1 = vsel %vm1509_vm0, %v7414_v48, %v5237_v28 }
 0x7d4   : > { %v2688_v34 = vsel %vm1509_vm0, %v7420_v26, %v5248_v2  ;;  %v2687_v43 = vsel %vm1509_vm0, %v7416_v32, %v5247_v55  ;;  %v4607_v2 = vld [vmem:[%s8221_s14] ss:$0 sm:$0xff] }
 0x7fc   : > { %v5241_v37 = vpop.permute.xlu0 %5240 }
 0x7fd   : > { %v5251_v51 = vpop.permute.xlu1 %5250  ;;  %v5243_v46 = vunpack.i.h.bf16 %v5241_v37  ;;  %v5242_v18 = vunpack.i.l.bf16 %v5241_v37 }
 0x7fe   : > { %v5253_v21 = vunpack.i.h.bf16 %v5251_v51  ;;  %v5252_v20 = vunpack.i.l.bf16 %v5251_v51 }
 0x7ff   : > { %v2697_v44 = vsel %vm1914_vm2, %v2689_v1, %v5242_v18  ;;  %v2698_v39 = vsel %vm1914_vm2, %v2690_v16, %v5243_v46 }
 0x800   : > { %v5261_v19 = vpop.permute.xlu0 %5260  ;;  %v2695_v36 = vsel %vm1914_vm2, %v2687_v43, %v5252_v20  ;;  %v2696_v48 = vsel %vm1914_vm2, %v2688_v34, %v5253_v21  ;;  %v5638_v20 = vld [vmem:[#allocation2] sm:$0xff]  ;;  %v5639_v43 = vld [vmem:[#allocation2 + $0x8] sm:$0xff] }
 0x801   : > { %v5263_v61 = vunpack.i.h.bf16 %v5261_v19  ;;  %v5262_v15 = vunpack.i.l.bf16 %v5261_v19  ;;  %v5256_v13 = vpop.permute.xlu1 %5255 }
 0x802   : > { %v5258_v53 = vunpack.i.h.bf16 %v5256_v13  ;;  %v5257_v56 = vunpack.i.l.bf16 %v5256_v13 }
 0x803   : > { %v2706_v5 = vsel %vm2703_vm10, %v2697_v44, %v5262_v15  ;;  %v2707_v26 = vsel %vm2703_vm10, %v2698_v39, %v5263_v61  ;;  %v5640_v15 = vld [vmem:[#allocation2 + $0x18] sm:$0xff]  ;;  %v5641_v44 = vld [vmem:[#allocation2 + $0x10] sm:$0xff] }
 0x804   : > { %v2713_v6 = vpack.c.bf16 %v2707_v26, %v2706_v5  ;;  %v5271_v41 = vpop.permute.xlu0 %5270  ;;  %v2704_v32 = vsel %vm2703_vm10, %v2695_v36, %v5257_v56  ;;  %v2705_v27 = vsel %vm2703_vm10, %v2696_v48, %v5258_v53 }
 0x805   : > { %v5266_v63 = vpop.permute.xlu1 %5265  ;;  %v2712_v11 = vpack.c.bf16 %v2705_v27, %v2704_v32  ;;  %v5273_v33 = vunpack.i.h.bf16 %v5271_v41  ;;  %v5272_v30 = vunpack.i.l.bf16 %v5271_v41 }
 0x806   : > { %v5268_v58 = vunpack.i.h.bf16 %v5266_v63  ;;  %v5267_v54 = vunpack.i.l.bf16 %v5266_v63  ;;  %v5643_v63 = vld [vmem:[#allocation2 + $0x28] sm:$0xff] }
 0x807   : > { %5069 = vmatprep.mubr.bf16.mxu0 %v2712_v11  ;;  %v2694_v31 = vsel %vm1509_vm0, %v7426_v60, %v5273_v33  ;;  %v2693_v0 = vsel %vm1509_vm0, %v7422_v47, %v5272_v30  ;;  %v5644_v33 = vld [vmem:[#allocation2 + $0x30] sm:$0xff] }
 0x808   : > { %v5281_v24 = vpop.permute.xlu0 %5280  ;;  %5070 = vmatmul.mubr.bf16.vlgmr.msra.gmra.mrb[40].mxu0 %v2713_v6  ;;  %v2692_v52 = vsel %vm1509_vm0, %v7428_v35, %v5268_v58  ;;  %v2691_v29 = vsel %vm1509_vm0, %v7424_v42, %v5267_v54  ;;  %v5642_v6 = vld [vmem:[#allocation2 + $0x20] sm:$0xff] }
 0x809   : > { %v5276_v25 = vpop.permute.xlu1 %5275  ;;  %v5283_v23 = vunpack.i.h.bf16 %v5281_v24  ;;  %v5282_v59 = vunpack.i.l.bf16 %v5281_v24  ;;  %v5645_v24 = vld [vmem:[#allocation2 + $0x38] sm:$0xff]  ;;  %v5334_v54 = vld [vmem:[%s6656_s18] ss:$16 sps:$4 sm:$0xff]  }
 0x80a   : > { %v5278_v22 = vunpack.i.h.bf16 %v5276_v25  ;;  %v5277_v3 = vunpack.i.l.bf16 %v5276_v25  ;;  %v5336_v25 = vld [vmem:[%s6656_s18 + $0x4] ss:$16 sps:$4 sm:$0xff]  }
 0x80b   : > { %v2701_v8 = vsel %vm1914_vm2, %v2693_v0, %v5282_v59  ;;  %v2702_v45 = vsel %vm1914_vm2, %v2694_v31, %v5283_v23  ;;  %v5337_v23 = vld [vmem:[%s6656_s18 + $0x8] ss:$16 sps:$4 sm:$0xff]   ;;  %v5339_v59 = vld [vmem:[%s6656_s18 + $0xc] ss:$16 sps:$4 sm:$0xff]   ;;  %3196 = vmatprep.subr.bf16.mxu1 %v5336_v25  ;;  %v5340_v31 = vld [vmem:[%s6656_s18 + $0x20] ss:$16 sps:$4 sm:$0xff]  }
 0x80c   : > { %v5291_v62 = vpop.permute.xlu0 %5290  ;;  %v2699_v50 = vsel %vm1914_vm2, %v2691_v29, %v5277_v3  ;;  %v2700_v47 = vsel %vm1914_vm2, %v2692_v52, %v5278_v22  ;;  %v5342_v22 = vld [vmem:[%s6656_s18 + $0x24] ss:$16 sps:$4 sm:$0xff]   ;;  %v5345_v3 = vld [vmem:[%s6656_s18 + $0x2c] ss:$16 sps:$4 sm:$0xff]   ;;  %3269 = vmatprep.subr.bf16.mxu0 %v5339_v59  ;;  %3197 = vmatpush1.bf16.msra.mxu1 %v5334_v54  ;;  %v5343_v0 = vld [vmem:[%s6656_s18 + $0x28] ss:$16 sps:$4 sm:$0xff]  }
 0x80d   : > { %v5293_v57 = vunpack.i.h.bf16 %v5291_v62  ;;  %v5292_v40 = vunpack.i.l.bf16 %v5291_v62  ;;  %v5286_v4 = vpop.permute.xlu1 %5285  ;;  %3270 = vmatpush1.bf16.msra.mxu0 %v5337_v23  ;;  %3198 = vmatprep.subr.bf16.mxu1 %v5342_v22  ;;  %v5361_v54 = vld [vmem:[%s6656_s18 + $0x88] ss:$16 sps:$4 sm:$0xff]   ;;  %v5366_v25 = vld [vmem:[%s6656_s18 + $0xa4] ss:$16 sps:$4 sm:$0xff]   ;;  %v5369_v23 = vld [vmem:[%s6656_s18 + $0xac] ss:$16 sps:$4 sm:$0xff]  }
 0x80e   : > { %v5288_v17 = vunpack.i.h.bf16 %v5286_v4  ;;  %v5287_v60 = vunpack.i.l.bf16 %v5286_v4  ;;  %3271 = vmatprep.subr.bf16.mxu0 %v5345_v3  ;;  %v5364_v59 = vld [vmem:[%s6656_s18 + $0xa0] ss:$16 sps:$4 sm:$0xff]   ;;  %v5367_v22 = vld [vmem:[%s6656_s18 + $0xa8] ss:$16 sps:$4 sm:$0xff]   ;;  %v5372_v3 = vld [vmem:[%s6656_s18 + $0xc4] ss:$16 sps:$4 sm:$0xff]  }
 0x80f   : > { %v2710_v38 = vsel %vm2703_vm10, %v2701_v8, %v5292_v40  ;;  %v2711_v35 = vsel %vm2703_vm10, %v2702_v45, %v5293_v57 }
 0x810   : > { %v2708_v42 = vsel %vm2703_vm10, %v2699_v50, %v5287_v60  ;;  %v2709_v9 = vsel %vm2703_vm10, %v2700_v47, %v5288_v17  ;;  %v2715_v28 = vpack.c.bf16 %v2711_v35, %v2710_v38  ;;  %3199 = vmatpush1.bf16.msra.mxu1 %v5340_v31  ;;  %v5375_v31 = vld [vmem:[%s6656_s18 + $0xcc] ss:$16 sps:$4 sm:$0xff]  }
 0x811   : > { %v2714_v37 = vpack.c.bf16 %v2709_v9, %v2708_v42  ;;  %3272 = vmatpush1.bf16.msra.mxu0 %v5343_v0  ;;  %v5370_v0 = vld [vmem:[%s6656_s18 + $0xc0] ss:$16 sps:$4 sm:$0xff]  }
 0x813   : > { %5073 = vmatprep.mubr.bf16.mxu0 %v2714_v37 }
 0x814   : > { %5074 = vmatmul.mubr.bf16.gmra.mrb[44].mxu0 %v2715_v28 }
 0x815   : > { %3301 = vmatprep.mubr.bf16.mxu0 %v6097_v7 }
 0x8db   : > { %v5071_v55 = vpop.f32.mrb[40].mxu0 }
 0x8dc   : > { %v2821_v51 = vpop.f32.mrb[41].mxu0  ;;  %v2830_v34 = vadd.f32 %v5071_v55, %v4607_v2 }
 0x8dd   : > { %v2822_v46 = vadd.f32 %v4607_v2, %v2821_v51  ;;  %v5072_v18 = vpop.f32.mrb[42].mxu0 }
 0x8de   : > { %v2824_v21 = vpop.f32.mrb[43].mxu0  ;;  %v2833_v1 = vadd.f32 %v5072_v18, %v4607_v2  ;;  %v7493_v39 = vadd.f32 %v5641_v44, %v2830_v34 }
 0x8df   : > { %v7485_v16 = vadd.f32 %v5638_v20, %v2822_v46  ;;  %v2825_v19 = vadd.f32 %v4607_v2, %v2824_v21 }
 0x8e0   : > { %v7490_v13 = vadd.f32 %v5640_v15, %v2833_v1  ;;  %8225 = vst [vmem:[#allocation38_spill] sm:$0xff] %v7493_v39 }
 0x8e1   : > { %8222 = vst [vmem:[#allocation35_spill] sm:$0xff] %v7485_v16  ;;  %v7487_v61 = vadd.f32 %v5639_v43, %v2825_v19  ;;  %2862 = vadd.xlane.f32.xlu1 %v7485_v16 }
 0x8e2   : > { %8224 = vst [vmem:[#allocation37_spill] sm:$0xff] %v7490_v13 }
 0x8e3   : > { %8223 = vst [vmem:[#allocation36_spill] sm:$0xff] %v7487_v61  ;;  %2864 = vadd.xlane.f32.xlu0 %v7487_v61 }
 0x8e5   : > { %2868 = vadd.xlane.f32.xlu1 %v7490_v13 }
 0x8e7   : > { %v5075_v53 = vpop.f32.mrb[44].mxu0  ;;  %2866 = vadd.xlane.f32.xlu0 %v7493_v39 }
 0x8e8   : > { %v2837_v56 = vpop.f32.mrb[45].mxu0  ;;  %v2846_v26 = vadd.f32 %v5075_v53, %v4607_v2  ;;  %v5348_v53 = vld [vmem:[%s6656_s18 + $0x44] ss:$16 sps:$4 sm:$0xff]  }
 0x8e9   : > { %v2838_v36 = vadd.f32 %v4607_v2, %v2837_v56  ;;  %v5076_v48 = vpop.f32.mrb[46].mxu0  ;;  %v5351_v56 = vld [vmem:[%s6656_s18 + $0x4c] ss:$16 sps:$4 sm:$0xff]   ;;  %3200 = vmatprep.subr.bf16.mxu1 %v5348_v53 }
 0x8ea   : > { %v2840_v5 = vpop.f32.mrb[47].mxu0  ;;  %v2849_v27 = vadd.f32 %v5076_v48, %v4607_v2  ;;  %v7502_v30 = vadd.f32 %v5644_v33, %v2846_v26  ;;  %v5349_v48 = vld [vmem:[%s6656_s18 + $0x48] ss:$16 sps:$4 sm:$0xff]   ;;  %3273 = vmatprep.subr.bf16.mxu0 %v5351_v56  ;;  %v5354_v26 = vld [vmem:[%s6656_s18 + $0x64] ss:$16 sps:$4 sm:$0xff]  }
 0x8eb   : > { %v7497_v41 = vadd.f32 %v5642_v6, %v2838_v36  ;;  %v2841_v32 = vadd.f32 %v4607_v2, %v2840_v5  ;;  %v5346_v36 = vld [vmem:[%s6656_s18 + $0x40] ss:$16 sps:$4 sm:$0xff]   ;;  %3274 = vmatpush1.bf16.msra.mxu0 %v5349_v48  ;;  %v5357_v6 = vld [vmem:[%s6656_s18 + $0x6c] ss:$16 sps:$4 sm:$0xff]  }
 0x8ec   : > { %8228 = vst [vmem:[#allocation41_spill] sm:$0xff] %v7502_v30  ;;  %v7505_v58 = vadd.f32 %v5645_v24, %v2849_v27  ;;  %3201 = vmatpush1.bf16.msra.mxu1 %v5346_v36  ;;  %v5355_v27 = vld [vmem:[%s6656_s18 + $0x68] ss:$16 sps:$4 sm:$0xff]   ;;  %3275 = vmatprep.subr.bf16.mxu0 %v5357_v6  ;;  %v5363_v33 = vld [vmem:[%s6656_s18 + $0x8c] ss:$16 sps:$4 sm:$0xff]  }
 0x8ed   : > { %8226 = vst [vmem:[#allocation39_spill] sm:$0xff] %v7497_v41  ;;  %v7499_v11 = vadd.f32 %v5643_v63, %v2841_v32  ;;  %2870 = vadd.xlane.f32.xlu0 %v7497_v41  ;;  %v5352_v32 = vld [vmem:[%s6656_s18 + $0x60] ss:$16 sps:$4 sm:$0xff]   ;;  %3202 = vmatprep.subr.bf16.mxu1 %v5354_v26  ;;  %v5360_v63 = vld [vmem:[%s6656_s18 + $0x84] ss:$16 sps:$4 sm:$0xff]  }
 0x8ee   : > { %8229 = vst [vmem:[#allocation42_spill] sm:$0xff] %v7505_v58  ;;  %v5358_v24 = vld [vmem:[%s6656_s18 + $0x80] ss:$16 sps:$4 sm:$0xff]  }
 0x8ef   : > { %8227 = vst [vmem:[#allocation40_spill] sm:$0xff] %v7499_v11  ;;  %2872 = vadd.xlane.f32.xlu1 %v7499_v11  ;;  %3276 = vmatpush1.bf16.msra.mxu0 %v5355_v27 }
 0x8f0   : > { %3203 = vmatpush1.bf16.msra.mxu1 %v5352_v32  ;;  %3277 = vmatprep.subr.bf16.mxu0 %v5363_v33  ;;  %v4617_v33 = vld [vmem:[%s8231_s22] ss:$0 sm:$0xff] }
 0x8f1   : > { %2874 = vadd.xlane.f32.xlu0 %v7502_v30  ;;  %3204 = vmatprep.subr.bf16.mxu1 %v5360_v63 }
 0x8f3   : > { %2876 = vadd.xlane.f32.xlu1 %v7505_v58  ;;  %3278 = vmatpush1.bf16.msra.mxu0 %v5361_v54 }
 0x8f4   : > { %3205 = vmatpush1.bf16.msra.mxu1 %v5358_v24  ;;  %3279 = vmatprep.subr.bf16.mxu0 %v5369_v23 }
 0x8f5   : > { %3206 = vmatprep.subr.bf16.mxu1 %v5366_v25 }
 0x8f7   : > { %3280 = vmatpush1.bf16.msra.mxu0 %v5367_v22 }
 0x8f8   : > { %3207 = vmatpush1.bf16.msra.mxu1 %v5364_v59  ;;  %3281 = vmatprep.subr.bf16.mxu0 %v5375_v31 }
 0x8f9   : > { %3208 = vmatprep.subr.bf16.mxu1 %v5372_v3 }
 0x8fc   : > { %3209 = vmatpush1.bf16.msra.mxu1 %v5370_v0 }
 0x96e   : > { %v2863_v62 = vpop.xlane.xlu1 %2862 }
 0x96f   : > { %v2878_v52 = vmul.f32 0.0078125, %v2863_v62  ;;  %v5373_v62 = vld [vmem:[%s6656_s18 + $0xc8] ss:$16 sps:$4 sm:$0xff]  }
 0x970   : > { %v2865_v29 = vpop.xlane.xlu0 %2864  ;;  %3282 = vmatpush1.bf16.msra.mxu0 %v5373_v62 }
 0x971   : > { %v7518_v57 = vsub.f32 %v7485_v16, %v2878_v52  ;;  %v2879_v40 = vmul.f32 0.0078125, %v2865_v29  ;;  %v5378_v52 = vld [vmem:[%s6656_s18 + $0xe4] ss:$16 sps:$4 sm:$0xff]   ;;  %v5381_v29 = vld [vmem:[%s6656_s18 + $0xec] ss:$16 sps:$4 sm:$0xff]  }
 0x972   : > { %v2869_v4 = vpop.xlane.xlu1 %2868  ;;  %3210 = vmatprep.subr.bf16.mxu1 %v5378_v52  ;;  %3283 = vmatprep.subr.bf16.mxu0 %v5381_v29 }
 0x973   : > { %v7521_v8 = vsub.f32 %v7487_v61, %v2879_v40  ;;  %v2881_v45 = vmul.f32 0.0078125, %v2869_v4  ;;  %v2894_v17 = vmul.f32 %v7518_v57, %v7518_v57  ;;  %v5376_v40 = vld [vmem:[%s6656_s18 + $0xe0] ss:$16 sps:$4 sm:$0xff]   ;;  %v5379_v4 = vld [vmem:[%s6656_s18 + $0xe8] ss:$16 sps:$4 sm:$0xff]  }
 0x974   : > { %v2867_v60 = vpop.xlane.xlu0 %2866  ;;  %3211 = vmatpush1.bf16.msra.mxu1 %v5376_v40  ;;  %3284 = vmatpush1.bf16.msra.mxu0 %v5379_v4 }
 0x975   : > { %v7526_v50 = vsub.f32 %v7490_v13, %v2881_v45  ;;  %v2880_v47 = vmul.f32 0.0078125, %v2867_v60  ;;  %2902 = vadd.xlane.f32.xlu0 %v2894_v17  ;;  %v2895_v38 = vmul.f32 %v7521_v8, %v7521_v8 }
 0x977   : > { %v7531_v35 = vsub.f32 %v7493_v39, %v2880_v47  ;;  %2904 = vadd.xlane.f32.xlu1 %v2895_v38  ;;  %v2897_v9 = vmul.f32 %v7526_v50, %v7526_v50 }
 0x979   : > { %v2896_v42 = vmul.f32 %v7531_v35, %v7531_v35 }
 0x97a   : > { %v2871_v28 = vpop.xlane.xlu0 %2870 }
 0x97b   : > { %v2882_v37 = vmul.f32 0.0078125, %v2871_v28  ;;  %2906 = vadd.xlane.f32.xlu0 %v2896_v42  ;;  %2908 = vadd.xlane.f32.xlu1 %v2897_v9 }
 0x97c   : > { %v2873_v2 = vpop.xlane.xlu1 %2872 }
 0x97d   : > { %v7538_v55 = vsub.f32 %v7497_v41, %v2882_v37  ;;  %v2883_v51 = vmul.f32 0.0078125, %v2873_v2 }
 0x97e   : > { %v2875_v46 = vpop.xlane.xlu0 %2874 }
 0x97f   : > { %v7541_v18 = vsub.f32 %v7499_v11, %v2883_v51  ;;  %v2884_v21 = vmul.f32 0.0078125, %v2875_v46  ;;  %v2898_v20 = vmul.f32 %v7538_v55, %v7538_v55 }
 0x980   : > { %v2877_v1 = vpop.xlane.xlu1 %2876 }
 0x981   : > { %v7546_v19 = vsub.f32 %v7502_v30, %v2884_v21  ;;  %v2885_v34 = vmul.f32 0.0078125, %v2877_v1  ;;  %2910 = vadd.xlane.f32.xlu0 %v2898_v20  ;;  %v2899_v43 = vmul.f32 %v7541_v18, %v7541_v18 }
 0x983   : > { %v7551_v15 = vsub.f32 %v7505_v58, %v2885_v34  ;;  %2912 = vadd.xlane.f32.xlu1 %v2899_v43  ;;  %v2900_v44 = vmul.f32 %v7546_v19, %v7546_v19  ;;  %v4616_v43 = vld [vmem:[%s8230_s16] ss:$0 sm:$0xff] }
 0x985   : > { %2914 = vadd.xlane.f32.xlu0 %v2900_v44  ;;  %v2901_v5 = vmul.f32 %v7551_v15, %v7551_v15 }
 0x987   : > { %2916 = vadd.xlane.f32.xlu1 %v2901_v5 }
 0xa02   : > { %v2903_v45 = vpop.xlane.xlu0 %2902 }
 0xa03   : > { %v2918_v17 = vmul.f32 0.0078125, %v2903_v45 }
 0xa04   : > { %v2905_v60 = vpop.xlane.xlu1 %2904 }
 0xa05   : > { %v2926_v47 = vadd.f32 1e-05, %v2918_v17  ;;  %v2919_v38 = vmul.f32 0.0078125, %v2905_v60 }
 0xa07   : > { %5558 = vrsqrt.f32 %v2926_v47  ;;  %v2927_v42 = vadd.f32 1e-05, %v2919_v38 }
 0xa08   : > { %v2907_v9 = vpop.xlane.xlu0 %2906  ;;  %v2909_v28 = vpop.xlane.xlu1 %2908 }
 0xa09   : > { %5560 = vrsqrt.f32 %v2927_v42  ;;  %v2920_v37 = vmul.f32 0.0078125, %v2907_v9  ;;  %v2921_v2 = vmul.f32 0.0078125, %v2909_v28 }
 0xa0b   : > { %v2928_v51 = vadd.f32 1e-05, %v2920_v37  ;;  %v2929_v46 = vadd.f32 1e-05, %v2921_v2 }
 0xa0d   : > { %5562 = vrsqrt.f32 %v2928_v51 }
 0xa0e   : > { %5564 = vrsqrt.f32 %v2929_v46  ;;  %v2911_v21 = vpop.xlane.xlu0 %2910 }
 0xa0f   : > { %v2922_v20 = vmul.f32 0.0078125, %v2911_v21  ;;  %v5383_v21 = vld [vmem:[%s6661_s5 + $0xc0] sm:$0xff]  }
 0xa10   : > { %v2913_v1 = vpop.xlane.xlu1 %2912  ;;  %4861 = vmatprep.subr.bf16.mxu0 %v5383_v21 }
 0xa11   : > { %v5559_v34 = vpop.eup %5558  ;;  %v2930_v44 = vadd.f32 1e-05, %v2922_v20  ;;  %v2923_v53 = vmul.f32 0.0078125, %v2913_v1  ;;  %v5384_v20 = vld [vmem:[%s6661_s5] sm:$0xff]  }
 0xa12   : > { %v2942_v56 = vmul.f32 %v5559_v34, %v7518_v57  ;;  %v2915_v36 = vpop.xlane.xlu0 %2914  ;;  %v5385_v1 = vld [vmem:[%s6661_s5 + $0x80] sm:$0xff]   ;;  %v5387_v34 = vld [vmem:[%s6661_s5 + $0xc8] sm:$0xff]  }
 0xa13   : > { %v5561_v48 = vpop.eup %5560  ;;  %5566 = vrsqrt.f32 %v2930_v44  ;;  %v2931_v5 = vadd.f32 1e-05, %v2923_v53  ;;  %v2924_v26 = vmul.f32 0.0078125, %v2915_v36  ;;  %v5389_v44 = vld [vmem:[%s6661_s5 + $0x88] sm:$0xff]   ;;  %v5390_v53 = vld [vmem:[%s6661_s5 + $0x50] sm:$0xff]  }
 0xa14   : > { %v2956_v6 = vmul.f32 %v4616_v43, %v2942_v56  ;;  %v2943_v32 = vmul.f32 %v5561_v48, %v7521_v8  ;;  %v2917_v27 = vpop.xlane.xlu1 %2916  ;;  %v5391_v56 = vld [vmem:[%s6661_s5 + $0xd0] sm:$0xff]  }
 0xa15   : > { %5568 = vrsqrt.f32 %v2931_v5  ;;  %v2925_v63 = vmul.f32 0.0078125, %v2917_v27  ;;  %v2932_v25 = vadd.f32 1e-05, %v2924_v26  ;;  %v5392_v36 = vld [vmem:[%s6661_s5 + $0x10] sm:$0xff]   ;;  %v5394_v5 = vld [vmem:[%s6661_s5 + $0x58] sm:$0xff]   ;;  %v5398_v27 = vld [vmem:[%s6661_s5 + $0x60] sm:$0xff]  }
 0xa16   : > { %v2957_v24 = vmul.f32 %v4616_v43, %v2943_v32  ;;  %v2970_v22 = vadd.f32 %v4617_v33, %v2956_v6  ;;  %v5393_v48 = vld [vmem:[%s6661_s5 + $0x90] sm:$0xff]   ;;  %v5395_v26 = vld [vmem:[%s6661_s5 + $0xd8] sm:$0xff]  }
 0xa17   : > { %v5563_v54 = vpop.eup %5562  ;;  %v2933_v23 = vadd.f32 1e-05, %v2925_v63  ;;  %v5396_v6 = vld [vmem:[%s6661_s5 + $0x18] sm:$0xff]   ;;  %v5399_v63 = vld [vmem:[%s6661_s5 + $0xe0] sm:$0xff]  }
 0xa18   : > { %v5565_v59 = vpop.eup %5564  ;;  %v2971_v57 = vadd.f32 %v4617_v33, %v2957_v24  ;;  %v2944_v3 = vmul.f32 %v5563_v54, %v7531_v35  ;;  %v5397_v32 = vld [vmem:[%s6661_s5 + $0x98] sm:$0xff]   ;;  %v5401_v24 = vld [vmem:[%s6661_s5 + $0xa0] sm:$0xff]   ;;  %v5402_v54 = vld [vmem:[%s6661_s5 + $0x68] sm:$0xff]  }
 0xa19   : > { %5570 = vrsqrt.f32 %v2933_v23  ;;  %v2945_v31 = vmul.f32 %v5565_v59, %v7526_v50  ;;  %v5404_v23 = vld [vmem:[%s6661_s5 + $0x28] sm:$0xff]  }
 0xa1a   : > { %v2978_v0 = vpack.c.bf16 %v2971_v57, %v2970_v22  ;;  %v2958_v62 = vmul.f32 %v4616_v43, %v2944_v3  ;;  %5572 = vrsqrt.f32 %v2932_v25  ;;  %v5403_v25 = vld [vmem:[%s6661_s5 + $0xe8] sm:$0xff]   ;;  %v5406_v22 = vld [vmem:[%s6661_s5 + $0x70] sm:$0xff]  }
 0xa1b   : > { %v2959_v8 = vmul.f32 %v4616_v43, %v2945_v31  ;;  %v5405_v59 = vld [vmem:[%s6661_s5 + $0xa8] sm:$0xff]   ;;  %v5407_v57 = vld [vmem:[%s6661_s5 + $0xf0] sm:$0xff]  }
 0xa1c   : > { %3229 = vmatmul.mubr.bf16.vlgmr.msra.gmra.mrb[48].mxu1 %v2978_v0  ;;  %3302 = vmatmul.mubr.bf16.vlgmr.msra.gmra.mrb[48].mxu0 %v2978_v0  ;;  %v2972_v29 = vadd.f32 %v4617_v33, %v2958_v62  ;;  %v5408_v3 = vld [vmem:[%s6661_s5 + $0x30] sm:$0xff]   ;;  %v5410_v0 = vld [vmem:[%s6661_s5 + $0x78] sm:$0xff]  }
 0xa1d   : > { %v5567_v52 = vpop.eup %5566  ;;  %3238 = vmatprep.mubr.bf16.mxu1 %v6097_v7  ;;  %3311 = vmatprep.mubr.bf16.mxu0 %v6097_v7  ;;  %v2973_v40 = vadd.f32 %v4617_v33, %v2959_v8  ;;  %v5409_v31 = vld [vmem:[%s6661_s5 + $0xb0] sm:$0xff]   ;;  %v5411_v62 = vld [vmem:[%s6661_s5 + $0xf8] sm:$0xff]  }
 0xa1e   : > { %v2946_v45 = vmul.f32 %v5567_v52, %v7538_v55  ;;  %4862 = vmatpush3.bf16.msra.mxu0 %v5385_v1  ;;  %v5412_v8 = vld [vmem:[%s6661_s5 + $0x38] sm:$0xff]  }
 0xa1f   : > { %v5569_v4 = vpop.eup %5568  ;;  %v2979_v17 = vpack.c.bf16 %v2973_v40, %v2972_v29  ;;  %4863 = vmatprep.subr.bf16.mxu0 %v5387_v34  ;;  %v5413_v52 = vld [vmem:[%s6661_s5 + $0xb8] sm:$0xff]   ;;  %v3014_v29 = vld [vmem:[%s6635_s27] sm:$0xf]  ;;  %v3030_v40 = vsub.s32 3, %v6742_v10 }
 0xa20   : > { %v2947_v35 = vmul.f32 %v5569_v4, %v7541_v18  ;;  %v2960_v47 = vmul.f32 %v4616_v43, %v2946_v45  ;;  %v7635_v4 = vrot.slane %v3014_v29, %v1095_v49  ;;  %v7639_v45 = vrot.slane %v3014_v29, %v1103_v14 }
 0xa22   : > { %v2961_v50 = vmul.f32 %v4616_v43, %v2947_v35  ;;  %v2974_v28 = vadd.f32 %v4617_v33, %v2960_v47  ;;  %4864 = vmatpush3.bf16.msra.mxu0 %v5389_v44  ;;  %v7643_v35 = vrot.slane %v3014_v29, %v1099_v12 }
 0xa23   : > { %v5571_v60 = vpop.eup %5570  ;;  %4865 = vmatprep.subr.bf16.mxu0 %v5391_v56 }
 0xa24   : > { %3239 = vmatmul.mubr.bf16.gmra.mrb[52].mxu1 %v2979_v17  ;;  %3312 = vmatmul.mubr.bf16.gmra.mrb[52].mxu0 %v2979_v17  ;;  %v5573_v38 = vpop.eup %5572  ;;  %v2975_v42 = vadd.f32 %v4617_v33, %v2961_v50  ;;  %v2949_v9 = vmul.f32 %v5571_v60, %v7551_v15  ;;  %v7645_v17 = vrot.slane %v3014_v29, %v3030_v40 }
 0xa25   : > { %3248 = vmatprep.mubr.bf16.mxu1 %v6097_v7  ;;  %3321 = vmatprep.mubr.bf16.mxu0 %v6097_v7  ;;  %v2948_v55 = vmul.f32 %v5573_v38, %v7546_v19  ;;  %v5382_v19 = vld [vmem:[%s6661_s5 + $0x40] sm:$0xff]  }
 0xa26   : > { %v2980_v18 = vpack.c.bf16 %v2975_v42, %v2974_v28  ;;  %v2963_v37 = vmul.f32 %v4616_v43, %v2949_v9  ;;  %4821 = vmatprep.subr.bf16.mxu1 %v5382_v19  ;;  %4866 = vmatpush3.bf16.msra.mxu0 %v5393_v48 }
 0xa27   : > { %v2962_v2 = vmul.f32 %v4616_v43, %v2948_v55  ;;  %4822 = vmatpush3.bf16.msra.mxu1 %v5384_v20  ;;  %v5388_v43 = vld [vmem:[%s6661_s5 + $0x8] sm:$0xff]   ;;  %4867 = vmatprep.subr.bf16.mxu0 %v5395_v26 }
 0xa28   : > { %v2977_v51 = vadd.f32 %v4617_v33, %v2963_v37 }
 0xa29   : > { %v2976_v15 = vadd.f32 %v4617_v33, %v2962_v2  ;;  %v5400_v33 = vld [vmem:[%s6661_s5 + $0x20] sm:$0xff]  }
 0xa2a   : > { %4868 = vmatpush3.bf16.msra.mxu0 %v5397_v32 }
 0xa2b   : > { %v2981_v46 = vpack.c.bf16 %v2977_v51, %v2976_v15  ;;  %4869 = vmatprep.subr.bf16.mxu0 %v5399_v63 }
 0xa2c   : > { %3249 = vmatmul.mubr.bf16.gmra.mrb[56].mxu1 %v2980_v18  ;;  %3322 = vmatmul.mubr.bf16.gmra.mrb[56].mxu0 %v2980_v18 }
 0xa2d   : > { %3258 = vmatprep.mubr.bf16.mxu1 %v6097_v7  ;;  %3331 = vmatprep.mubr.bf16.mxu0 %v6097_v7  ;;  %v5386_v7 = vld [vmem:[%s6661_s5 + $0x48] sm:$0xff]   ;;  %s8250_s5 = scalar_lea.vmem [#allocation17], %s6595_s28  ;;  %s8259_s28 = sld [smem:[#allocation28_spill]] }
 0xa2e   : > { %4823 = vmatprep.subr.bf16.mxu1 %v5386_v7  ;;  %4870 = vmatpush3.bf16.msra.mxu0 %v5401_v24 }
 0xa2f   : > { %4824 = vmatpush3.bf16.msra.mxu1 %v5388_v43  ;;  %4871 = vmatprep.subr.bf16.mxu0 %v5403_v25 }
 0xa30   : > { %4825 = vmatprep.subr.bf16.mxu1 %v5390_v53 }
 0xa32   : > { %4872 = vmatpush3.bf16.msra.mxu0 %v5405_v59 }
 0xa33   : > { %4826 = vmatpush3.bf16.msra.mxu1 %v5392_v36  ;;  %4873 = vmatprep.subr.bf16.mxu0 %v5407_v57  ;;  %p4683_p3 = scmp.ne.s32.totalorder %s8259_s28, 1 }
 0xa34   : > { %3259 = vmatmul.mubr.bf16.gmra.mrb[60].mxu1 %v2981_v46  ;;  %3332 = vmatmul.mubr.bf16.gmra.mrb[60].mxu0 %v2981_v46  ;;  %s8260_s29 = sld [smem:[#allocation64_spill]] (!%p4683_p3) }
 0xa35   : > { %4827 = vmatprep.subr.bf16.mxu1 %v5394_v5 }
 0xa36   : > { %4874 = vmatpush3.bf16.msra.mxu0 %v5409_v31 }
 0xa37   : > { %4828 = vmatpush3.bf16.msra.mxu1 %v5396_v6  ;;  %4875 = vmatprep.subr.bf16.mxu0 %v5411_v62 }
 0xa38   : > { %4829 = vmatprep.subr.bf16.mxu1 %v5398_v27 }
 0xa3a   : > { %4876 = vmatpush3.bf16.msra.mxu0 %v5413_v52 }
 0xa3b   : > { %4830 = vmatpush3.bf16.msra.mxu1 %v5400_v33 }
 0xa3c   : > { %4831 = vmatprep.subr.bf16.mxu1 %v5402_v54 }
 0xa3f   : > { %4832 = vmatpush3.bf16.msra.mxu1 %v5404_v23 }
 0xa40   : > { %4833 = vmatprep.subr.bf16.mxu1 %v5406_v22 }
 0xa43   : > { %4834 = vmatpush3.bf16.msra.mxu1 %v5408_v3 }
 0xa44   : > { %4835 = vmatprep.subr.bf16.mxu1 %v5410_v0 }
 0xa47   : > { %4836 = vmatpush3.bf16.msra.mxu1 %v5412_v8 }
 0xaef   : > { %v3230_v50 = vpop.f32.mrb[48].mxu1  ;;  %v3303_v60 = vpop.f32.mrb[48].mxu0 }
 0xaf0   : > { %v3231_v47 = vadd.f32 %v3230_v50, %v7635_v4  ;;  %v3304_v38 = vadd.f32 %v3303_v60, %v7639_v45  ;;  %v3232_v42 = vpop.f32.mrb[49].mxu1  ;;  %v3305_v9 = vpop.f32.mrb[49].mxu0 }
 0xaf1   : > { %v7650_v49 = vadd.f32 %v3232_v42, %v7643_v35  ;;  %v7653_v14 = vadd.f32 %v3305_v9, %v7645_v17  ;;  %v3234_v28 = vpop.f32.mrb[50].mxu1  ;;  %v3307_v10 = vpop.f32.mrb[50].mxu0 }
 0xaf2   : > { %v3374_v12 = vmul.f32 0.044715, %v3231_v47  ;;  %v3376_v55 = vmul.f32 0.044715, %v3304_v38  ;;  %v3235_v37 = vadd.f32 %v3234_v28, %v7635_v4  ;;  %v3308_v2 = vadd.f32 %v3307_v10, %v7639_v45  ;;  %v3236_v51 = vpop.f32.mrb[51].mxu1  ;;  %v3309_v15 = vpop.f32.mrb[51].mxu0 }
 0xaf3   : > { %v3375_v18 = vmul.f32 0.044715, %v7650_v49  ;;  %v3377_v21 = vmul.f32 0.044715, %v7653_v14  ;;  %v7660_v20 = vadd.f32 %v3236_v51, %v7643_v35  ;;  %v7663_v44 = vadd.f32 %v3309_v15, %v7645_v17 }
 0xaf4   : > { %v3406_v46 = vmul.f32 %v3374_v12, %v3231_v47  ;;  %v3408_v19 = vmul.f32 %v3376_v55, %v3304_v38  ;;  %v3378_v1 = vmul.f32 0.044715, %v3235_v37  ;;  %v3380_v43 = vmul.f32 0.044715, %v3308_v2 }
 0xaf5   : > { %v3407_v53 = vmul.f32 %v3375_v18, %v7650_v49  ;;  %v3409_v26 = vmul.f32 %v3377_v21, %v7653_v14  ;;  %v3379_v32 = vmul.f32 0.044715, %v7660_v20  ;;  %v7674_v22 = vmul.f32 0.5, %v3231_v47 }
 0xaf6   : > { %v3438_v7 = vmul.f32 %v3406_v46, %v3231_v47  ;;  %v3440_v34 = vmul.f32 %v3408_v19, %v3304_v38  ;;  %v3410_v56 = vmul.f32 %v3378_v1, %v3235_v37  ;;  %v3412_v6 = vmul.f32 %v3380_v43, %v3308_v2 }
 0xaf7   : > { %v3240_v36 = vpop.f32.mrb[52].mxu1  ;;  %v3313_v48 = vpop.f32.mrb[52].mxu0  ;;  %v7676_v57 = vmul.f32 0.5, %v3304_v38  ;;  %v3381_v31 = vmul.f32 0.044715, %v7663_v44  ;;  %v7679_v52 = vmul.f32 0.5, %v3235_v37  ;;  %v7689_v9 = vmul.f32 %v3407_v53, %v7650_v49 }
 0xaf8   : > { %v3470_v5 = vadd.f32 %v3438_v7, %v3231_v47  ;;  %v3242_v27 = vpop.f32.mrb[53].mxu1  ;;  %v3315_v63 = vpop.f32.mrb[53].mxu0  ;;  %v3472_v33 = vadd.f32 %v3440_v34, %v3304_v38  ;;  %v3442_v24 = vmul.f32 %v3410_v56, %v3235_v37  ;;  %v7669_v54 = vadd.f32 %v3240_v36, %v7635_v4 }
 0xaf9   : > { %v7672_v25 = vadd.f32 %v3313_v48, %v7639_v45  ;;  %v3244_v23 = vpop.f32.mrb[54].mxu1  ;;  %v3317_v59 = vpop.f32.mrb[54].mxu0  ;;  %v3444_v3 = vmul.f32 %v3412_v6, %v3308_v2  ;;  %v7681_v40 = vmul.f32 0.5, %v3308_v2  ;;  %v7686_v47 = vadd.f32 %v3242_v27, %v7643_v35 }
 0xafa   : > { %v3246_v0 = vpop.f32.mrb[55].mxu1  ;;  %v3319_v62 = vpop.f32.mrb[55].mxu0  ;;  %v3502_v8 = vmul.f32 0.7978846, %v3470_v5  ;;  %v3474_v29 = vadd.f32 %v3442_v24, %v3235_v37  ;;  %v3382_v60 = vmul.f32 0.044715, %v7669_v54  ;;  %v7692_v28 = vmul.f32 %v3409_v26, %v7653_v14 }
 0xafb   : > { %8232 = vst [vmem:[#allocation43_spill] sm:$0xff] %v7672_v25  ;;  %v3476_v50 = vadd.f32 %v3444_v3, %v3308_v2  ;;  %v3384_v42 = vmul.f32 0.044715, %v7672_v25  ;;  %v3504_v38 = vmul.f32 0.7978846, %v3472_v33  ;;  %v3411_v10 = vmul.f32 %v3379_v32, %v7660_v20 }
 0xafc   : > { %v3413_v12 = vmul.f32 %v3381_v31, %v7663_v44  ;;  %v3383_v55 = vmul.f32 0.044715, %v7686_v47  ;;  %v7698_v18 = vadd.f32 %v3315_v63, %v7645_v17  ;;  %v7701_v37 = vadd.f32 %v3244_v23, %v7635_v4 }
 0xafd   : > { %5574 = vtanh.f32 %v3502_v8  ;;  %v3506_v2 = vmul.f32 0.7978846, %v3474_v29  ;;  %v3508_v51 = vmul.f32 0.7978846, %v3476_v50  ;;  %v7704_v15 = vadd.f32 %v3317_v59, %v7639_v45 }
 0xafe   : > { %8233 = vst [vmem:[#allocation44_spill] sm:$0xff] %v7701_v37  ;;  %v3414_v21 = vmul.f32 %v3382_v60, %v7669_v54  ;;  %v3416_v1 = vmul.f32 %v3384_v42, %v7672_v25  ;;  %v3385_v7 = vmul.f32 0.044715, %v7698_v18  ;;  %v3386_v34 = vmul.f32 0.044715, %v7701_v37 }
 0xaff   : > { %8234 = vst [vmem:[#allocation45_spill] sm:$0xff] %v7704_v15  ;;  %v3250_v46 = vpop.f32.mrb[56].mxu1  ;;  %v3323_v19 = vpop.f32.mrb[56].mxu0  ;;  %v3415_v56 = vmul.f32 %v3383_v55, %v7686_v47  ;;  %v3388_v36 = vmul.f32 0.044715, %v7704_v15  ;;  %v7713_v48 = vadd.f32 %v3246_v0, %v7643_v35  ;;  %v7716_v5 = vadd.f32 %v3319_v62, %v7645_v17 }
 0xb00   : > { %v3252_v43 = vpop.f32.mrb[57].mxu1  ;;  %v3325_v53 = vpop.f32.mrb[57].mxu0  ;;  %5576 = vtanh.f32 %v3504_v38  ;;  %v7719_v32 = vmul.f32 %v3411_v10, %v7660_v20  ;;  %v7722_v27 = vadd.f32 %v3250_v46, %v7635_v4  ;;  %v7725_v63 = vadd.f32 %v3323_v19, %v7639_v45 }
 0xb01   : > { %v3254_v26 = vpop.f32.mrb[58].mxu1  ;;  %v3327_v6 = vpop.f32.mrb[58].mxu0  ;;  %5578 = vtanh.f32 %v3506_v2  ;;  %v7728_v23 = vmul.f32 %v3413_v12, %v7663_v44  ;;  %v3417_v59 = vmul.f32 %v3385_v7, %v7698_v18  ;;  %v3387_v3 = vmul.f32 0.044715, %v7713_v48 }
 0xb02   : > { %v3256_v33 = vpop.f32.mrb[59].mxu1  ;;  %v3329_v24 = vpop.f32.mrb[59].mxu0  ;;  %v7733_v31 = vmul.f32 %v3414_v21, %v7669_v54  ;;  %v3418_v0 = vmul.f32 %v3386_v34, %v7701_v37  ;;  %v3389_v62 = vmul.f32 0.044715, %v7716_v5  ;;  %v7738_v8 = vadd.f32 %v3252_v43, %v7643_v35 }
 0xb03   : > { %5580 = vtanh.f32 %v3508_v51  ;;  %v7741_v29 = vmul.f32 %v3416_v1, %v7672_v25  ;;  %v7744_v50 = vmul.f32 %v3415_v56, %v7686_v47  ;;  %v3420_v60 = vmul.f32 %v3388_v36, %v7704_v15 }
 0xb04   : > { %8235 = vst [vmem:[#allocation46_spill] sm:$0xff] %v7733_v31  ;;  %v3390_v42 = vmul.f32 0.044715, %v7722_v27  ;;  %v3392_v38 = vmul.f32 0.044715, %v7725_v63  ;;  %v7750_v10 = vadd.f32 %v3325_v53, %v7645_v17  ;;  %v7753_v12 = vadd.f32 %v3254_v26, %v7635_v4 }
 0xb05   : > { %8236 = vst [vmem:[#allocation47_spill] sm:$0xff] %v7741_v29  ;;  %v7756_v55 = vmul.f32 %v3417_v59, %v7698_v18  ;;  %v3419_v2 = vmul.f32 %v3387_v3, %v7713_v48  ;;  %v3391_v51 = vmul.f32 0.044715, %v7738_v8  ;;  %v7761_v46 = vadd.f32 %v3327_v6, %v7639_v45 }
 0xb06   : > { %v7764_v1 = vmul.f32 %v3418_v0, %v7701_v37  ;;  %v3421_v7 = vmul.f32 %v3389_v62, %v7716_v5  ;;  %v3393_v34 = vmul.f32 0.044715, %v7750_v10  ;;  %v3394_v43 = vmul.f32 0.044715, %v7753_v12 }
 0xb07   : > { %v3260_v19 = vpop.f32.mrb[60].mxu1  ;;  %v3333_v21 = vpop.f32.mrb[60].mxu0  ;;  %v3396_v26 = vmul.f32 0.044715, %v7761_v46  ;;  %v7773_v6 = vadd.f32 %v3256_v33, %v7643_v35  ;;  %v7776_v59 = vadd.f32 %v3329_v24, %v7645_v17  ;;  %v7782_v58 = vmul.f32 %v3420_v60, %v7704_v15 }
 0xb08   : > { %8237 = vst [vmem:[#allocation48_spill] sm:$0xff] %v7764_v1  ;;  %v3262_v53 = vpop.f32.mrb[61].mxu1  ;;  %v3335_v56 = vpop.f32.mrb[61].mxu0  ;;  %v7779_v3 = vadd.f32 %v3260_v19, %v7635_v4  ;;  %v3422_v30 = vmul.f32 %v3390_v42, %v7722_v27  ;;  %v3424_v11 = vmul.f32 %v3392_v38, %v7725_v63  ;;  %v7787_v41 = vadd.f32 %v3333_v21, %v7639_v45 }
 0xb09   : > { %v7769_v36 = vpop.eup %5574  ;;  %v3264_v0 = vpop.f32.mrb[62].mxu1  ;;  %8238 = vst [vmem:[#allocation49_spill] sm:$0xff] %v7782_v58  ;;  %v7790_v24 = vmul.f32 %v3419_v2, %v7713_v48  ;;  %v3395_v19 = vmul.f32 0.044715, %v7773_v6  ;;  %v3397_v39 = vmul.f32 0.044715, %v7776_v59  ;;  %v7796_v16 = vmul.f32 %v3421_v7, %v7716_v5 }
 0xb0a   : > { %v3337_v62 = vpop.f32.mrb[62].mxu0  ;;  %8239 = vst [vmem:[#allocation50_spill] sm:$0xff] %v7787_v41  ;;  %v3266_v33 = vpop.f32.mrb[63].mxu1  ;;  %v3398_v61 = vmul.f32 0.044715, %v7779_v3  ;;  %v3423_v42 = vmul.f32 %v3391_v51, %v7738_v8  ;;  %v7801_v21 = vadd.f32 %v3262_v53, %v7643_v35  ;;  %v3425_v2 = vmul.f32 %v3393_v34, %v7750_v10 }
 0xb0b   : > { %v3339_v13 = vpop.f32.mrb[63].mxu0  ;;  %v5577_v60 = vpop.eup %5576  ;;  %v3400_v38 = vmul.f32 0.044715, %v7787_v41  ;;  %v3426_v15 = vmul.f32 %v3394_v43, %v7753_v12  ;;  %v3428_v29 = vmul.f32 %v3396_v26, %v7761_v46  ;;  %v3427_v25 = vmul.f32 %v3395_v19, %v7773_v6 }
 0xb0c   : > { %v5579_v58 = vpop.eup %5578  ;;  %v3429_v1 = vmul.f32 %v3397_v39, %v7776_v59  ;;  %v3399_v7 = vmul.f32 0.044715, %v7801_v21  ;;  %v7810_v51 = vadd.f32 %v3335_v56, %v7645_v17  ;;  %v7813_v37 = vadd.f32 %v3264_v0, %v7635_v4 }
 0xb0d   : > { %v5581_v53 = vpop.eup %5580  ;;  %v7816_v31 = vmul.f32 %v3422_v30, %v7722_v27  ;;  %v7819_v34 = vmul.f32 %v3424_v11, %v7725_v63  ;;  %v3430_v43 = vmul.f32 %v3398_v61, %v7779_v3  ;;  %v7823_v26 = vadd.f32 %v3337_v62, %v7639_v45 }
 0xb0e   : > { %v7826_v39 = vmul.f32 %v3423_v42, %v7738_v8  ;;  %v3432_v56 = vmul.f32 %v3400_v38, %v7787_v41  ;;  %v3431_v4 = vmul.f32 %v3399_v7, %v7801_v21  ;;  %v3401_v0 = vmul.f32 0.044715, %v7810_v51 }
 0xb0f   : > { %v7832_v30 = vmul.f32 %v3425_v2, %v7750_v10  ;;  %v7835_v11 = vmul.f32 %v3426_v15, %v7753_v12  ;;  %v3402_v61 = vmul.f32 0.044715, %v7813_v37  ;;  %v3404_v45 = vmul.f32 0.044715, %v7823_v26 }
 0xb10   : > { %v7840_v62 = vmul.f32 %v3428_v29, %v7761_v46  ;;  %v7843_v19 = vmul.f32 %v3427_v25, %v7773_v6  ;;  %v7846_v42 = vmul.f32 %v3429_v1, %v7776_v59  ;;  %v7849_v38 = vadd.f32 %v3266_v33, %v7643_v35 }
 0xb11   : > { %v7852_v2 = vmul.f32 %v3430_v43, %v7779_v3  ;;  %v3433_v15 = vmul.f32 %v3401_v0, %v7810_v51  ;;  %v7856_v7 = vadd.f32 %v3339_v13, %v7645_v17  ;;  %v3471_v29 = vadd.f32 %v7689_v9, %v7650_v49 }
 0xb12   : > { %v7861_v25 = vmul.f32 %v3432_v56, %v7787_v41  ;;  %v7864_v1 = vmul.f32 %v3431_v4, %v7801_v21  ;;  %v7867_v35 = vmul.f32 0.5, %v7650_v49  ;;  %v3475_v33 = vadd.f32 %v7719_v32, %v7660_v20 }
 0xb13   : > { %v3434_v43 = vmul.f32 %v3402_v61, %v7813_v37  ;;  %v3436_v13 = vmul.f32 %v3404_v45, %v7823_v26  ;;  %v7874_v17 = vmul.f32 0.5, %v7660_v20  ;;  %v3503_v9 = vmul.f32 0.7978846, %v3471_v29 }
 0xb14   : > { %8240 = vst [vmem:[#allocation51_spill] sm:$0xff] %v7861_v25  ;;  %v3403_v56 = vmul.f32 0.044715, %v7849_v38  ;;  %v3507_v0 = vmul.f32 0.7978846, %v3475_v33  ;;  %v3473_v4 = vadd.f32 %v7692_v28, %v7653_v14  ;;  %v3477_v49 = vadd.f32 %v7728_v23, %v7663_v44 }
 0xb15   : > { %v7882_v25 = vmul.f32 %v3433_v15, %v7810_v51  ;;  %v3405_v32 = vmul.f32 0.044715, %v7856_v7  ;;  %5582 = vtanh.f32 %v3503_v9  ;;  %v3566_v61 = vadd.f32 1.0, %v7769_v36 }
 0xb16   : > { %5584 = vtanh.f32 %v3507_v0  ;;  %v3505_v20 = vmul.f32 0.7978846, %v3473_v4  ;;  %v3509_v45 = vmul.f32 0.7978846, %v3477_v49  ;;  %v3570_v29 = vadd.f32 1.0, %v5579_v58 }
 0xb17   : > { %v7887_v33 = vmul.f32 %v3434_v43, %v7813_v37  ;;  %v7890_v28 = vmul.f32 0.5, %v7653_v14  ;;  %v3568_v41 = vadd.f32 1.0, %v5577_v60  ;;  %v3572_v23 = vadd.f32 1.0, %v5581_v53 }
 0xb18   : > { %5586 = vtanh.f32 %v3505_v20  ;;  %v7893_v15 = vmul.f32 %v3566_v61, %v7674_v22  ;;  %v7896_v9 = vmul.f32 %v3570_v29, %v7679_v52  ;;  %v3479_v36 = vadd.f32 %v7744_v50, %v7686_v47  ;;  %v8242_v61 = vld [vmem:[#allocation44_spill] sm:$0xff]  ;;  %v8244_v29 = vld [vmem:[#allocation43_spill] sm:$0xff] }
 0xb19   : > { %5588 = vtanh.f32 %v3509_v45  ;;  %v7901_v58 = vmul.f32 %v3568_v41, %v7676_v57  ;;  %v7904_v43 = vmul.f32 %v3572_v23, %v7681_v40  ;;  %v3483_v14 = vadd.f32 %v7790_v24, %v7713_v48  ;;  %v8243_v20 = vld [vmem:[#allocation48_spill] sm:$0xff]  ;;  %v8245_v23 = vld [vmem:[#allocation47_spill] sm:$0xff] }
 0xb1a   : > { %v3435_v60 = vmul.f32 %v3403_v56, %v7849_v38  ;;  %v3437_v22 = vmul.f32 %v3405_v32, %v7856_v7  ;;  %v3630_v52 = vpack.c.bf16 %v7896_v9, %v7893_v15  ;;  %v3511_v53 = vmul.f32 0.7978846, %v3479_v36  ;;  %v8241_v56 = vld [vmem:[#allocation46_spill] sm:$0xff] }
 0xb1b   : > { %v3632_v50 = vpack.c.bf16 %v7904_v43, %v7901_v58  ;;  %v3515_v0 = vmul.f32 0.7978846, %v3483_v14  ;;  %v3481_v41 = vadd.f32 %v7756_v55, %v7698_v18  ;;  %v3485_v57 = vadd.f32 %v7796_v16, %v7716_v5  ;;  %v8246_v14 = vld [vmem:[#allocation45_spill] sm:$0xff] }
 0xb1c   : > { %v7919_v40 = vmul.f32 %v3436_v13, %v7823_v26  ;;  %v3349_v24 = vmul.f32 0.5, %v7663_v44  ;;  %5590 = vtanh.f32 %v3511_v53  ;;  %v3478_v4 = vadd.f32 %v8241_v56, %v7669_v54  ;;  %v8247_v53 = vld [vmem:[#allocation49_spill] sm:$0xff] }
 0xb1d   : > { %5592 = vtanh.f32 %v3515_v0  ;;  %v3513_v49 = vmul.f32 0.7978846, %v3481_v41  ;;  %v3517_v32 = vmul.f32 0.7978846, %v3485_v57  ;;  %v3482_v45 = vadd.f32 %v8243_v20, %v8242_v61 }
 0xb1e   : > { %v7927_v55 = vmul.f32 %v3435_v60, %v7849_v38  ;;  %v7930_v16 = vmul.f32 %v3437_v22, %v7856_v7  ;;  %v3510_v13 = vmul.f32 0.7978846, %v3478_v4  ;;  %v3480_v44 = vadd.f32 %v8245_v23, %v8244_v29 }
 0xb1f   : > { %v5583_v15 = vpop.eup %5582  ;;  %v3351_v9 = vmul.f32 0.5, %v7686_v47  ;;  %5594 = vtanh.f32 %v3513_v49  ;;  %v3514_v36 = vmul.f32 0.7978846, %v3482_v45  ;;  %v3484_v0 = vadd.f32 %v8247_v53, %v8246_v14 }
 0xb20   : > { %v5585_v41 = vpop.eup %5584  ;;  %v3567_v57 = vadd.f32 1.0, %v5583_v15  ;;  %v3355_v60 = vmul.f32 0.5, %v7713_v48  ;;  %5596 = vtanh.f32 %v3517_v32  ;;  %v3512_v56 = vmul.f32 0.7978846, %v3480_v44 }
 0xb21   : > { %v3571_v22 = vadd.f32 1.0, %v5585_v41  ;;  %5598 = vtanh.f32 %v3510_v13  ;;  %v3516_v4 = vmul.f32 0.7978846, %v3484_v0  ;;  %v3487_v20 = vadd.f32 %v7826_v39, %v7738_v8 }
 0xb22   : > { %v5587_v23 = vpop.eup %5586  ;;  %v3599_v47 = vmul.f32 %v3567_v57, %v7867_v35  ;;  %v3353_v49 = vmul.f32 0.5, %v7698_v18  ;;  %5600 = vtanh.f32 %v3514_v36  ;;  %v3491_v45 = vadd.f32 %v7843_v19, %v7773_v6 }
 0xb23   : > { %v5589_v15 = vpop.eup %5588  ;;  %v3603_v48 = vmul.f32 %v3571_v22, %v7874_v17  ;;  %v3569_v32 = vadd.f32 1.0, %v5587_v23  ;;  %5602 = vtanh.f32 %v3512_v56  ;;  %v3519_v44 = vmul.f32 0.7978846, %v3487_v20 }
 0xb24   : > { %v3573_v13 = vadd.f32 1.0, %v5589_v15  ;;  %v3357_v53 = vmul.f32 0.5, %v7716_v5  ;;  %5604 = vtanh.f32 %v3516_v4  ;;  %v3523_v39 = vmul.f32 0.7978846, %v3491_v45 }
 0xb25   : > { %v3631_v0 = vpack.c.bf16 %v3603_v48, %v3599_v47  ;;  %v3350_v35 = vmul.f32 0.5, %v7669_v54  ;;  %5606 = vtanh.f32 %v3519_v44  ;;  %v3489_v18 = vadd.f32 %v7832_v30, %v7750_v10 }
 0xb26   : > { %v5591_v36 = vpop.eup %5590  ;;  %v3601_v19 = vmul.f32 %v3569_v32, %v7890_v28  ;;  %v3605_v41 = vmul.f32 %v3573_v13, %v3349_v24  ;;  %5608 = vtanh.f32 %v3523_v39  ;;  %v3493_v17 = vadd.f32 %v7846_v42, %v7776_v59 }
 0xb27   : > { %v5593_v57 = vpop.eup %5592  ;;  %3941 = vmatprep.mubr.bf16.mxu1 %v3631_v0  ;;  %v3575_v5 = vadd.f32 1.0, %v5591_v36  ;;  %v3354_v56 = vmul.f32 0.5, %v8242_v61  ;;  %v3521_v22 = vmul.f32 0.7978846, %v3489_v18  ;;  %v3486_v54 = vadd.f32 %v7816_v31, %v7722_v27 }
 0xb28   : > { %v3633_v4 = vpack.c.bf16 %v3605_v41, %v3601_v19  ;;  %3942 = vmatmul.mubr.bf16.vlgmr.msra.gmra.mrb[64].mxu1 %v3630_v52  ;;  %v3579_v30 = vadd.f32 1.0, %v5593_v57  ;;  %v3525_v20 = vmul.f32 0.7978846, %v3493_v17  ;;  %v3490_v28 = vadd.f32 %v7835_v11, %v7753_v12 }
 0xb29   : > { %v5595_v24 = vpop.eup %5594  ;;  %v3607_v23 = vmul.f32 %v3575_v5, %v3351_v9  ;;  %v3352_v42 = vmul.f32 0.5, %v8244_v29  ;;  %5610 = vtanh.f32 %v3521_v22  ;;  %v3518_v47 = vmul.f32 0.7978846, %v3486_v54 }
 0xb2a   : > { %v5597_v45 = vpop.eup %5596  ;;  %4006 = vmatprep.mubr.bf16.mxu0 %v3633_v4  ;;  %v3611_v61 = vmul.f32 %v3579_v30, %v3355_v60  ;;  %v3577_v15 = vadd.f32 1.0, %v5595_v24  ;;  %5612 = vtanh.f32 %v3525_v20  ;;  %v3522_v48 = vmul.f32 0.7978846, %v3490_v28 }
 0xb2b   : > { %v5599_v31 = vpop.eup %5598  ;;  %4007 = vmatmul.mubr.bf16.vlgmr.msra.gmra.mrb[64].mxu0 %v3632_v50  ;;  %v3581_v52 = vadd.f32 1.0, %v5597_v45  ;;  %v3356_v11 = vmul.f32 0.5, %v8246_v14  ;;  %5614 = vtanh.f32 %v3518_v47  ;;  %v3488_v29 = vadd.f32 %v7819_v34, %v7725_v63 }
 0xb2c   : > { %v5601_v9 = vpop.eup %5600  ;;  %v3635_v32 = vpack.c.bf16 %v3611_v61, %v3607_v23  ;;  %v3609_v44 = vmul.f32 %v3577_v15, %v3353_v49  ;;  %v3574_v13 = vadd.f32 1.0, %v5599_v31  ;;  %5616 = vtanh.f32 %v3522_v48 }
 0xb2d   : > { %v5603_v60 = vpop.eup %5602  ;;  %v3613_v39 = vmul.f32 %v3581_v52, %v3357_v53  ;;  %v3578_v0 = vadd.f32 1.0, %v5601_v9  ;;  %v3492_v18 = vadd.f32 %v7840_v62, %v7761_v46  ;;  %v3520_v58 = vmul.f32 0.7978846, %v3488_v29 }
 0xb2e   : > { %v5605_v43 = vpop.eup %5604  ;;  %3949 = vmatprep.mubr.bf16.mxu1 %v3635_v32  ;;  %v3606_v50 = vmul.f32 %v3574_v13, %v3350_v35  ;;  %v3576_v14 = vadd.f32 1.0, %v5603_v60  ;;  %v3359_v36 = vmul.f32 0.5, %v7738_v8  ;;  %v3363_v34 = vmul.f32 0.5, %v7773_v6 }
 0xb2f   : > { %v5607_v19 = vpop.eup %5606  ;;  %v3637_v41 = vpack.c.bf16 %v3613_v39, %v3609_v44  ;;  %v3610_v49 = vmul.f32 %v3578_v0, %v3354_v56  ;;  %v3580_v17 = vadd.f32 1.0, %v5605_v43  ;;  %v3524_v57 = vmul.f32 0.7978846, %v3492_v18  ;;  %v8248_v18 = vld [vmem:[#allocation50_spill] sm:$0xff] }
 0xb30   : > { %v5609_v5 = vpop.eup %5608  ;;  %v3608_v53 = vmul.f32 %v3576_v14, %v3352_v42  ;;  %v3583_v22 = vadd.f32 1.0, %v5607_v19  ;;  %5618 = vtanh.f32 %v3520_v58  ;;  %v3495_v62 = vadd.f32 %v7864_v1, %v7801_v21  ;;  %v8249_v58 = vld [vmem:[#allocation51_spill] sm:$0xff] }
 0xb31   : > { %4014 = vmatprep.mubr.bf16.mxu0 %v3637_v41  ;;  %v3634_v54 = vpack.c.bf16 %v3610_v49, %v3606_v50  ;;  %v3612_v35 = vmul.f32 %v3580_v17, %v3356_v11  ;;  %v3587_v4 = vadd.f32 1.0, %v5609_v5  ;;  %5620 = vtanh.f32 %v3524_v57 }
 0xb32   : > { %v3361_v8 = vmul.f32 0.5, %v7750_v10  ;;  %v3365_v6 = vmul.f32 0.5, %v7776_v59  ;;  %v3499_v56 = vadd.f32 %v7927_v55, %v7849_v38  ;;  %v3527_v30 = vmul.f32 0.7978846, %v3495_v62 }
 0xb33   : > { %v5611_v20 = vpop.eup %5610  ;;  %3950 = vmatmul.mubr.bf16.gmra.mrb[68].mxu1 %v3634_v54  ;;  %v3636_v28 = vpack.c.bf16 %v3612_v35, %v3608_v53  ;;  %v3615_v24 = vmul.f32 %v3583_v22, %v3359_v36  ;;  %v3619_v23 = vmul.f32 %v3587_v4, %v3363_v34  ;;  %v3497_v1 = vadd.f32 %v7882_v25, %v7810_v51 }
 0xb34   : > { %v5613_v42 = vpop.eup %5612  ;;  %v3585_v47 = vadd.f32 1.0, %v5611_v20  ;;  %v3531_v45 = vmul.f32 0.7978846, %v3499_v56  ;;  %5622 = vtanh.f32 %v3527_v30  ;;  %v3501_v10 = vadd.f32 %v7930_v16, %v7856_v7 }
 0xb35   : > { %v5615_v59 = vpop.eup %5614  ;;  %4015 = vmatmul.mubr.bf16.gmra.mrb[68].mxu0 %v3636_v28  ;;  %v3639_v61 = vpack.c.bf16 %v3619_v23, %v3615_v24  ;;  %v3589_v55 = vadd.f32 1.0, %v5613_v42  ;;  %v3358_v15 = vmul.f32 0.5, %v7722_v27  ;;  %v3529_v48 = vmul.f32 0.7978846, %v3497_v1 }
 0xb36   : > { %v5617_v31 = vpop.eup %5616  ;;  %v3362_v52 = vmul.f32 0.5, %v7753_v12  ;;  %v3582_v11 = vadd.f32 1.0, %v5615_v59  ;;  %5624 = vtanh.f32 %v3531_v45  ;;  %v3533_v25 = vmul.f32 0.7978846, %v3501_v10 }
 0xb37   : > { %3957 = vmatprep.mubr.bf16.mxu1 %v3639_v61  ;;  %v3617_v29 = vmul.f32 %v3585_v47, %v3361_v8  ;;  %v3621_v9 = vmul.f32 %v3589_v55, %v3365_v6  ;;  %v3586_v32 = vadd.f32 1.0, %v5617_v31  ;;  %5626 = vtanh.f32 %v3529_v48 }
 0xb38   : > { %5628 = vtanh.f32 %v3533_v25  ;;  %v3494_v16 = vadd.f32 %v7852_v2, %v7779_v3  ;;  %v3498_v44 = vadd.f32 %v7887_v33, %v7813_v37  ;;  %v3614_v13 = vmul.f32 %v3582_v11, %v3358_v15 }
 0xb39   : > { %v3641_v27 = vpack.c.bf16 %v3621_v9, %v3617_v29  ;;  %v3618_v60 = vmul.f32 %v3586_v32, %v3362_v52  ;;  %v3496_v43 = vadd.f32 %v8249_v58, %v8248_v18  ;;  %v3500_v50 = vadd.f32 %v7919_v40, %v7823_v26 }
 0xb3a   : > { %v5619_v39 = vpop.eup %5618  ;;  %v3526_v12 = vmul.f32 0.7978846, %v3494_v16  ;;  %v3530_v0 = vmul.f32 0.7978846, %v3498_v44  ;;  %v3360_v2 = vmul.f32 0.5, %v7725_v63  ;;  %v3364_v34 = vmul.f32 0.5, %v7761_v46 }
 0xb3b   : > { %v5621_v14 = vpop.eup %5620  ;;  %4022 = vmatprep.mubr.bf16.mxu0 %v3641_v27  ;;  %v3638_v36 = vpack.c.bf16 %v3618_v60, %v3614_v13  ;;  %v3584_v33 = vadd.f32 1.0, %v5619_v39  ;;  %v3528_v41 = vmul.f32 0.7978846, %v3496_v43  ;;  %v3532_v49 = vmul.f32 0.7978846, %v3500_v50  ;;  %v8251_v50 = vld [vmem:[#allocation35_spill] sm:$0xff] }
 0xb3c   : > { %v3588_v19 = vadd.f32 1.0, %v5621_v14  ;;  %5630 = vtanh.f32 %v3526_v12  ;;  %v3367_v63 = vmul.f32 0.5, %v7801_v21  ;;  %v3371_v46 = vmul.f32 0.5, %v7849_v38 }
 0xb3d   : > { %3958 = vmatmul.mubr.bf16.gmra.mrb[72].mxu1 %v3638_v36  ;;  %5632 = vtanh.f32 %v3530_v0  ;;  %v3616_v57 = vmul.f32 %v3584_v33, %v3360_v2  ;;  %v3369_v4 = vmul.f32 0.5, %v7810_v51  ;;  %v3373_v30 = vmul.f32 0.5, %v7856_v7  ;;  %v8252_v2 = vld [vmem:[#allocation36_spill] sm:$0xff] }
 0xb3e   : > { %v5623_v17 = vpop.eup %5622  ;;  %v3620_v5 = vmul.f32 %v3588_v19, %v3364_v34  ;;  %5634 = vtanh.f32 %v3528_v41  ;;  %v3366_v45 = vmul.f32 0.5, %v7779_v3  ;;  %v3370_v10 = vmul.f32 0.5, %v7813_v37  ;;  %v8000_v37 = vld [vmem:[%s8250_s5] ss:$0 sm:$0xff] }
 0xb3f   : > { %v3591_v53 = vadd.f32 1.0, %v5623_v17  ;;  %5636 = vtanh.f32 %v3532_v49  ;;  %v3368_v7 = vmul.f32 0.5, %v8248_v18  ;;  %v3372_v48 = vmul.f32 0.5, %v7823_v26 }
 0xb40   : > { %v5625_v40 = vpop.eup %5624  ;;  %v3640_v22 = vpack.c.bf16 %v3620_v5, %v3616_v57 }
 0xb41   : > { %v5627_v62 = vpop.eup %5626  ;;  %v3595_v54 = vadd.f32 1.0, %v5625_v40  ;;  %v3623_v6 = vmul.f32 %v3591_v53, %v3367_v63 }
 0xb42   : > { %v5629_v35 = vpop.eup %5628  ;;  %4023 = vmatmul.mubr.bf16.gmra.mrb[72].mxu0 %v3640_v22  ;;  %v3593_v8 = vadd.f32 1.0, %v5627_v62 }
 0xb43   : > { %v3627_v56 = vmul.f32 %v3595_v54, %v3371_v46  ;;  %v3597_v20 = vadd.f32 1.0, %v5629_v35 }
 0xb44   : > { %v3625_v24 = vmul.f32 %v3593_v8, %v3369_v4  ;;  %v8253_v4 = vld [vmem:[#allocation38_spill] sm:$0xff] }
 0xb45   : > { %v3643_v28 = vpack.c.bf16 %v3627_v56, %v3623_v6  ;;  %v3629_v23 = vmul.f32 %v3597_v20, %v3373_v30  ;;  %v8254_v56 = vld [vmem:[#allocation37_spill] sm:$0xff] }
 0xb46   : > { %v5631_v1 = vpop.eup %5630 }
 0xb47   : > { %v5633_v42 = vpop.eup %5632  ;;  %3965 = vmatprep.mubr.bf16.mxu1 %v3643_v28  ;;  %v3645_v21 = vpack.c.bf16 %v3629_v23, %v3625_v24  ;;  %v3590_v47 = vadd.f32 1.0, %v5631_v1 }
 0xb48   : > { %v5635_v38 = vpop.eup %5634  ;;  %v3594_v51 = vadd.f32 1.0, %v5633_v42 }
 0xb49   : > { %v5637_v59 = vpop.eup %5636  ;;  %4030 = vmatprep.mubr.bf16.mxu0 %v3645_v21  ;;  %v3592_v61 = vadd.f32 1.0, %v5635_v38  ;;  %v3622_v55 = vmul.f32 %v3590_v47, %v3366_v45 }
 0xb4a   : > { %v3626_v15 = vmul.f32 %v3594_v51, %v3370_v10  ;;  %v3596_v31 = vadd.f32 1.0, %v5637_v59 }
 0xb4b   : > { %v3624_v11 = vmul.f32 %v3592_v61, %v3368_v7 }
 0xb4c   : > { %v3642_v52 = vpack.c.bf16 %v3626_v15, %v3622_v55  ;;  %v3628_v25 = vmul.f32 %v3596_v31, %v3372_v48  ;;  %v8255_v55 = vld [vmem:[#allocation39_spill] sm:$0xff]  ;;  %v8256_v31 = vld [vmem:[#allocation40_spill] sm:$0xff] }
 0xb4e   : > { %3966 = vmatmul.mubr.bf16.gmra.mrb[76].mxu1 %v3642_v52  ;;  %v3644_v29 = vpack.c.bf16 %v3628_v25, %v3624_v11 }
 0xb50   : > { %4031 = vmatmul.mubr.bf16.gmra.mrb[76].mxu0 %v3644_v29 }
 0xbfb   : > { %v4837_v3 = vpop.f32.mrb[64].mxu1 }
 0xbfc   : > { %v4838_v9 = vpop.f32.mrb[65].mxu1 }
 0xbfd   : > { %v4839_v32 = vadd.f32 %v4838_v9, %v4837_v3  ;;  %v4840_v16 = vpop.f32.mrb[66].mxu1 }
 0xbfe   : > { %v4877_v44 = vpop.f32.mrb[64].mxu0  ;;  %v4841_v27 = vpop.f32.mrb[67].mxu1 }
 0xbff   : > { %v3944_v13 = vadd.f32 %v4839_v32, %v8000_v37  ;;  %v4878_v60 = vpop.f32.mrb[65].mxu0  ;;  %v4842_v26 = vadd.f32 %v4841_v27, %v4840_v16 }
 0xc00   : > { %v4879_v39 = vadd.f32 %v4878_v60, %v4877_v44  ;;  %v4880_v12 = vpop.f32.mrb[66].mxu0 }
 0xc01   : > { %v3947_v0 = vadd.f32 %v4842_v26, %v8000_v37  ;;  %v4881_v18 = vpop.f32.mrb[67].mxu0 }
 0xc02   : > { %v4009_v58 = vadd.f32 %v4879_v39, %v3944_v13  ;;  %v4882_v43 = vadd.f32 %v4881_v18, %v4880_v12  ;;  %v8257_v18 = vld [vmem:[#allocation41_spill] sm:$0xff] }
 0xc04   : > { %v8005_v14 = vadd.f32 %v4009_v58, %v8251_v50  ;;  %v4012_v36 = vadd.f32 %v4882_v43, %v3947_v0  ;;  %v8258_v50 = vld [vmem:[#allocation42_spill] sm:$0xff] }
 0xc06   : > { %4047 = vst [vmem:[#allocation2] sm:$0xff] %v8005_v14  ;;  %v8009_v34 = vadd.f32 %v4012_v36, %v8252_v2  ;;  %v4843_v33 = vpop.f32.mrb[68].mxu1  ;;  %4061 = vadd.xlane.f32.xlu0 (!%p4683_p3), %v8005_v14 }
 0xc07   : > { %v4844_v19 = vpop.f32.mrb[69].mxu1 }
 0xc08   : > { %4048 = vst [vmem:[#allocation2 + $0x8] sm:$0xff] %v8009_v34  ;;  %v4883_v41 = vpop.f32.mrb[68].mxu0  ;;  %v4845_v49 = vadd.f32 %v4844_v19, %v4843_v33  ;;  %v4846_v17 = vpop.f32.mrb[70].mxu1 }
 0xc09   : > { %v4884_v57 = vpop.f32.mrb[69].mxu0  ;;  %v4847_v5 = vpop.f32.mrb[71].mxu1 }
 0xc0a   : > { %v3952_v53 = vadd.f32 %v4845_v49, %v8000_v37  ;;  %v4885_v40 = vadd.f32 %v4884_v57, %v4883_v41  ;;  %v4886_v22 = vpop.f32.mrb[70].mxu0  ;;  %v4848_v62 = vadd.f32 %v4847_v5, %v4846_v17  ;;  %4063 = vadd.xlane.f32.xlu0 (!%p4683_p3), %v8009_v34 }
 0xc0b   : > { %v4887_v63 = vpop.f32.mrb[71].mxu0 }
 0xc0c   : > { %v4017_v46 = vadd.f32 %v4885_v40, %v3952_v53  ;;  %v3955_v54 = vadd.f32 %v4848_v62, %v8000_v37  ;;  %v4888_v35 = vadd.f32 %v4887_v63, %v4886_v22 }
 0xc0e   : > { %v4041_v8 = vadd.f32 %v4017_v46, %v8253_v4  ;;  %v4020_v6 = vadd.f32 %v4888_v35, %v3955_v54 }
 0xc10   : > { %4049 = vst [vmem:[#allocation2 + $0x10] sm:$0xff] %v4041_v8  ;;  %v8016_v30 = vadd.f32 %v4020_v6, %v8254_v56  ;;  %v4849_v20 = vpop.f32.mrb[72].mxu1  ;;  %4065 = vadd.xlane.f32.xlu1 (!%p4683_p3), %v4041_v8 }
 0xc11   : > { %v4850_v28 = vpop.f32.mrb[73].mxu1 }
 0xc12   : > { %4050 = vst [vmem:[#allocation2 + $0x18] sm:$0xff] %v8016_v30  ;;  %v4851_v24 = vadd.f32 %v4850_v28, %v4849_v20  ;;  %v4852_v23 = vpop.f32.mrb[74].mxu1 }
 0xc13   : > { %v4853_v1 = vpop.f32.mrb[75].mxu1 }
 0xc14   : > { %v4854_v42 = vadd.f32 %v4853_v1, %v4852_v23  ;;  %v3960_v47 = vadd.f32 %v4851_v24, %v8000_v37  ;;  %4067 = vadd.xlane.f32.xlu1 (!%p4683_p3), %v8016_v30 }
 0xc15   : > { %v4889_v21 = vpop.f32.mrb[72].mxu0 }
 0xc16   : > { %v4890_v38 = vpop.f32.mrb[73].mxu0  ;;  %v3963_v51 = vadd.f32 %v4854_v42, %v8000_v37 }
 0xc17   : > { %v4891_v45 = vadd.f32 %v4890_v38, %v4889_v21  ;;  %v4892_v10 = vpop.f32.mrb[74].mxu0 }
 0xc18   : > { %v4893_v59 = vpop.f32.mrb[75].mxu0 }
 0xc19   : > { %v4025_v7 = vadd.f32 %v4891_v45, %v3960_v47  ;;  %v4894_v61 = vadd.f32 %v4893_v59, %v4892_v10 }
 0xc1b   : > { %v4043_v15 = vadd.f32 %v4025_v7, %v8255_v55  ;;  %v4028_v48 = vadd.f32 %v4894_v61, %v3963_v51 }
 0xc1d   : > { %4051 = vst [vmem:[#allocation2 + $0x20] sm:$0xff] %v4043_v15  ;;  %v4044_v52 = vadd.f32 %v4028_v48, %v8256_v31  ;;  %4069 = vadd.xlane.f32.xlu0 (!%p4683_p3), %v4043_v15 }
 0xc1f   : > { %4052 = vst [vmem:[#allocation2 + $0x28] sm:$0xff] %v4044_v52  ;;  %4071 = vadd.xlane.f32.xlu1 (!%p4683_p3), %v4044_v52 }
 0xc21   : > { %v4855_v11 = vpop.f32.mrb[76].mxu1 }
 0xc22   : > { %v4856_v25 = vpop.f32.mrb[77].mxu1 }
 0xc23   : > { %v4895_v29 = vpop.f32.mrb[76].mxu0  ;;  %v4857_v3 = vadd.f32 %v4856_v25, %v4855_v11  ;;  %v4858_v9 = vpop.f32.mrb[78].mxu1 }
 0xc24   : > { %v4896_v32 = vpop.f32.mrb[77].mxu0  ;;  %v4859_v16 = vpop.f32.mrb[79].mxu1 }
 0xc25   : > { %v3968_v44 = vadd.f32 %v4857_v3, %v8000_v37  ;;  %v4897_v27 = vadd.f32 %v4896_v32, %v4895_v29  ;;  %v4898_v13 = vpop.f32.mrb[78].mxu0  ;;  %v4860_v60 = vadd.f32 %v4859_v16, %v4858_v9 }
 0xc26   : > { %v4899_v26 = vpop.f32.mrb[79].mxu0 }
 0xc27   : > { %v4033_v39 = vadd.f32 %v4897_v27, %v3968_v44  ;;  %v3971_v12 = vadd.f32 %v4860_v60, %v8000_v37  ;;  %v4900_v0 = vadd.f32 %v4899_v26, %v4898_v13  ;;  %4058 = sbr.rel (%p4683_p3) target bundleno = 3431 (0xd67), region = 132 }
 0xc29   : > { %v4045_v58 = vadd.f32 %v4033_v39, %v8257_v18  ;;  %v4036_v43 = vadd.f32 %v4900_v0, %v3971_v12  ;;  %v4684_v39 = vld [vmem:[%s8260_s29] ss:$0 sm:$0xff] (!%p4683_p3) }
 0xc2b   : > { %4053 = vst [vmem:[#allocation2 + $0x30] sm:$0xff] %v4045_v58  ;;  %v4046_v36 = vadd.f32 %v4036_v43, %v8258_v50  ;;  %4073 = vadd.xlane.f32.xlu0 (!%p4683_p3), %v4045_v58 }
 0xc2d   : > { %4054 = vst [vmem:[#allocation2 + $0x38] sm:$0xff] %v4046_v36  ;;  %4075 = vadd.xlane.f32.xlu1 (!%p4683_p3), %v4046_v36 }
 0xc93   : > { %v4062_v37 = vpop.xlane.xlu0 %4061 }
 0xc94   : > { %v4077_v33 = vmul.f32 0.0078125, %v4062_v37 }
 0xc96   : > { %v8032_v41 = vsub.f32 %v8005_v14, %v4077_v33 }
 0xc97   : > { %v4064_v17 = vpop.xlane.xlu0 %4063 }
 0xc98   : > { %v4078_v5 = vmul.f32 0.0078125, %v4064_v17  ;;  %v4093_v53 = vmul.f32 %v8032_v41, %v8032_v41 }
 0xc9a   : > { %v8039_v22 = vsub.f32 %v8009_v34, %v4078_v5  ;;  %4101 = vadd.xlane.f32.xlu0 %v4093_v53 }
 0xc9c   : > { %v4094_v35 = vmul.f32 %v8039_v22, %v8039_v22 }
 0xc9d   : > { %v4066_v2 = vpop.xlane.xlu1 %4065 }
 0xc9e   : > { %v4079_v19 = vmul.f32 0.0078125, %v4066_v2  ;;  %4103 = vadd.xlane.f32.xlu1 %v4094_v35 }
 0xca0   : > { %v8034_v49 = vsub.f32 %v4041_v8, %v4079_v19 }
 0xca1   : > { %v4068_v57 = vpop.xlane.xlu1 %4067 }
 0xca2   : > { %v4080_v40 = vmul.f32 0.0078125, %v4068_v57  ;;  %v4095_v14 = vmul.f32 %v8034_v49, %v8034_v49 }
 0xca4   : > { %v8042_v62 = vsub.f32 %v8016_v30, %v4080_v40  ;;  %4105 = vadd.xlane.f32.xlu0 %v4095_v14 }
 0xca6   : > { %v4096_v6 = vmul.f32 %v8042_v62, %v8042_v62 }
 0xca8   : > { %4107 = vadd.xlane.f32.xlu1 %v4096_v6 }
 0xcaa   : > { %v4070_v63 = vpop.xlane.xlu0 %4069 }
 0xcab   : > { %v4081_v54 = vmul.f32 0.0078125, %v4070_v63 }
 0xcac   : > { %v4072_v46 = vpop.xlane.xlu1 %4071 }
 0xcad   : > { %v4082_v4 = vmul.f32 0.0078125, %v4072_v46  ;;  %v8048_v8 = vsub.f32 %v4043_v15, %v4081_v54 }
 0xcaf   : > { %v8050_v34 = vsub.f32 %v4044_v52, %v4082_v4  ;;  %v4097_v28 = vmul.f32 %v8048_v8, %v8048_v8 }
 0xcb1   : > { %4109 = vadd.xlane.f32.xlu0 %v4097_v28  ;;  %v4098_v42 = vmul.f32 %v8050_v34, %v8050_v34 }
 0xcb3   : > { %4111 = vadd.xlane.f32.xlu1 %v4098_v42 }
 0xcb8   : > { %v4074_v56 = vpop.xlane.xlu0 %4073 }
 0xcb9   : > { %v4083_v20 = vmul.f32 0.0078125, %v4074_v56 }
 0xcba   : > { %v4076_v30 = vpop.xlane.xlu1 %4075 }
 0xcbb   : > { %v4084_v24 = vmul.f32 0.0078125, %v4076_v30  ;;  %v8056_v23 = vsub.f32 %v4045_v58, %v4083_v20 }
 0xcbd   : > { %v8058_v1 = vsub.f32 %v4046_v36, %v4084_v24  ;;  %v4099_v21 = vmul.f32 %v8056_v23, %v8056_v23  ;;  %v4685_v36 = vld [vmem:[#allocation19] ss:$0 sm:$0xff] }
 0xcbf   : > { %4113 = vadd.xlane.f32.xlu0 %v4099_v21  ;;  %v4100_v47 = vmul.f32 %v8058_v1, %v8058_v1 }
 0xcc1   : > { %4115 = vadd.xlane.f32.xlu1 %v4100_v47 }
 0xd27   : > { %v4102_v38 = vpop.xlane.xlu0 %4101 }
 0xd28   : > { %v4117_v45 = vmul.f32 0.0078125, %v4102_v38 }
 0xd2a   : > { %v4125_v10 = vadd.f32 1e-05, %v4117_v45 }
 0xd2b   : > { %v4104_v51 = vpop.xlane.xlu1 %4103 }
 0xd2c   : > { %5646 = vrsqrt.f32 %v4125_v10  ;;  %v4118_v7 = vmul.f32 0.0078125, %v4104_v51 }
 0xd2e   : > { %v4126_v55 = vadd.f32 1e-05, %v4118_v7 }
 0xd30   : > { %5648 = vrsqrt.f32 %v4126_v55 }
 0xd31   : > { %v4106_v59 = vpop.xlane.xlu0 %4105 }
 0xd32   : > { %v4119_v61 = vmul.f32 0.0078125, %v4106_v59 }
 0xd34   : > { %v4127_v15 = vadd.f32 1e-05, %v4119_v61 }
 0xd35   : > { %v4108_v48 = vpop.xlane.xlu1 %4107 }
 0xd36   : > { %v4120_v52 = vmul.f32 0.0078125, %v4108_v48  ;;  %5650 = vrsqrt.f32 %v4127_v15  ;;  %v5647_v44 = vpop.eup %5646 }
 0xd37   : > { %v4141_v60 = vmul.f32 %v5647_v44, %v8032_v41 }
 0xd38   : > { %v4128_v25 = vadd.f32 1e-05, %v4120_v52 }
 0xd39   : > { %v4155_v43 = vmul.f32 %v4684_v39, %v4141_v60 }
 0xd3a   : > { %5652 = vrsqrt.f32 %v4128_v25  ;;  %v5649_v0 = vpop.eup %5648 }
 0xd3b   : > { %v4142_v50 = vmul.f32 %v5649_v0, %v8039_v22  ;;  %v4169_v41 = vadd.f32 %v4685_v36, %v4155_v43 }
 0xd3d   : > { %v4156_v2 = vmul.f32 %v4684_v39, %v4142_v50 }
 0xd3e   : > { %v4110_v31 = vpop.xlane.xlu0 %4109 }
 0xd3f   : > { %v4121_v11 = vmul.f32 0.0078125, %v4110_v31  ;;  %v4170_v17 = vadd.f32 %v4685_v36, %v4156_v2 }
 0xd40   : > { %v4112_v3 = vpop.xlane.xlu1 %4111  ;;  %v5651_v58 = vpop.eup %5650 }
 0xd41   : > { %v4129_v29 = vadd.f32 1e-05, %v4121_v11  ;;  %v4122_v32 = vmul.f32 0.0078125, %v4112_v3  ;;  %v4143_v37 = vmul.f32 %v5651_v58, %v8034_v49  ;;  %v4713_v40 = vpack.c.bf16 %v4170_v17, %v4169_v41 }
 0xd43   : > { %5654 = vrsqrt.f32 %v4129_v29  ;;  %v4130_v27 = vadd.f32 1e-05, %v4122_v32  ;;  %v4157_v57 = vmul.f32 %v4684_v39, %v4143_v37  ;;  %4714 = vst [vmem:[%s6666_s10] sm:$0xff] %v4713_v40  }
 0xd44   : > { %v5653_v33 = vpop.eup %5652 }
 0xd45   : > { %5656 = vrsqrt.f32 %v4130_v27  ;;  %v4144_v5 = vmul.f32 %v5653_v33, %v8042_v62  ;;  %v4171_v46 = vadd.f32 %v4685_v36, %v4157_v57 }
 0xd47   : > { %v4158_v14 = vmul.f32 %v4684_v39, %v4144_v5 }
 0xd49   : > { %v4172_v49 = vadd.f32 %v4685_v36, %v4158_v14 }
 0xd4b   : > { %v4718_v6 = vpack.c.bf16 %v4172_v49, %v4171_v46 }
 0xd4c   : > { %v4114_v9 = vpop.xlane.xlu0 %4113 }
 0xd4d   : > { %v4123_v16 = vmul.f32 0.0078125, %v4114_v9  ;;  %v5655_v19 = vpop.eup %5654  ;;  %4730 = vst [vmem:[%s6666_s10 + $0x8] sm:$0xff] %v4718_v6  }
 0xd4e   : > { %v4116_v26 = vpop.xlane.xlu1 %4115  ;;  %v4145_v53 = vmul.f32 %v5655_v19, %v8048_v8 }
 0xd4f   : > { %v4131_v13 = vadd.f32 1e-05, %v4123_v16  ;;  %v4124_v12 = vmul.f32 0.0078125, %v4116_v26  ;;  %v5657_v63 = vpop.eup %5656 }
 0xd50   : > { %v4159_v54 = vmul.f32 %v4684_v39, %v4145_v53  ;;  %v4146_v35 = vmul.f32 %v5657_v63, %v8050_v34 }
 0xd51   : > { %5658 = vrsqrt.f32 %v4131_v13  ;;  %v4132_v18 = vadd.f32 1e-05, %v4124_v12 }
 0xd52   : > { %v4160_v56 = vmul.f32 %v4684_v39, %v4146_v35  ;;  %v4173_v62 = vadd.f32 %v4685_v36, %v4159_v54 }
 0xd53   : > { %5660 = vrsqrt.f32 %v4132_v18 }
 0xd54   : > { %v4174_v8 = vadd.f32 %v4685_v36, %v4160_v56 }
 0xd56   : > { %v4723_v24 = vpack.c.bf16 %v4174_v8, %v4173_v62 }
 0xd58   : > { %4731 = vst [vmem:[%s6666_s10 + $0x10] sm:$0xff] %v4723_v24  }
 0xd5b   : > { %v5659_v22 = vpop.eup %5658 }
 0xd5c   : > { %v4147_v4 = vmul.f32 %v5659_v22, %v8056_v23 }
 0xd5d   : > { %v5661_v30 = vpop.eup %5660 }
 0xd5e   : > { %v4161_v20 = vmul.f32 %v4684_v39, %v4147_v4  ;;  %v4148_v28 = vmul.f32 %v5661_v30, %v8058_v1 }
 0xd60   : > { %v4162_v42 = vmul.f32 %v4684_v39, %v4148_v28  ;;  %v4175_v21 = vadd.f32 %v4685_v36, %v4161_v20 }
 0xd62   : > { %v4176_v47 = vadd.f32 %v4685_v36, %v4162_v42 }
 0xd64   : > { %v4728_v38 = vpack.c.bf16 %v4176_v47, %v4175_v21 }
 0xd66   : > { %4732 = vst [vmem:[%s6666_s10 + $0x18] sm:$0xff] %v4728_v38  }
 0xd67 PF: > { %s43_s25 = sadd.s32 1, %s6080_s25   ;;  %s8261_s27 = sld [smem:[#allocation27_spill]] }
 0xd68   : > { %p40_p2 = scmp.ge.s32.totalorder %s43_s25, 6   ;;  %s8262_s20 = sld [smem:[#allocation33_spill]] }
 0xd69   : > { %s8263_s22 = sld [smem:[#allocation30_spill]]  ;;  %s8264_s13 = sld [smem:[#allocation31_spill]] }
 0xd6a   : > { %s8265_s24 = sld [smem:[#allocation32_spill]]  ;;  %s8266_s18 = smov %s6056_s19 }
 0xd6b   : > { %s8268_s21 = smov %s6072_s23  ;;  %42 = sbr.rel (!%p40_p2) target bundleno = 31 (0x1f), region = 250 }
 0xd6d   : > { %s8267_s19 = smov %s8261_s27 }
 0xd6f   : > { %s8269_s23 = smov %s8264_s13 }
 0xd72   :  { %4238 = vsyncpa [#allocation4], 1 }
 0xd73   :  { %4240 = vsyncpa [#allocation4 + $0x1], 1 }
 0xd74   :  { %4241 = vsyncpa [#allocation6], 1 }
 0xd75   :  { %4243 = vsyncpa [#allocation6 + $0x1], 1 }
 0xd76   :  { %4244 = vsyncpa [#allocation9], 1 }
 0xd77   :  { %4246 = vsyncpa [#allocation9 + $0x1], 1 }
 0xd78   :  { %4247 = vsyncpa [#allocation12], 1 }
 0xd79   :  { %4249 = vsyncpa [#allocation12 + $0x1], 1 }
 0xd7a   :  { %4250 = vsyncpa [#allocation15], 1 }
 0xd7b   :  { %4252 = vsyncpa [#allocation15 + $0x1], 1 }
 0xd7c   :  { %4253 = vsyncpa [#allocation18], 1 }
 0xd7d   :  { %4255 = vsyncpa [#allocation18 + $0x1], 1 }

</bundles_post_ra>
